<compile_context>
chip_gen: v7x
topology: tpu7x:2x2x1
jax: 0.10.0
libtpu: 0.0.40
codegen_flags: <defaults>
</compile_context>

<pallas_src>
import functools
import numpy as np
import jax
import jax.numpy as jnp
from jax.experimental import pallas as pl
from jax.experimental.pallas import tpu as pltpu


# ------------------------------ small helpers ------------------------------

def _round_up(x, m):
    return ((x + m - 1) // m) * m


def _silu(x):
    return x * (1.0 / (1.0 + jnp.exp(-x)))


def _init(key, shape, scale=0.05):
    return scale * jax.random.normal(key, shape, jnp.float32)


def upsample_nearest2x(x):  # NCHW
    return jnp.repeat(jnp.repeat(x, 2, axis=2), 2, axis=3)


def _as_rows128(x):
    """Flatten to a zero-padded (rows, 128) lane-dense slab; returns (arr, tile_rows, n)."""
    flat = x.reshape(-1).astype(jnp.float32)
    n = flat.size
    rows = -(-n // 128)
    if rows > 512:
        tr = 512
        rows = _round_up(rows, 512)
    else:
        tr = _round_up(rows, 8)
        rows = tr
    pad = rows * 128 - n
    return jnp.pad(flat, (0, pad)).reshape(rows, 128), tr, n


# ------------------------- tiled fused matmul kernel -------------------------

def _matmul_kernel(a_ref, b_ref, bias_ref, o_ref, acc_ref, *, activation):
    @pl.when(pl.program_id(2) == 0)
    def _init_acc():
        acc_ref[...] = jnp.zeros_like(acc_ref)

    acc_ref[...] += jnp.dot(a_ref[...], b_ref[...],
                            preferred_element_type=jnp.float32)

    @pl.when(pl.program_id(2) == pl.num_programs(2) - 1)
    def _finalize():
        y = acc_ref[...] + bias_ref[...]
        if activation == "silu":
            y = _silu(y)
        o_ref[...] = y.astype(o_ref.dtype)


def fused_matmul(a, b, bias=None, activation="none", out_dtype=jnp.bfloat16):
    """(M,K)@(K,N)+bias (+SiLU): bf16 MXU operands, f32 VMEM accumulation,
    bf16 output.  Small K/N stay unpadded (no zero-padded MXU work, no lane
    write amplification); N tile is 256 where possible to fill v6e/v7x MXU."""
    M, K = a.shape
    K2, N = b.shape
    assert K == K2
    if bias is None:
        bias = jnp.zeros((N,), jnp.float32)

    # N tiling: never pad tiny channel counts out to 128 lanes.
    if N < 128:
        Np, tn = N, N
    else:
        Np = _round_up(N, 128)
        tn = 256 if Np % 256 == 0 else 128
    # K tiling: single unpadded pass for K <= 512, else 128-aligned tiles.
    if K <= 512:
        Kp, tk = K, K
    else:
        Kp = _round_up(K, 128)
        tk = 512 if Kp % 512 == 0 else (256 if Kp % 256 == 0 else 128)
    # M tiling.
    Mp = _round_up(M, 8)
    if Mp > 512:
        Mp = _round_up(Mp, 256)
        tm = 256
    else:
        tm = Mp
    assert Kp % tk == 0 and Np % tn == 0 and Mp % tm == 0

    a_p = jnp.pad(a.astype(jnp.bfloat16), ((0, Mp - M), (0, Kp - K)))
    b_p = jnp.pad(b.astype(jnp.bfloat16), ((0, Kp - K), (0, Np - N)))
    bias_p = jnp.pad(bias.astype(jnp.float32), (0, Np - N)).reshape(1, Np)

    out = pl.pallas_call(
        functools.partial(_matmul_kernel, activation=activation),
        out_shape=jax.ShapeDtypeStruct((Mp, Np), out_dtype),
        grid=(Mp // tm, Np // tn, Kp // tk),
        in_specs=[pl.BlockSpec((tm, tk), lambda i, j, k: (i, k)),
                  pl.BlockSpec((tk, tn), lambda i, j, k: (k, j)),
                  pl.BlockSpec((1, tn), lambda i, j, k: (0, j))],
        out_specs=pl.BlockSpec((tm, tn), lambda i, j, k: (i, j)),
        scratch_shapes=[pltpu.VMEM((tm, tn), jnp.float32)],
        compiler_params=pltpu.CompilerParams(
            dimension_semantics=("parallel", "parallel", "arbitrary"),
            vmem_limit_bytes=32 * 1024 * 1024),
    )(a_p, b_p, bias_p)
    return out[:M, :N]


# ------------- 3x3 stride-1 conv: spatial-on-lanes, one K=9*Cin dot -------------

def _conv3x3_kernel(x_ref, w_ref, b_ref, add_ref, o_ref, *, wp, n_out, activation):
    # x_ref: (1, Cin, n_in) bf16, spatial (row-major over padded (H+2, W+2)) on lanes.
    # Build a (9*Cin, n_out) im2col slab in VMEM (9 static lane-shifted slices),
    # then ONE MXU dot with the (Cout, 9*Cin) weight -> (Cout, n_out) output,
    # which is already lane-dense (spatial on lanes, Cout on sublanes).
    x = x_ref[0]
    taps = [x[:, ki * wp + kj: ki * wp + kj + n_out]
            for ki in range(3) for kj in range(3)]
    xim = jnp.concatenate(taps, axis=0)                          # (9*Cin, n_out)
    y = jnp.dot(w_ref[...], xim, preferred_element_type=jnp.float32)
    y = y + b_ref[...] + add_ref[...]
    if activation == "silu":
        y = _silu(y)
    o_ref[0] = y.astype(o_ref.dtype)


def conv3x3_s1(x_nchw, w_hwio, b, activation="none", add_vec=None,
               out_dtype=jnp.bfloat16):
    """3x3 / stride-1 / pad-1 conv, NCHW in / NCHW out.  bias + broadcast add +
    SiLU fused.  Output has no lane padding (spatial is the lane dim).
    # TODO(synk): at full 512x512 scale this needs halo-tiling over output rows
    # and DMA-delivered tap windows instead of whole-image VMEM residency."""
    B, Cin, H, W = x_nchw.shape
    Cout = w_hwio.shape[3]
    Wp = W + 2
    n_out = H * Wp                       # two garbage columns sliced off below
    n_in = (H + 2) * Wp + 2              # +2 slack lanes for the (2,2) tap

    xp = jnp.pad(x_nchw, ((0, 0), (0, 0), (1, 1), (1, 1)))
    xf = xp.reshape(B, Cin, (H + 2) * Wp)
    xf = jnp.pad(xf, ((0, 0), (0, 0), (0, 2))).astype(jnp.bfloat16)

    # (ki,kj,ci,co) -> (co, ki*3*Cin + kj*Cin + ci), matching the tap/concat order.
    w_mat = jnp.transpose(w_hwio, (3, 0, 1, 2)).reshape(Cout, 9 * Cin)
    w_mat = w_mat.astype(jnp.bfloat16)
    b_col = b.reshape(Cout, 1).astype(jnp.float32)
    if add_vec is None:
        add_col = jnp.zeros((Cout, 1), jnp.float32)
    else:
        add_col = add_vec.reshape(-1).astype(jnp.float32).reshape(Cout, 1)

    out = pl.pallas_call(
        functools.partial(_conv3x3_kernel, wp=Wp, n_out=n_out,
                          activation=activation),
        out_shape=jax.ShapeDtypeStruct((B, Cout, n_out), out_dtype),
        grid=(B,),
        in_specs=[pl.BlockSpec((1, Cin, n_in), lambda bi: (bi, 0, 0)),
                  pl.BlockSpec((Cout, 9 * Cin), lambda bi: (0, 0)),
                  pl.BlockSpec((Cout, 1), lambda bi: (0, 0)),
                  pl.BlockSpec((Cout, 1), lambda bi: (0, 0))],
        out_specs=pl.BlockSpec((1, Cout, n_out), lambda bi: (bi, 0, 0)),
        compiler_params=pltpu.CompilerParams(
            dimension_semantics=("parallel",)),
    )(xf, w_mat, b_col, add_col)
    return out.reshape(B, Cout, H, Wp)[:, :, :, :W]              # NCHW


# --------------------------- fused attention kernels ---------------------------

def _self_attention_kernel(x_ref, wqkv_ref, bqkv_ref, wo_ref, bo_ref,
                           g_ref, beta_ref, o_ref, *, dh):
    # pre-LN -> fused QKV (scale folded into Wq) -> softmax -> PV -> Wo -> residual
    x = x_ref[0].astype(jnp.float32)
    mu = jnp.mean(x, axis=-1, keepdims=True)
    var = jnp.mean(jnp.square(x - mu), axis=-1, keepdims=True)
    xn = (x - mu) * jax.lax.rsqrt(var + 1e-5) * g_ref[...] + beta_ref[...]
    qkv = jnp.dot(xn.astype(jnp.bfloat16), wqkv_ref[...],
                  preferred_element_type=jnp.float32) + bqkv_ref[...]
    q = qkv[:, :dh]
    k = qkv[:, dh:2 * dh]
    v = qkv[:, 2 * dh:3 * dh]
    s = jax.lax.dot_general(q.astype(jnp.bfloat16), k.astype(jnp.bfloat16),
                            (((1,), (1,)), ((), ())),
                            preferred_element_type=jnp.float32)
    s = s - jnp.max(s, axis=-1, keepdims=True)
    e = jnp.exp(s)
    p = e * pl.reciprocal(jnp.sum(e, axis=-1, keepdims=True), approx=True)
    o = jnp.dot(p.astype(jnp.bfloat16), v.astype(jnp.bfloat16),
                preferred_element_type=jnp.float32)
    out = jnp.dot(o.astype(jnp.bfloat16), wo_ref[...],
                  preferred_element_type=jnp.float32) + bo_ref[...]
    o_ref[0] = (x + out).astype(o_ref.dtype)


def fused_self_attention(x, wqkv, bqkv, wo, bo, ln_g, ln_b,
                         out_dtype=jnp.bfloat16):
    B, S, D = x.shape
    Dh3 = wqkv.shape[1]
    dh = Dh3 // 3
    # TODO(synk): at Sq=4096 (512x512 latents) this needs flash-style Skv tiling.
    return pl.pallas_call(
        functools.partial(_self_attention_kernel, dh=dh),
        out_shape=jax.ShapeDtypeStruct((B, S, D), out_dtype),
        grid=(B,),
        in_specs=[pl.BlockSpec((1, S, D), lambda b: (b, 0, 0)),
                  pl.BlockSpec((D, Dh3), lambda b: (0, 0)),
                  pl.BlockSpec((1, Dh3), lambda b: (0, 0)),
                  pl.BlockSpec((dh, D), lambda b: (0, 0)),
                  pl.BlockSpec((1, D), lambda b: (0, 0)),
                  pl.BlockSpec((1, D), lambda b: (0, 0)),
                  pl.BlockSpec((1, D), lambda b: (0, 0))],
        out_specs=pl.BlockSpec((1, S, D), lambda b: (b, 0, 0)),
        compiler_params=pltpu.CompilerParams(
            dimension_semantics=("parallel",)),
    )(x.astype(jnp.float32), wqkv.astype(jnp.bfloat16),
      bqkv.reshape(1, Dh3).astype(jnp.float32),
      wo.astype(jnp.bfloat16), bo.reshape(1, D).astype(jnp.float32),
      ln_g.reshape(1, D).astype(jnp.float32),
      ln_b.reshape(1, D).astype(jnp.float32))


def _cross_attention_kernel(x_ref, kv_ref, wq_ref, bq_ref, wkv_ref, bkv_ref,
                            wo_ref, bo_ref, o_ref, *, dh):
    x = x_ref[0].astype(jnp.float32)
    q = jnp.dot(x.astype(jnp.bfloat16), wq_ref[...],
                preferred_element_type=jnp.float32) + bq_ref[...]
    kvp = jnp.dot(kv_ref[0].astype(jnp.bfloat16), wkv_ref[...],
                  preferred_element_type=jnp.float32) + bkv_ref[...]
    k = kvp[:, :dh]
    v = kvp[:, dh:2 * dh]
    s = jax.lax.dot_general(q.astype(jnp.bfloat16), k.astype(jnp.bfloat16),
                            (((1,), (1,)), ((), ())),
                            preferred_element_type=jnp.float32)
    s = s - jnp.max(s, axis=-1, keepdims=True)
    e = jnp.exp(s)
    p = e * pl.reciprocal(jnp.sum(e, axis=-1, keepdims=True), approx=True)
    o = jnp.dot(p.astype(jnp.bfloat16), v.astype(jnp.bfloat16),
                preferred_element_type=jnp.float32)
    out = jnp.dot(o.astype(jnp.bfloat16), wo_ref[...],
                  preferred_element_type=jnp.float32) + bo_ref[...]
    o_ref[0] = (x + out).astype(o_ref.dtype)


def fused_cross_attention(x, kv, wq, bq, wkv, bkv, wo, bo,
                          out_dtype=jnp.bfloat16):
    B, Sq, Dq = x.shape
    _, Skv, Dkv = kv.shape
    Dh2 = wkv.shape[1]
    dh = Dh2 // 2
    return pl.pallas_call(
        functools.partial(_cross_attention_kernel, dh=dh),
        out_shape=jax.ShapeDtypeStruct((B, Sq, Dq), out_dtype),
        grid=(B,),
        in_specs=[pl.BlockSpec((1, Sq, Dq), lambda b: (b, 0, 0)),
                  pl.BlockSpec((1, Skv, Dkv), lambda b: (b, 0, 0)),
                  pl.BlockSpec((Dq, dh), lambda b: (0, 0)),
                  pl.BlockSpec((1, dh), lambda b: (0, 0)),
                  pl.BlockSpec((Dkv, Dh2), lambda b: (0, 0)),
                  pl.BlockSpec((1, Dh2), lambda b: (0, 0)),
                  pl.BlockSpec((dh, Dq), lambda b: (0, 0)),
                  pl.BlockSpec((1, Dq), lambda b: (0, 0))],
        out_specs=pl.BlockSpec((1, Sq, Dq), lambda b: (b, 0, 0)),
        compiler_params=pltpu.CompilerParams(
            dimension_semantics=("parallel",)),
    )(x.astype(jnp.float32), kv.astype(jnp.bfloat16),
      wq.astype(jnp.bfloat16), bq.reshape(1, dh).astype(jnp.float32),
      wkv.astype(jnp.bfloat16), bkv.reshape(1, Dh2).astype(jnp.float32),
      wo.astype(jnp.bfloat16), bo.reshape(1, Dq).astype(jnp.float32))


# ------------------------------ fused CLIP FFN ------------------------------

def _clip_ffn_kernel(x_ref, w1_ref, b1_ref, w2_ref, b2_ref,
                     g2_ref, beta2_ref, gf_ref, betaf_ref, o_ref):
    x = x_ref[...].astype(jnp.float32)
    mu = jnp.mean(x, axis=-1, keepdims=True)
    var = jnp.mean(jnp.square(x - mu), axis=-1, keepdims=True)
    xn = (x - mu) * jax.lax.rsqrt(var + 1e-5) * g2_ref[...] + beta2_ref[...]
    h = jnp.dot(xn.astype(jnp.bfloat16), w1_ref[...],
                preferred_element_type=jnp.float32) + b1_ref[...]
    h = _silu(h)
    y = x + jnp.dot(h.astype(jnp.bfloat16), w2_ref[...],
                    preferred_element_type=jnp.float32) + b2_ref[...]
    mu2 = jnp.mean(y, axis=-1, keepdims=True)
    var2 = jnp.mean(jnp.square(y - mu2), axis=-1, keepdims=True)
    o_ref[...] = ((y - mu2) * jax.lax.rsqrt(var2 + 1e-5) * gf_ref[...]
                  + betaf_ref[...]).astype(o_ref.dtype)


def clip_ffn(x2d, w1, b1, w2, b2, g2, beta2, gf, betaf, out_dtype=jnp.bfloat16):
    """Fused LN -> W1 -> SiLU -> W2 -> residual -> final LN over all B*S rows."""
    M, D = x2d.shape
    Dh = w1.shape[1]
    Mp = _round_up(M, 8)
    if Mp > 512:
        Mp = _round_up(Mp, 256)
        tm = 256
    else:
        tm = Mp
    xp = jnp.pad(x2d.astype(jnp.float32), ((0, Mp - M), (0, 0)))
    out = pl.pallas_call(
        _clip_ffn_kernel,
        out_shape=jax.ShapeDtypeStruct((Mp, D), out_dtype),
        grid=(Mp // tm,),
        in_specs=[pl.BlockSpec((tm, D), lambda i: (i, 0)),
                  pl.BlockSpec((D, Dh), lambda i: (0, 0)),
                  pl.BlockSpec((1, Dh), lambda i: (0, 0)),
                  pl.BlockSpec((Dh, D), lambda i: (0, 0)),
                  pl.BlockSpec((1, D), lambda i: (0, 0)),
                  pl.BlockSpec((1, D), lambda i: (0, 0)),
                  pl.BlockSpec((1, D), lambda i: (0, 0)),
                  pl.BlockSpec((1, D), lambda i: (0, 0)),
                  pl.BlockSpec((1, D), lambda i: (0, 0))],
        out_specs=pl.BlockSpec((tm, D), lambda i: (i, 0)),
        compiler_params=pltpu.CompilerParams(
            dimension_semantics=("parallel",)),
    )(xp, w1.astype(jnp.bfloat16), b1.reshape(1, Dh).astype(jnp.float32),
      w2.astype(jnp.bfloat16), b2.reshape(1, D).astype(jnp.float32),
      g2.reshape(1, D).astype(jnp.float32),
      beta2.reshape(1, D).astype(jnp.float32),
      gf.reshape(1, D).astype(jnp.float32),
      betaf.reshape(1, D).astype(jnp.float32))
    return out[:M]


# ---------------------- elementwise sampler / output kernels ----------------------

def _lincomb2_kernel(c_ref, x_ref, y_ref, o_ref):
    o_ref[...] = c_ref[0] * x_ref[...] + c_ref[1] * y_ref[...]


def _lincomb3_kernel(c_ref, x_ref, y_ref, z_ref, o_ref):
    o_ref[...] = (c_ref[0] * x_ref[...] + c_ref[1] * y_ref[...]
                  + c_ref[2] * z_ref[...])


def pallas_lincomb2(coeffs, x, y):
    shape = x.shape
    xf, tr, n = _as_rows128(x)
    yf, _, _ = _as_rows128(y)
    rows = xf.shape[0]
    cs = jnp.asarray(coeffs, jnp.float32).reshape(2)
    out = pl.pallas_call(
        _lincomb2_kernel,
        out_shape=jax.ShapeDtypeStruct((rows, 128), jnp.float32),
        grid_spec=pltpu.PrefetchScalarGridSpec(
            num_scalar_prefetch=1, grid=(rows // tr,),
            in_specs=[pl.BlockSpec((tr, 128), lambda i, c: (i, 0)),
                      pl.BlockSpec((tr, 128), lambda i, c: (i, 0))],
            out_specs=pl.BlockSpec((tr, 128), lambda i, c: (i, 0))),
        compiler_params=pltpu.CompilerParams(
            dimension_semantics=("parallel",)),
    )(cs, xf, yf)
    return out.reshape(-1)[:n].reshape(shape)


def pallas_lincomb3(coeffs, x, y, z):
    shape = x.shape
    xf, tr, n = _as_rows128(x)
    yf, _, _ = _as_rows128(y)
    zf, _, _ = _as_rows128(z)
    rows = xf.shape[0]
    cs = jnp.asarray(coeffs, jnp.float32).reshape(3)
    out = pl.pallas_call(
        _lincomb3_kernel,
        out_shape=jax.ShapeDtypeStruct((rows, 128), jnp.float32),
        grid_spec=pltpu.PrefetchScalarGridSpec(
            num_scalar_prefetch=1, grid=(rows // tr,),
            in_specs=[pl.BlockSpec((tr, 128), lambda i, c: (i, 0)),
                      pl.BlockSpec((tr, 128), lambda i, c: (i, 0)),
                      pl.BlockSpec((tr, 128), lambda i, c: (i, 0))],
            out_specs=pl.BlockSpec((tr, 128), lambda i, c: (i, 0))),
        compiler_params=pltpu.CompilerParams(
            dimension_semantics=("parallel",)),
    )(cs, xf, yf, zf)
    return out.reshape(-1)[:n].reshape(shape)


def _rescale_clamp_kernel(x_ref, o_ref, *, old_min, old_max, new_min, new_max):
    scale = (new_max - new_min) / (old_max - old_min)
    y = (x_ref[...] - old_min) * scale + new_min
    o_ref[...] = jnp.clip(y, new_min, new_max)


def pallas_rescale_clamp(x, old_range, new_range):
    shape = x.shape
    xf, tr, n = _as_rows128(x)
    rows = xf.shape[0]
    kern = functools.partial(
        _rescale_clamp_kernel,
        old_min=float(old_range[0]), old_max=float(old_range[1]),
        new_min=float(new_range[0]), new_max=float(new_range[1]))
    out = pl.pallas_call(
        kern,
        out_shape=jax.ShapeDtypeStruct((rows, 128), jnp.float32),
        grid=(rows // tr,),
        in_specs=[pl.BlockSpec((tr, 128), lambda i: (i, 0))],
        out_specs=pl.BlockSpec((tr, 128), lambda i: (i, 0)),
        compiler_params=pltpu.CompilerParams(
            dimension_semantics=("parallel",)),
    )(xf)
    return out.reshape(-1)[:n].reshape(shape)


# ------------------------------- sub-modules -------------------------------
# TODO(synk): CLIP / VAE_Encoder / VAE_Decoder / Diffusion architectures are
# not present in the reference file; small synthetic stand-ins with the same
# interfaces (shapes / data-flow) are used.

class CLIP:
    def __init__(self, key, vocab=64, seq=8, d=32):
        ks = jax.random.split(key, 8)
        self.d = d
        self.tok_emb = _init(ks[0], (vocab, d))
        self.pos_emb = _init(ks[1], (seq, d))
        scale = 1.0 / float(np.sqrt(d))
        wq = _init(ks[2], (d, d))
        wk = _init(ks[3], (d, d))
        wv = _init(ks[4], (d, d))
        # softmax scale folded into Wq; QKV fused into one (d, 3d) weight.
        self.wqkv = jnp.concatenate([wq * scale, wk, wv], axis=1)
        self.bqkv = jnp.zeros((3 * d,))
        self.wo = _init(ks[5], (d, d)); self.bo = jnp.zeros((d,))
        self.w1 = _init(ks[6], (d, 4 * d)); self.b1 = jnp.zeros((4 * d,))
        self.w2 = _init(ks[7], (4 * d, d)); self.b2 = jnp.zeros((d,))
        self.ln1_g = jnp.ones((d,)); self.ln1_b = jnp.zeros((d,))
        self.ln2_g = jnp.ones((d,)); self.ln2_b = jnp.zeros((d,))
        self.lnf_g = jnp.ones((d,)); self.lnf_b = jnp.zeros((d,))

    def __call__(self, tokens):  # (B, S) int32 -> (B, S, d)
        B, S = tokens.shape
        d = self.d
        x = jnp.take(self.tok_emb, tokens, axis=0) + self.pos_emb[None, :, :]
        x = fused_self_attention(x, self.wqkv, self.bqkv, self.wo, self.bo,
                                 self.ln1_g, self.ln1_b)
        x = clip_ffn(x.reshape(B * S, d), self.w1, self.b1, self.w2, self.b2,
                     self.ln2_g, self.ln2_b, self.lnf_g, self.lnf_b)
        return x.reshape(B, S, d)


class VAEEncoder:
    def __init__(self, key):
        ks = jax.random.split(key, 3)
        self.w1 = _init(ks[0], (3, 3, 3, 8));   self.b1 = jnp.zeros((8,))
        self.w2 = _init(ks[1], (3, 3, 8, 16));  self.b2 = jnp.zeros((16,))
        self.w3 = _init(ks[2], (3, 3, 16, 8));  self.b3 = jnp.zeros((8,))

    @staticmethod
    def _conv_s2(x, w, b, activation, out_dtype=jnp.bfloat16):
        # stride-2 conv: strided tap gather (XLA) + one fused GEMM (bias+SiLU fused,
        # unpadded small-N output, bf16).
        # TODO(synk): at 512x512 scale this should be an in-kernel halo-tiled
        # stride-2 conv (DMA-delivered tap windows) instead of HBM im2col.
        B, H, W, Cin = x.shape
        Cout = w.shape[3]
        Ho, Wo = H // 2, W // 2
        xp = jnp.pad(x, ((0, 0), (1, 1), (1, 1), (0, 0)))
        cols = [xp[:, ki:ki + 2 * Ho:2, kj:kj + 2 * Wo:2, :]
                for ki in range(3) for kj in range(3)]
        patches = jnp.concatenate(cols, axis=-1).reshape(B * Ho * Wo, 9 * Cin)
        out = fused_matmul(patches, w.reshape(9 * Cin, Cout), b,
                           activation=activation, out_dtype=out_dtype)
        return out.reshape(B, Ho, Wo, Cout)

    def __call__(self, images_nchw, noise_nchw):
        x = jnp.transpose(images_nchw, (0, 2, 3, 1))            # NHWC
        x = self._conv_s2(x, self.w1, self.b1, "silu")          # H/2
        x = self._conv_s2(x, self.w2, self.b2, "silu")          # H/4
        x = self._conv_s2(x, self.w3, self.b3, "none",
                          out_dtype=jnp.float32)                # H/8, 8 ch
        mean, log_var = jnp.split(x, 2, axis=-1)
        log_var = jnp.clip(log_var, -30.0, 20.0)
        std = jnp.exp(0.5 * log_var)
        noise = jnp.transpose(noise_nchw, (0, 2, 3, 1))
        lat = (mean + std * noise) * 0.18215
        return jnp.transpose(lat, (0, 3, 1, 2))                 # NCHW latents


class Diffusion:
    def __init__(self, key, d_ctx=32, ch=32, t_dim=320):
        ks = jax.random.split(key, 8)
        self.ch = ch
        scale = 1.0 / float(np.sqrt(ch))
        self.t_w1 = _init(ks[0], (t_dim, ch)); self.t_b1 = jnp.zeros((ch,))
        self.t_w2 = _init(ks[1], (ch, ch));    self.t_b2 = jnp.zeros((ch,))
        self.cin_w = _init(ks[2], (3, 3, 4, ch)); self.cin_b = jnp.zeros((ch,))
        # softmax scale folded into Wq/bq; K|V fused into one (d_ctx, 2*ch) weight.
        self.wq = _init(ks[3], (ch, ch)) * scale
        self.bq = jnp.zeros((ch,))
        wk = _init(ks[4], (d_ctx, ch))
        wv = _init(ks[5], (d_ctx, ch))
        self.wkv = jnp.concatenate([wk, wv], axis=1)
        self.bkv = jnp.zeros((2 * ch,))
        self.wo = _init(ks[6], (ch, ch));    self.bo = jnp.zeros((ch,))
        self.cout_w = _init(ks[7], (3, 3, ch, 4)); self.cout_b = jnp.zeros((4,))

    def __call__(self, latents_nchw, context, time_emb):
        t = fused_matmul(time_emb, self.t_w1, self.t_b1, activation="silu")
        t = fused_matmul(t, self.t_w2, self.t_b2)                # (1, ch) bf16
        B, _, H, W = latents_nchw.shape
        # conv + bias + time-embedding add + SiLU, fused in one kernel
        x = conv3x3_s1(latents_nchw, self.cin_w, self.cin_b,
                       activation="silu", add_vec=t)             # (B,ch,H,W)
        xq = jnp.transpose(x, (0, 2, 3, 1)).reshape(B, H * W, self.ch)
        xq = fused_cross_attention(xq, context, self.wq, self.bq,
                                   self.wkv, self.bkv, self.wo, self.bo)
        x = jnp.transpose(xq.reshape(B, H, W, self.ch), (0, 3, 1, 2))
        x = conv3x3_s1(x, self.cout_w, self.cout_b)              # (B,4,H,W)
        return x


class VAEDecoder:
    def __init__(self, key):
        ks = jax.random.split(key, 4)
        self.w1 = _init(ks[0], (3, 3, 4, 16));  self.b1 = jnp.zeros((16,))
        self.w2 = _init(ks[1], (3, 3, 16, 16)); self.b2 = jnp.zeros((16,))
        self.w3 = _init(ks[2], (3, 3, 16, 8));  self.b3 = jnp.zeros((8,))
        self.w4 = _init(ks[3], (3, 3, 8, 3));   self.b4 = jnp.zeros((3,))

    def __call__(self, latents_nchw):
        x = latents_nchw / 0.18215
        x = conv3x3_s1(x, self.w1, self.b1, activation="silu")
        x = upsample_nearest2x(x)
        x = conv3x3_s1(x, self.w2, self.b2, activation="silu")
        x = upsample_nearest2x(x)
        x = conv3x3_s1(x, self.w3, self.b3, activation="silu")
        x = upsample_nearest2x(x)
        x = conv3x3_s1(x, self.w4, self.b4)
        return x                                                 # (B,3,H,W)


class DDPMSampler:
    def __init__(self, n_train=1000, beta_start=0.00085, beta_end=0.0120):
        betas = np.linspace(beta_start ** 0.5, beta_end ** 0.5, n_train,
                            dtype=np.float64) ** 2
        alphas = 1.0 - betas
        self.alphas_cumprod = np.cumprod(alphas)
        self.n_train = n_train
        self.timesteps = np.arange(0, n_train)[::-1]

    def set_inference_timesteps(self, n):
        self.n_inf = n
        step_ratio = self.n_train // n
        self.timesteps = (np.arange(0, n) * step_ratio).round()[::-1].astype(np.int64)

    def set_strength(self, strength):
        start = self.n_inf - int(self.n_inf * strength)
        self.timesteps = self.timesteps[start:]

    def add_noise_coeffs(self, t):
        ab = float(self.alphas_cumprod[int(t)])
        return np.array([np.sqrt(ab), np.sqrt(1.0 - ab)], np.float32)

    def step_coeffs(self, t):
        # x_{t-1} = cx * x_t + ce * eps + sigma * z   (x0 formula folded in)
        t = int(t)
        prev_t = t - self.n_train // self.n_inf
        ab_t = float(self.alphas_cumprod[t])
        ab_prev = float(self.alphas_cumprod[prev_t]) if prev_t >= 0 else 1.0
        beta_prod = 1.0 - ab_t
        cur_alpha = ab_t / ab_prev
        cur_beta = 1.0 - cur_alpha
        c_x0 = np.sqrt(ab_prev) * cur_beta / beta_prod
        c_xt = np.sqrt(cur_alpha) * (1.0 - ab_prev) / beta_prod
        cx = c_x0 / np.sqrt(ab_t) + c_xt
        ce = -c_x0 * np.sqrt(beta_prod) / np.sqrt(ab_t)
        if t > 0:
            var = max(cur_beta * (1.0 - ab_prev) / beta_prod, 1e-20)
            sigma = float(np.sqrt(var))
        else:
            sigma = 0.0
        return np.array([cx, ce, sigma], np.float32)


# ----------------------------- top-level model -----------------------------

class StableDiffusionPallas:
    HEIGHT = 32     # TODO(synk): reference is 512; shrunk for a runnable demo
    WIDTH = 32
    SEQ = 8         # TODO(synk): reference uses 77-token CLIP context
    VOCAB = 64
    D_EMB = 32

    def __init__(self, key, alpha=0.5, n_inference_steps=4, seed=0):
        self.alpha = alpha
        self.n_inference_steps = n_inference_steps
        self.lat_h = self.HEIGHT // 8
        self.lat_w = self.WIDTH // 8
        kc, ke, kd, kdec = jax.random.split(key, 4)
        self.clip = CLIP(kc, vocab=self.VOCAB, seq=self.SEQ, d=self.D_EMB)
        self.encoder = VAEEncoder(ke)
        self.diffusion = Diffusion(kd, d_ctx=self.D_EMB)
        self.decoder = VAEDecoder(kdec)
        self.seed = seed
        # whole encode path and the whole denoise+decode loop compile once each
        self._encode_jit = jax.jit(self._encode_impl)
        self._denoise_decode_jit = jax.jit(self._denoise_decode_impl)

    @staticmethod
    def get_time_embedding(timestep):
        freqs = jnp.power(10000.0,
                          -jnp.arange(0, 160, dtype=jnp.float32) / 160.0)
        x = jnp.asarray([float(timestep)], jnp.float32)[:, None] * freqs[None]
        return jnp.concatenate([jnp.cos(x), jnp.sin(x)], axis=-1)   # (1, 320)

    def _encode_impl(self, images, enc_noise, eps0, add_coeffs):
        latents = self.encoder(images, enc_noise)
        return pallas_lincomb2(add_coeffs, latents, eps0)           # add_noise

    def _denoise_decode_impl(self, latents, tokens, time_embs, step_noises,
                             step_coeffs):
        context = self.clip(tokens)

        def body(lat, xs):
            t_emb, noise, coeffs = xs
            model_output = self.diffusion(lat, context, t_emb[None, :])
            lat = pallas_lincomb3(coeffs, lat, model_output, noise)
            return lat, None

        latents, _ = jax.lax.scan(body, latents,
                                  (time_embs, step_noises, step_coeffs))
        decoded = self.decoder(latents)
        images_out = pallas_rescale_clamp(decoded, (-1.0, 1.0), (0.0, 1.0))
        return images_out, context

    def forward(self, images, tokens, strength=0.8):
        # TODO(synk): HF tokenizer not reimplemented; `tokens` are the already
        # tokenized captions, shape (B, SEQ) int32.
        batch = tokens.shape[0]
        latents_shape = (batch, 4, self.lat_h, self.lat_w)

        sampler = DDPMSampler()
        sampler.set_inference_timesteps(self.n_inference_steps)

        rng = jax.random.PRNGKey(self.seed)
        if images is not None:
            sampler.set_strength(strength)
            rng, k1 = jax.random.split(rng)
            enc_noise = jax.random.normal(k1, latents_shape, jnp.float32)
            rng, k2 = jax.random.split(rng)
            eps0 = jax.random.normal(k2, latents_shape, jnp.float32)
            add_coeffs = jnp.asarray(
                sampler.add_noise_coeffs(sampler.timesteps[0]))
            latents = self._encode_jit(images, enc_noise, eps0, add_coeffs)
        else:
            rng, k = jax.random.split(rng)
            latents = jax.random.normal(k, latents_shape, jnp.float32)

        # per-step schedule precomputed host-side; one jitted scan runs all steps
        timesteps = np.asarray(sampler.timesteps)
        time_embs = jnp.concatenate(
            [self.get_time_embedding(float(t)) for t in timesteps], axis=0)
        step_coeffs = jnp.asarray(
            np.stack([sampler.step_coeffs(int(t)) for t in timesteps]))
        rng, k = jax.random.split(rng)
        step_noises = jax.random.normal(
            k, (len(timesteps),) + latents_shape, jnp.float32)

        return self._denoise_decode_jit(latents, tokens, time_embs,
                                        step_noises, step_coeffs)


if __name__ == "__main__":
    key = jax.random.PRNGKey(0)
    k_img, k_tok = jax.random.split(key)
    B = 2
    images = jax.random.normal(k_img, (B, 3, 32, 32), jnp.float32)   # NCHW
    tokens = jax.random.randint(k_tok, (B, 8), 0, 64, jnp.int32)

    model = StableDiffusionPallas(jax.random.PRNGKey(1),
                                  n_inference_steps=4, seed=0)
    out_images, context = model.forward(images, tokens, strength=0.8)
    jax.block_until_ready((out_images, context))

    assert out_images.shape == (B, 3, 32, 32)
    assert context.shape == (B, 8, 32)
    assert bool(jnp.all(out_images >= 0.0)) and bool(jnp.all(out_images <= 1.0))
    print("KERNEL_OK")
</pallas_src>

<mosaic_0001>
module attributes {stable_mosaic.version = 11 : i64} {
  func.func @_matmul_kernel(%arg0: i32, %arg1: i32, %arg2: i32, %arg3: memref<512x27xbf16, #tpu.memory_space<vmem>>, %arg4: memref<27x8xbf16, #tpu.memory_space<vmem>>, %arg5: memref<1x8xf32, #tpu.memory_space<vmem>>, %arg6: memref<512x8xbf16, #tpu.memory_space<vmem>>, %arg7: memref<512x8xf32, #tpu.memory_space<vmem>>) attributes {dimension_semantics = [#tpu.dimension_semantics<parallel>, #tpu.dimension_semantics<parallel>, #tpu.dimension_semantics<arbitrary>], iteration_bounds = array<i64: 1, 1, 1>, scalar_prefetch = 0 : i64, scratch_operands = 1 : i64, tpu.core_type = #tpu.core_type<tc>, window_params = [{transform_indices = @transform_0, window_bounds = array<i64: 512, 27>}, {transform_indices = @transform_1, window_bounds = array<i64: 27, 8>}, {transform_indices = @transform_2, window_bounds = array<i64: 1, 8>}, {transform_indices = @transform_3, window_bounds = array<i64: 512, 8>}]} {
    %c0_i32 = arith.constant 0 : i32
    %0 = arith.cmpi eq, %arg2, %c0_i32 : i32
    %1 = arith.extui %0 : i1 to i32
    %c0_i32_0 = arith.constant 0 : i32
    %2 = arith.cmpi ne, %1, %c0_i32_0 : i32
    scf.if %2 {
      %cst_10 = arith.constant 0.000000e+00 : f32
      %12 = vector.broadcast %cst_10 : f32 to vector<512x8xf32>
      %c0_11 = arith.constant 0 : index
      %c0_12 = arith.constant 0 : index
      %13 = vector.load %arg7[%c0_11, %c0_12] : memref<512x8xf32, #tpu.memory_space<vmem>>, vector<512x8xf32>
      tpu.vector_store %arg7[%c0_11, %c0_12], %12 {strides = array<i32>} : memref<512x8xf32, #tpu.memory_space<vmem>>, vector<512x8xf32>,
    } else {
    }
    %c0 = arith.constant 0 : index
    %c0_1 = arith.constant 0 : index
    %3 = vector.load %arg7[%c0, %c0_1] : memref<512x8xf32, #tpu.memory_space<vmem>>, vector<512x8xf32>
    %c0_2 = arith.constant 0 : index
    %c0_3 = arith.constant 0 : index
    %4 = vector.load %arg3[%c0_2, %c0_3] : memref<512x27xbf16, #tpu.memory_space<vmem>>, vector<512x27xbf16>
    %c0_4 = arith.constant 0 : index
    %c0_5 = arith.constant 0 : index
    %5 = vector.load %arg4[%c0_4, %c0_5] : memref<27x8xbf16, #tpu.memory_space<vmem>>, vector<27x8xbf16>
    %cst = arith.constant dense<0.000000e+00> : vector<512x8xf32>
    %6 = tpu.matmul %4, %5, %cst {dimension_numbers = #tpu.dot_dimension_numbers<[1], [0], [0], [1], [0, 0, 1, 1], [], []>} : vector<512x27xbf16>, vector<27x8xbf16>, vector<512x8xf32> -> vector<512x8xf32>
    %7 = arith.addf %3, %6 : vector<512x8xf32>
    %c0_6 = arith.constant 0 : index
    %c0_7 = arith.constant 0 : index
    %8 = vector.load %arg7[%c0_6, %c0_7] : memref<512x8xf32, #tpu.memory_space<vmem>>, vector<512x8xf32>
    tpu.vector_store %arg7[%c0_6, %c0_7], %7 {strides = array<i32>} : memref<512x8xf32, #tpu.memory_space<vmem>>, vector<512x8xf32>,
    %c0_i32_8 = arith.constant 0 : i32
    %9 = arith.cmpi eq, %arg2, %c0_i32_8 : i32
    %10 = arith.extui %9 : i1 to i32
    %c0_i32_9 = arith.constant 0 : i32
    %11 = arith.cmpi ne, %10, %c0_i32_9 : i32
    scf.if %11 {
      %c0_10 = arith.constant 0 : index
      %c0_11 = arith.constant 0 : index
      %12 = vector.load %arg7[%c0_10, %c0_11] : memref<512x8xf32, #tpu.memory_space<vmem>>, vector<512x8xf32>
      %c0_12 = arith.constant 0 : index
      %c0_13 = arith.constant 0 : index
      %13 = vector.load %arg5[%c0_12, %c0_13] : memref<1x8xf32, #tpu.memory_space<vmem>>, vector<1x8xf32>
      %14 = vector.broadcast %13 : vector<1x8xf32> to vector<512x8xf32>
      %15 = arith.addf %12, %14 : vector<512x8xf32>
      %cst_14 = arith.constant 0.000000e+00 : f32
      %16 = vector.broadcast %cst_14 : f32 to vector<512x8xf32>
      %17 = arith.subf %16, %15 : vector<512x8xf32>
      %18 = math.exp %17 : vector<512x8xf32>
      %cst_15 = arith.constant 1.000000e+00 : f32
      %19 = vector.broadcast %cst_15 : f32 to vector<512x8xf32>
      %20 = arith.addf %19, %18 : vector<512x8xf32>
      %cst_16 = arith.constant 1.000000e+00 : f32
      %21 = vector.broadcast %cst_16 : f32 to vector<512x8xf32>
      %22 = arith.divf %21, %20 : vector<512x8xf32>
      %23 = arith.mulf %15, %22 : vector<512x8xf32>
      %24 = arith.truncf %23 : vector<512x8xf32> to vector<512x8xbf16>
      %c0_17 = arith.constant 0 : index
      %c0_18 = arith.constant 0 : index
      %25 = vector.load %arg6[%c0_17, %c0_18] : memref<512x8xbf16, #tpu.memory_space<vmem>>, vector<512x8xbf16>
      tpu.vector_store %arg6[%c0_17, %c0_18], %24 {strides = array<i32>} : memref<512x8xbf16, #tpu.memory_space<vmem>>, vector<512x8xbf16>,
    } else {
    }
    return
  }
  func.func @transform_0(%arg0: i32, %arg1: i32, %arg2: i32) -> (i32, i32) {
    %c0_i32 = arith.constant 0 : i32
    return %arg0, %arg2 : i32, i32
  }
  func.func @transform_1(%arg0: i32, %arg1: i32, %arg2: i32) -> (i32, i32) {
    %c0_i32 = arith.constant 0 : i32
    return %arg2, %arg1 : i32, i32
  }
  func.func @transform_2(%arg0: i32, %arg1: i32, %arg2: i32) -> (i32, i32) {
    %c0_i32 = arith.constant 0 : i32
    %c0_i32_0 = arith.constant 0 : i32
    return %c0_i32, %arg1 : i32, i32
  }
  func.func @transform_3(%arg0: i32, %arg1: i32, %arg2: i32) -> (i32, i32) {
    %c0_i32 = arith.constant 0 : i32
    return %arg0, %arg1 : i32, i32
  }
}

module attributes {stable_mosaic.version = 11 : i64} {
  func.func @_matmul_kernel(%arg0: i32, %arg1: i32, %arg2: i32, %arg3: memref<128x72xbf16, #tpu.memory_space<vmem>>, %arg4: memref<72x16xbf16, #tpu.memory_space<vmem>>, %arg5: memref<1x16xf32, #tpu.memory_space<vmem>>, %arg6: memref<128x16xbf16, #tpu.memory_space<vmem>>, %arg7: memref<128x16xf32, #tpu.memory_space<vmem>>) attributes {dimension_semantics = [#tpu.dimension_semantics<parallel>, #tpu.dimension_semantics<parallel>, #tpu.dimension_semantics<arbitrary>], iteration_bounds = array<i64: 1, 1, 1>, scalar_prefetch = 0 : i64, scratch_operands = 1 : i64, tpu.core_type = #tpu.core_type<tc>, window_params = [{transform_indices = @transform_0, window_bounds = array<i64: 128, 72>}, {transform_indices = @transform_1, window_bounds = array<i64: 72, 16>}, {transform_indices = @transform_2, window_bounds = array<i64: 1, 16>}, {transform_indices = @transform_3, window_bounds = array<i64: 128, 16>}]} {
    %c0_i32 = arith.constant 0 : i32
    %0 = arith.cmpi eq, %arg2, %c0_i32 : i32
    %1 = arith.extui %0 : i1 to i32
    %c0_i32_0 = arith.constant 0 : i32
    %2 = arith.cmpi ne, %1, %c0_i32_0 : i32
    scf.if %2 {
      %cst_10 = arith.constant 0.000000e+00 : f32
      %12 = vector.broadcast %cst_10 : f32 to vector<128x16xf32>
      %c0_11 = arith.constant 0 : index
      %c0_12 = arith.constant 0 : index
      %13 = vector.load %arg7[%c0_11, %c0_12] : memref<128x16xf32, #tpu.memory_space<vmem>>, vector<128x16xf32>
      tpu.vector_store %arg7[%c0_11, %c0_12], %12 {strides = array<i32>} : memref<128x16xf32, #tpu.memory_space<vmem>>, vector<128x16xf32>,
    } else {
    }
    %c0 = arith.constant 0 : index
    %c0_1 = arith.constant 0 : index
    %3 = vector.load %arg7[%c0, %c0_1] : memref<128x16xf32, #tpu.memory_space<vmem>>, vector<128x16xf32>
    %c0_2 = arith.constant 0 : index
    %c0_3 = arith.constant 0 : index
    %4 = vector.load %arg3[%c0_2, %c0_3] : memref<128x72xbf16, #tpu.memory_space<vmem>>, vector<128x72xbf16>
    %c0_4 = arith.constant 0 : index
    %c0_5 = arith.constant 0 : index
    %5 = vector.load %arg4[%c0_4, %c0_5] : memref<72x16xbf16, #tpu.memory_space<vmem>>, vector<72x16xbf16>
    %cst = arith.constant dense<0.000000e+00> : vector<128x16xf32>
    %6 = tpu.matmul %4, %5, %cst {dimension_numbers = #tpu.dot_dimension_numbers<[1], [0], [0], [1], [0, 0, 1, 1], [], []>} : vector<128x72xbf16>, vector<72x16xbf16>, vector<128x16xf32> -> vector<128x16xf32>
    %7 = arith.addf %3, %6 : vector<128x16xf32>
    %c0_6 = arith.constant 0 : index
    %c0_7 = arith.constant 0 : index
    %8 = vector.load %arg7[%c0_6, %c0_7] : memref<128x16xf32, #tpu.memory_space<vmem>>, vector<128x16xf32>
    tpu.vector_store %arg7[%c0_6, %c0_7], %7 {strides = array<i32>} : memref<128x16xf32, #tpu.memory_space<vmem>>, vector<128x16xf32>,
    %c0_i32_8 = arith.constant 0 : i32
    %9 = arith.cmpi eq, %arg2, %c0_i32_8 : i32
    %10 = arith.extui %9 : i1 to i32
    %c0_i32_9 = arith.constant 0 : i32
    %11 = arith.cmpi ne, %10, %c0_i32_9 : i32
    scf.if %11 {
      %c0_10 = arith.constant 0 : index
      %c0_11 = arith.constant 0 : index
      %12 = vector.load %arg7[%c0_10, %c0_11] : memref<128x16xf32, #tpu.memory_space<vmem>>, vector<128x16xf32>
      %c0_12 = arith.constant 0 : index
      %c0_13 = arith.constant 0 : index
      %13 = vector.load %arg5[%c0_12, %c0_13] : memref<1x16xf32, #tpu.memory_space<vmem>>, vector<1x16xf32>
      %14 = vector.broadcast %13 : vector<1x16xf32> to vector<128x16xf32>
      %15 = arith.addf %12, %14 : vector<128x16xf32>
      %cst_14 = arith.constant 0.000000e+00 : f32
      %16 = vector.broadcast %cst_14 : f32 to vector<128x16xf32>
      %17 = arith.subf %16, %15 : vector<128x16xf32>
      %18 = math.exp %17 : vector<128x16xf32>
      %cst_15 = arith.constant 1.000000e+00 : f32
      %19 = vector.broadcast %cst_15 : f32 to vector<128x16xf32>
      %20 = arith.addf %19, %18 : vector<128x16xf32>
      %cst_16 = arith.constant 1.000000e+00 : f32
      %21 = vector.broadcast %cst_16 : f32 to vector<128x16xf32>
      %22 = arith.divf %21, %20 : vector<128x16xf32>
      %23 = arith.mulf %15, %22 : vector<128x16xf32>
      %24 = arith.truncf %23 : vector<128x16xf32> to vector<128x16xbf16>
      %c0_17 = arith.constant 0 : index
      %c0_18 = arith.constant 0 : index
      %25 = vector.load %arg6[%c0_17, %c0_18] : memref<128x16xbf16, #tpu.memory_space<vmem>>, vector<128x16xbf16>
      tpu.vector_store %arg6[%c0_17, %c0_18], %24 {strides = array<i32>} : memref<128x16xbf16, #tpu.memory_space<vmem>>, vector<128x16xbf16>,
    } else {
    }
    return
  }
  func.func @transform_0(%arg0: i32, %arg1: i32, %arg2: i32) -> (i32, i32) {
    %c0_i32 = arith.constant 0 : i32
    return %arg0, %arg2 : i32, i32
  }
  func.func @transform_1(%arg0: i32, %arg1: i32, %arg2: i32) -> (i32, i32) {
    %c0_i32 = arith.constant 0 : i32
    return %arg2, %arg1 : i32, i32
  }
  func.func @transform_2(%arg0: i32, %arg1: i32, %arg2: i32) -> (i32, i32) {
    %c0_i32 = arith.constant 0 : i32
    %c0_i32_0 = arith.constant 0 : i32
    return %c0_i32, %arg1 : i32, i32
  }
  func.func @transform_3(%arg0: i32, %arg1: i32, %arg2: i32) -> (i32, i32) {
    %c0_i32 = arith.constant 0 : i32
    return %arg0, %arg1 : i32, i32
  }
}

module attributes {stable_mosaic.version = 11 : i64} {
  func.func @_lincomb2_kernel(%arg0: i32, %arg1: memref<2xf32, #tpu.memory_space<smem>>, %arg2: memref<8x128xf32, #tpu.memory_space<vmem>>, %arg3: memref<8x128xf32, #tpu.memory_space<vmem>>, %arg4: memref<8x128xf32, #tpu.memory_space<vmem>>) attributes {dimension_semantics = [#tpu.dimension_semantics<parallel>], iteration_bounds = array<i64: 1>, scalar_prefetch = 1 : i64, scratch_operands = 0 : i64, tpu.core_type = #tpu.core_type<tc>, window_params = [{transform_indices = @transform_0, window_bounds = array<i64: 8, 128>}, {transform_indices = @transform_1, window_bounds = array<i64: 8, 128>}, {transform_indices = @transform_2, window_bounds = array<i64: 8, 128>}]} {
    %c0 = arith.constant 0 : index
    %0 = memref.load %arg1[%c0] : memref<2xf32, #tpu.memory_space<smem>>
    %c0_0 = arith.constant 0 : index
    %c0_1 = arith.constant 0 : index
    %1 = vector.load %arg2[%c0_0, %c0_1] : memref<8x128xf32, #tpu.memory_space<vmem>>, vector<8x128xf32>
    %2 = vector.broadcast %0 : f32 to vector<8x128xf32>
    %3 = arith.mulf %2, %1 : vector<8x128xf32>
    %c1 = arith.constant 1 : index
    %4 = memref.load %arg1[%c1] : memref<2xf32, #tpu.memory_space<smem>>
    %c0_2 = arith.constant 0 : index
    %c0_3 = arith.constant 0 : index
    %5 = vector.load %arg3[%c0_2, %c0_3] : memref<8x128xf32, #tpu.memory_space<vmem>>, vector<8x128xf32>
    %6 = vector.broadcast %4 : f32 to vector<8x128xf32>
    %7 = arith.mulf %6, %5 : vector<8x128xf32>
    %8 = arith.addf %3, %7 : vector<8x128xf32>
    %c0_4 = arith.constant 0 : index
    %c0_5 = arith.constant 0 : index
    %9 = vector.load %arg4[%c0_4, %c0_5] : memref<8x128xf32, #tpu.memory_space<vmem>>, vector<8x128xf32>
    tpu.vector_store %arg4[%c0_4, %c0_5], %8 {strides = array<i32>} : memref<8x128xf32, #tpu.memory_space<vmem>>, vector<8x128xf32>,
    return
  }
  func.func @transform_0(%arg0: i32, %arg1: memref<2xf32, #tpu.memory_space<smem>>) -> (i32, i32) {
    %c0_i32 = arith.constant 0 : i32
    %c0_i32_0 = arith.constant 0 : i32
    return %arg0, %c0_i32 : i32, i32
  }
  func.func @transform_1(%arg0: i32, %arg1: memref<2xf32, #tpu.memory_space<smem>>) -> (i32, i32) {
    %c0_i32 = arith.constant 0 : i32
    %c0_i32_0 = arith.constant 0 : i32
    return %arg0, %c0_i32 : i32, i32
  }
  func.func @transform_2(%arg0: i32, %arg1: memref<2xf32, #tpu.memory_space<smem>>) -> (i32, i32) {
    %c0_i32 = arith.constant 0 : i32
    %c0_i32_0 = arith.constant 0 : i32
    return %arg0, %c0_i32 : i32, i32
  }
}

module attributes {stable_mosaic.version = 11 : i64} {
  func.func @_matmul_kernel(%arg0: i32, %arg1: i32, %arg2: i32, %arg3: memref<32x144xbf16, #tpu.memory_space<vmem>>, %arg4: memref<144x8xbf16, #tpu.memory_space<vmem>>, %arg5: memref<1x8xf32, #tpu.memory_space<vmem>>, %arg6: memref<32x8xf32, #tpu.memory_space<vmem>>, %arg7: memref<32x8xf32, #tpu.memory_space<vmem>>) attributes {dimension_semantics = [#tpu.dimension_semantics<parallel>, #tpu.dimension_semantics<parallel>, #tpu.dimension_semantics<arbitrary>], iteration_bounds = array<i64: 1, 1, 1>, scalar_prefetch = 0 : i64, scratch_operands = 1 : i64, tpu.core_type = #tpu.core_type<tc>, window_params = [{transform_indices = @transform_0, window_bounds = array<i64: 32, 144>}, {transform_indices = @transform_1, window_bounds = array<i64: 144, 8>}, {transform_indices = @transform_2, window_bounds = array<i64: 1, 8>}, {transform_indices = @transform_3, window_bounds = array<i64: 32, 8>}]} {
    %c0_i32 = arith.constant 0 : i32
    %0 = arith.cmpi eq, %arg2, %c0_i32 : i32
    %1 = arith.extui %0 : i1 to i32
    %c0_i32_0 = arith.constant 0 : i32
    %2 = arith.cmpi ne, %1, %c0_i32_0 : i32
    scf.if %2 {
      %cst_10 = arith.constant 0.000000e+00 : f32
      %12 = vector.broadcast %cst_10 : f32 to vector<32x8xf32>
      %c0_11 = arith.constant 0 : index
      %c0_12 = arith.constant 0 : index
      %13 = vector.load %arg7[%c0_11, %c0_12] : memref<32x8xf32, #tpu.memory_space<vmem>>, vector<32x8xf32>
      tpu.vector_store %arg7[%c0_11, %c0_12], %12 {strides = array<i32>} : memref<32x8xf32, #tpu.memory_space<vmem>>, vector<32x8xf32>,
    } else {
    }
    %c0 = arith.constant 0 : index
    %c0_1 = arith.constant 0 : index
    %3 = vector.load %arg7[%c0, %c0_1] : memref<32x8xf32, #tpu.memory_space<vmem>>, vector<32x8xf32>
    %c0_2 = arith.constant 0 : index
    %c0_3 = arith.constant 0 : index
    %4 = vector.load %arg3[%c0_2, %c0_3] : memref<32x144xbf16, #tpu.memory_space<vmem>>, vector<32x144xbf16>
    %c0_4 = arith.constant 0 : index
    %c0_5 = arith.constant 0 : index
    %5 = vector.load %arg4[%c0_4, %c0_5] : memref<144x8xbf16, #tpu.memory_space<vmem>>, vector<144x8xbf16>
    %cst = arith.constant dense<0.000000e+00> : vector<32x8xf32>
    %6 = tpu.matmul %4, %5, %cst {dimension_numbers = #tpu.dot_dimension_numbers<[1], [0], [0], [1], [0, 0, 1, 1], [], []>} : vector<32x144xbf16>, vector<144x8xbf16>, vector<32x8xf32> -> vector<32x8xf32>
    %7 = arith.addf %3, %6 : vector<32x8xf32>
    %c0_6 = arith.constant 0 : index
    %c0_7 = arith.constant 0 : index
    %8 = vector.load %arg7[%c0_6, %c0_7] : memref<32x8xf32, #tpu.memory_space<vmem>>, vector<32x8xf32>
    tpu.vector_store %arg7[%c0_6, %c0_7], %7 {strides = array<i32>} : memref<32x8xf32, #tpu.memory_space<vmem>>, vector<32x8xf32>,
    %c0_i32_8 = arith.constant 0 : i32
    %9 = arith.cmpi eq, %arg2, %c0_i32_8 : i32
    %10 = arith.extui %9 : i1 to i32
    %c0_i32_9 = arith.constant 0 : i32
    %11 = arith.cmpi ne, %10, %c0_i32_9 : i32
    scf.if %11 {
      %c0_10 = arith.constant 0 : index
      %c0_11 = arith.constant 0 : index
      %12 = vector.load %arg7[%c0_10, %c0_11] : memref<32x8xf32, #tpu.memory_space<vmem>>, vector<32x8xf32>
      %c0_12 = arith.constant 0 : index
      %c0_13 = arith.constant 0 : index
      %13 = vector.load %arg5[%c0_12, %c0_13] : memref<1x8xf32, #tpu.memory_space<vmem>>, vector<1x8xf32>
      %14 = vector.broadcast %13 : vector<1x8xf32> to vector<32x8xf32>
      %15 = arith.addf %12, %14 : vector<32x8xf32>
      %c0_14 = arith.constant 0 : index
      %c0_15 = arith.constant 0 : index
      %16 = vector.load %arg6[%c0_14, %c0_15] : memref<32x8xf32, #tpu.memory_space<vmem>>, vector<32x8xf32>
      tpu.vector_store %arg6[%c0_14, %c0_15], %15 {strides = array<i32>} : memref<32x8xf32, #tpu.memory_space<vmem>>, vector<32x8xf32>,
    } else {
    }
    return
  }
  func.func @transform_0(%arg0: i32, %arg1: i32, %arg2: i32) -> (i32, i32) {
    %c0_i32 = arith.constant 0 : i32
    return %arg0, %arg2 : i32, i32
  }
  func.func @transform_1(%arg0: i32, %arg1: i32, %arg2: i32) -> (i32, i32) {
    %c0_i32 = arith.constant 0 : i32
    return %arg2, %arg1 : i32, i32
  }
  func.func @transform_2(%arg0: i32, %arg1: i32, %arg2: i32) -> (i32, i32) {
    %c0_i32 = arith.constant 0 : i32
    %c0_i32_0 = arith.constant 0 : i32
    return %c0_i32, %arg1 : i32, i32
  }
  func.func @transform_3(%arg0: i32, %arg1: i32, %arg2: i32) -> (i32, i32) {
    %c0_i32 = arith.constant 0 : i32
    return %arg0, %arg1 : i32, i32
  }
}

</mosaic_0001>

<bundles_post_ra>
// kernel: _encode_impl.5
= control target key start
LH: loop header
LB: loop body
LE: loop exit
PB: predicated region body
PF: predicated region fallthrough
CT: control target
= control target key end

     0   :  { %vm19_vm0 = vcmask 130048   ;;  %v725_v1 = vmov 0.0   ;;  %vm144_vm1 = vcmask 588800   ;;  %vm169_vm2 = vcmask 1043456   ;;  %s974_s1 = inlined_call_operand.vmem [shape: bf16[72,16], index: 1, kind: input, shape index: {}]   ;;  %s975_s0 = inlined_call_operand.vmem [shape: bf16[128,72], index: 0, kind: input, shape index: {}]   ;;  %s976_s2 = inlined_call_operand.vmem [shape: f32[1,16], index: 2, kind: input, shape index: {}]   ;;  %s977_s3 = inlined_call_operand.vmem [shape: bf16[128,16], index: 3, kind: output, shape index: {}]  }
   0x1   :  { %v648_v0 = vld [vmem:[%s974_s1] sm:$0xff]   ;;  %22 = vst.msk [vmem:[#allocation2 + $0x10] sm:$0xff] %vm19_vm0, %v725_v1  ;;  %20 = vst.msk [vmem:[#allocation2] sm:$0xff] %vm19_vm0, %v725_v1  ;;  %v649_v2 = vld [vmem:[%s974_s1 + $0x8] sm:$0xff]   ;;  %vm521_vm3 = vcmask 125952  }
   0x2   :  { %21 = vst.msk [vmem:[#allocation2 + $0x8] sm:$0xff] %vm19_vm0, %v725_v1  ;;  %23 = vst.msk [vmem:[#allocation2 + $0x18] sm:$0xff] %vm19_vm0, %v725_v1  ;;  %609 = vmatprep.subr.bf16.mxu0 %v648_v0  ;;  %635 = vmatprep.subr.bf16.mxu1 %v648_v0  ;;  %v650_v3 = vld [vmem:[%s974_s1 + $0x10] sm:$0xff]   ;;  %v653_v4 = vld [vmem:[%s975_s0] sm:$0xff]  }
   0x3   :  { %24 = vst.msk [vmem:[#allocation2 + $0x20] sm:$0xff] %vm19_vm0, %v725_v1  ;;  %25 = vst.msk [vmem:[#allocation2 + $0x28] sm:$0xff] %vm19_vm0, %v725_v1  ;;  %610 = vmatpush3.bf16.msra.mxu0 %v648_v0  ;;  %640 = vmatpush3.bf16.msra.mxu1 %v648_v0  ;;  %v654_v5 = vld [vmem:[%s975_s0 + $0x20] sm:$0xff]   ;;  %v651_v6 = vld [vmem:[%s974_s1 + $0x18] sm:$0xff]  }
   0x4   :  { %26 = vst.msk [vmem:[#allocation2 + $0x30] sm:$0xff] %vm19_vm0, %v725_v1  ;;  %27 = vst.msk [vmem:[#allocation2 + $0x38] sm:$0xff] %vm19_vm0, %v725_v1  ;;  %611 = vmatprep.subr.bf16.mxu0 %v649_v2  ;;  %636 = vmatprep.subr.bf16.mxu1 %v649_v2  ;;  %v652_v7 = vld [vmem:[%s974_s1 + $0x20] ss:$0 sps:$4 sm:$0xff]   ;;  %v655_v9 = vld [vmem:[%s975_s0 + $0x8] sm:$0xff]  }
   0x5   :  { %28 = vst.msk [vmem:[#allocation2 + $0x40] sm:$0xff] %vm19_vm0, %v725_v1  ;;  %29 = vst.msk [vmem:[#allocation2 + $0x48] sm:$0xff] %vm19_vm0, %v725_v1  ;;  %619 = vmatprep.mubr.msk.bf16.mxu0 %vm144_vm1, %v653_v4  ;;  %627 = vmatprep.mubr.msk.bf16.mxu1 %vm144_vm1, %v654_v5  ;;  %v171_v8 = vsel %vm169_vm2, %v652_v7, 0  ;;  %v656_v10 = vld [vmem:[%s975_s0 + $0x28] sm:$0xff]   ;;  %v657_v11 = vld [vmem:[%s975_s0 + $0x10] sm:$0xff]  }
   0x6   :  { %30 = vst.msk [vmem:[#allocation2 + $0x50] sm:$0xff] %vm19_vm0, %v725_v1  ;;  %31 = vst.msk [vmem:[#allocation2 + $0x58] sm:$0xff] %vm19_vm0, %v725_v1  ;;  %v658_v12 = vld [vmem:[%s975_s0 + $0x30] sm:$0xff]   ;;  %v659_v13 = vld [vmem:[%s975_s0 + $0x18] sm:$0xff]  }
   0x7   :  { %32 = vst.msk [vmem:[#allocation2 + $0x60] sm:$0xff] %vm19_vm0, %v725_v1  ;;  %33 = vst.msk [vmem:[#allocation2 + $0x68] sm:$0xff] %vm19_vm0, %v725_v1  ;;  %612 = vmatpush3.bf16.msra.mxu0 %v649_v2  ;;  %641 = vmatpush3.bf16.msra.mxu1 %v649_v2  ;;  %v660_v14 = vld [vmem:[%s975_s0 + $0x38] sm:$0xff]   ;;  %v820_v43 = vld [vmem:[%s976_s2] ss:$0 sm:$0xff] }
   0x8   :  { %34 = vst.msk [vmem:[#allocation2 + $0x70] sm:$0xff] %vm19_vm0, %v725_v1  ;;  %35 = vst.msk [vmem:[#allocation2 + $0x78] sm:$0xff] %vm19_vm0, %v725_v1  ;;  %613 = vmatprep.subr.bf16.mxu0 %v650_v3  ;;  %637 = vmatprep.subr.bf16.mxu1 %v650_v3  ;;  %v38_v15 = vld [vmem:[#allocation2 + $0x10] sm:$0xff]  ;;  %v36_v17 = vld [vmem:[#allocation2] sm:$0xff] }
   0x9   :  { %v39_v21 = vld [vmem:[#allocation2 + $0x18] sm:$0xff]  ;;  %v37_v27 = vld [vmem:[#allocation2 + $0x8] sm:$0xff] }
   0xa   :  { %v40_v41 = vld [vmem:[#allocation2 + $0x20] sm:$0xff]  ;;  %v41_v52 = vld [vmem:[#allocation2 + $0x28] sm:$0xff] }
   0xb   :  { %614 = vmatpush3.bf16.msra.mxu0 %v650_v3  ;;  %642 = vmatpush3.bf16.msra.mxu1 %v650_v3  ;;  %v42_v39 = vld [vmem:[#allocation2 + $0x30] sm:$0xff]  ;;  %v43_v46 = vld [vmem:[#allocation2 + $0x38] sm:$0xff] }
   0xc   :  { %615 = vmatprep.subr.bf16.mxu0 %v651_v6  ;;  %638 = vmatprep.subr.bf16.mxu1 %v651_v6  ;;  %v44_v18 = vld [vmem:[#allocation2 + $0x40] sm:$0xff]  ;;  %v45_v28 = vld [vmem:[#allocation2 + $0x48] sm:$0xff] }
   0xd   :  { %v46_v16 = vld [vmem:[#allocation2 + $0x50] sm:$0xff]  ;;  %v47_v22 = vld [vmem:[#allocation2 + $0x58] sm:$0xff] }
   0xe   :  { %v48_v42 = vld [vmem:[#allocation2 + $0x60] sm:$0xff]  ;;  %v49_v53 = vld [vmem:[#allocation2 + $0x68] sm:$0xff] }
   0xf   :  { %616 = vmatpush3.bf16.msra.mxu0 %v651_v6  ;;  %643 = vmatpush3.bf16.msra.mxu1 %v651_v6  ;;  %v50_v40 = vld [vmem:[#allocation2 + $0x70] sm:$0xff]  ;;  %v51_v47 = vld [vmem:[#allocation2 + $0x78] sm:$0xff] }
  0x10   :  { %645 = vmatprep.subr.msk.bf16.mxu0 %vm169_vm2, %v652_v7  ;;  %646 = vmatprep.subr.msk.bf16.mxu1 %vm169_vm2, %v652_v7 }
  0x13   :  { %618 = vmatpush3.bf16.msra.mxu0 %v171_v8  ;;  %644 = vmatpush3.bf16.msra.mxu1 %v171_v8 }
  0x16   :  { %620 = vmatmul.mubr.msk.bf16.vlgmr.msra.gmra.mrb[0].mxu0 %vm144_vm1, %v655_v9  ;;  %628 = vmatmul.mubr.msk.bf16.vlgmr.msra.gmra.mrb[0].mxu1 %vm144_vm1, %v656_v10 }
  0x17   :  { %623 = vmatprep.mubr.msk.bf16.mxu0 %vm144_vm1, %v657_v11  ;;  %631 = vmatprep.mubr.msk.bf16.mxu1 %vm144_vm1, %v658_v12 }
  0x1e   :  { %624 = vmatmul.mubr.msk.bf16.gmra.mrb[4].mxu0 %vm144_vm1, %v659_v13  ;;  %632 = vmatmul.mubr.msk.bf16.gmra.mrb[4].mxu1 %vm144_vm1, %v660_v14 }
  0xe9   :  { %v621_v19 = vpop.f32.mrb[0].mxu0  ;;  %v629_v20 = vpop.f32.mrb[0].mxu1 }
  0xea   :  { %v272_v23 = vadd.f32 %v621_v19, %v38_v15  ;;  %v280_v24 = vadd.f32 %v629_v20, %v46_v16  ;;  %v207_v25 = vpop.f32.mrb[1].mxu0  ;;  %v239_v26 = vpop.f32.mrb[1].mxu1 }
  0xeb   :  { %v270_v29 = vadd.f32 %v207_v25, %v36_v17  ;;  %v278_v30 = vadd.f32 %v239_v26, %v44_v18  ;;  %v622_v31 = vpop.f32.mrb[2].mxu0  ;;  %v630_v32 = vpop.f32.mrb[2].mxu1 }
  0xec   :  { %289 = vst.msk [vmem:[#allocation2 + $0x10] sm:$0xff] %vm19_vm0, %v272_v23  ;;  %297 = vst.msk [vmem:[#allocation2 + $0x50] sm:$0xff] %vm19_vm0, %v280_v24  ;;  %v273_v33 = vadd.f32 %v622_v31, %v39_v21  ;;  %v281_v34 = vadd.f32 %v630_v32, %v47_v22  ;;  %v210_v35 = vpop.f32.mrb[3].mxu0  ;;  %v242_v36 = vpop.f32.mrb[3].mxu1 }
  0xed   :  { %287 = vst.msk [vmem:[#allocation2] sm:$0xff] %vm19_vm0, %v270_v29  ;;  %295 = vst.msk [vmem:[#allocation2 + $0x40] sm:$0xff] %vm19_vm0, %v278_v30  ;;  %v271_v37 = vadd.f32 %v210_v35, %v37_v27  ;;  %v279_v38 = vadd.f32 %v242_v36, %v45_v28 }
  0xee   :  { %290 = vst.msk [vmem:[#allocation2 + $0x18] sm:$0xff] %vm19_vm0, %v273_v33  ;;  %298 = vst.msk [vmem:[#allocation2 + $0x58] sm:$0xff] %vm19_vm0, %v281_v34 }
  0xef   :  { %288 = vst.msk [vmem:[#allocation2 + $0x8] sm:$0xff] %vm19_vm0, %v271_v37  ;;  %296 = vst.msk [vmem:[#allocation2 + $0x48] sm:$0xff] %vm19_vm0, %v279_v38 }
  0xf1   :  { %v625_v44 = vpop.f32.mrb[4].mxu0  ;;  %v633_v45 = vpop.f32.mrb[4].mxu1 }
  0xf2   :  { %v276_v48 = vadd.f32 %v625_v44, %v42_v39  ;;  %v284_v49 = vadd.f32 %v633_v45, %v50_v40  ;;  %v223_v50 = vpop.f32.mrb[5].mxu0  ;;  %v255_v51 = vpop.f32.mrb[5].mxu1 }
  0xf3   :  { %v308_v54 = vld [vmem:[#allocation2 + $0x10] sm:$0xff]  ;;  %v274_v56 = vadd.f32 %v223_v50, %v40_v41  ;;  %v282_v57 = vadd.f32 %v255_v51, %v48_v42  ;;  %v626_v58 = vpop.f32.mrb[6].mxu0  ;;  %v634_v59 = vpop.f32.mrb[6].mxu1 }
  0xf4   :  { %v316_v55 = vld [vmem:[#allocation2 + $0x50] sm:$0xff]  ;;  %v823_v60 = vadd.f32 %v820_v43, %v308_v54  ;;  %v306_v62 = vld [vmem:[#allocation2] sm:$0xff]  ;;  %293 = vst.msk [vmem:[#allocation2 + $0x30] sm:$0xff] %vm19_vm0, %v276_v48  ;;  %301 = vst.msk [vmem:[#allocation2 + $0x70] sm:$0xff] %vm19_vm0, %v284_v49  ;;  %v277_v0 = vadd.f32 %v626_v58, %v43_v46  ;;  %v285_v1 = vadd.f32 %v634_v59, %v51_v47  ;;  %v226_v2 = vpop.f32.mrb[7].mxu0  ;;  %v258_v3 = vpop.f32.mrb[7].mxu1 }
  0xf5   :  { %v826_v61 = vadd.f32 %v820_v43, %v316_v55  ;;  %v314_v63 = vld [vmem:[#allocation2 + $0x40] sm:$0xff]  ;;  %v831_v4 = vadd.f32 %v820_v43, %v306_v62  ;;  %v309_v6 = vld [vmem:[#allocation2 + $0x18] sm:$0xff]  ;;  %291 = vst.msk [vmem:[#allocation2 + $0x20] sm:$0xff] %vm19_vm0, %v274_v56  ;;  %299 = vst.msk [vmem:[#allocation2 + $0x60] sm:$0xff] %vm19_vm0, %v282_v57  ;;  %v275_v8 = vadd.f32 %v226_v2, %v41_v52 }
  0xf6   :  { %v834_v5 = vadd.f32 %v820_v43, %v314_v63  ;;  %v317_v7 = vld [vmem:[#allocation2 + $0x58] sm:$0xff]  ;;  %v283_v9 = vadd.f32 %v258_v3, %v49_v53  ;;  %v347_v10 = vsub.f32 0.0, %v823_v60  ;;  %v841_v12 = vadd.f32 %v820_v43, %v309_v6  ;;  %v307_v14 = vld [vmem:[#allocation2 + $0x8] sm:$0xff]  ;;  %294 = vst.msk [vmem:[#allocation2 + $0x38] sm:$0xff] %vm19_vm0, %v277_v0  ;;  %302 = vst.msk [vmem:[#allocation2 + $0x78] sm:$0xff] %vm19_vm0, %v285_v1 }
  0xf7   :  { %v355_v11 = vsub.f32 0.0, %v826_v61  ;;  %v844_v13 = vadd.f32 %v820_v43, %v317_v7  ;;  %v315_v15 = vld [vmem:[#allocation2 + $0x48] sm:$0xff]  ;;  %v345_v16 = vsub.f32 0.0, %v831_v4  ;;  %v851_v18 = vadd.f32 %v820_v43, %v307_v14  ;;  %292 = vst.msk [vmem:[#allocation2 + $0x28] sm:$0xff] %vm19_vm0, %v275_v8 }
  0xf8   :  { %v353_v17 = vsub.f32 0.0, %v834_v5  ;;  %v854_v19 = vadd.f32 %v820_v43, %v315_v15  ;;  %300 = vst.msk [vmem:[#allocation2 + $0x68] sm:$0xff] %vm19_vm0, %v283_v9  ;;  %v365_v20 = vmul.f32 1.442695, %v347_v10  ;;  %v348_v22 = vsub.f32 0.0, %v841_v12 }
  0xf9   :  { %v381_v21 = vmul.f32 1.442695, %v355_v11  ;;  %v356_v23 = vsub.f32 0.0, %v844_v13  ;;  %v361_v24 = vmul.f32 1.442695, %v345_v16  ;;  %v346_v26 = vsub.f32 0.0, %v851_v18 }
  0xfa   :  { %v377_v25 = vmul.f32 1.442695, %v353_v17  ;;  %v354_v27 = vsub.f32 0.0, %v854_v19  ;;  %661 = vpow2.f32 %v365_v20  ;;  %v367_v28 = vmul.f32 1.442695, %v348_v22 }
  0xfb   :  { %663 = vpow2.f32 %v381_v21  ;;  %v383_v29 = vmul.f32 1.442695, %v356_v23  ;;  %v312_v30 = vld [vmem:[#allocation2 + $0x30] sm:$0xff]  ;;  %v363_v32 = vmul.f32 1.442695, %v346_v26 }
  0xfc   :  { %v320_v31 = vld [vmem:[#allocation2 + $0x70] sm:$0xff]  ;;  %665 = vpow2.f32 %v361_v24  ;;  %v863_v33 = vadd.f32 %v820_v43, %v312_v30  ;;  %v310_v35 = vld [vmem:[#allocation2 + $0x20] sm:$0xff]  ;;  %v379_v37 = vmul.f32 1.442695, %v354_v27 }
  0xfd   :  { %v866_v34 = vadd.f32 %v820_v43, %v320_v31  ;;  %v318_v36 = vld [vmem:[#allocation2 + $0x60] sm:$0xff]  ;;  %667 = vpow2.f32 %v377_v25  ;;  %v869_v38 = vadd.f32 %v820_v43, %v310_v35  ;;  %v313_v40 = vld [vmem:[#allocation2 + $0x38] sm:$0xff] }
  0xfe   :  { %v872_v39 = vadd.f32 %v820_v43, %v318_v36  ;;  %669 = vpow2.f32 %v367_v28  ;;  %v351_v41 = vsub.f32 0.0, %v863_v33  ;;  %v877_v44 = vadd.f32 %v820_v43, %v313_v40  ;;  %v321_v56 = vld [vmem:[#allocation2 + $0x78] sm:$0xff]  ;;  %v311_v59 = vld [vmem:[#allocation2 + $0x28] sm:$0xff] }
  0xff   :  { %v359_v42 = vsub.f32 0.0, %v866_v34  ;;  %671 = vpow2.f32 %v383_v29  ;;  %v349_v45 = vsub.f32 0.0, %v869_v38  ;;  %v319_v0 = vld [vmem:[#allocation2 + $0x68] sm:$0xff]  ;;  %v883_v3 = vadd.f32 %v820_v43, %v321_v56 }
 0x100   :  { %v357_v46 = vsub.f32 0.0, %v872_v39  ;;  %673 = vpow2.f32 %v363_v32  ;;  %v373_v47 = vmul.f32 1.442695, %v351_v41  ;;  %v352_v49 = vsub.f32 0.0, %v877_v44 }
 0x101   :  { %v389_v48 = vmul.f32 1.442695, %v359_v42  ;;  %675 = vpow2.f32 %v379_v37  ;;  %v369_v50 = vmul.f32 1.442695, %v349_v45  ;;  %v886_v8 = vadd.f32 %v820_v43, %v311_v59 }
 0x102   :  { %v385_v51 = vmul.f32 1.442695, %v357_v46  ;;  %677 = vpow2.f32 %v373_v47  ;;  %v375_v52 = vmul.f32 1.442695, %v352_v49  ;;  %v889_v11 = vadd.f32 %v820_v43, %v319_v0 }
 0x103   :  { %679 = vpow2.f32 %v389_v48  ;;  %v360_v20 = vsub.f32 0.0, %v883_v3  ;;  %v350_v23 = vsub.f32 0.0, %v886_v8 }
 0x104   :  { %v662_v53 = vpop.eup %661  ;;  %681 = vpow2.f32 %v369_v50  ;;  %v358_v26 = vsub.f32 0.0, %v889_v11 }
 0x105   :  { %v664_v54 = vpop.eup %663  ;;  %v395_v55 = vadd.f32 1.0, %v662_v53  ;;  %683 = vpow2.f32 %v385_v51  ;;  %v391_v30 = vmul.f32 1.442695, %v360_v20  ;;  %v371_v35 = vmul.f32 1.442695, %v350_v23 }
 0x106   :  { %v666_v57 = vpop.eup %665  ;;  %v403_v58 = vadd.f32 1.0, %v664_v54  ;;  %685 = vpow2.f32 %v375_v52  ;;  %v387_v40 = vmul.f32 1.442695, %v358_v26 }
 0x107   :  { %v668_v62 = vpop.eup %667  ;;  %687 = vrcp.f32 %v395_v55  ;;  %v393_v63 = vadd.f32 1.0, %v666_v57 }
 0x108   :  { %v670_v1 = vpop.eup %669  ;;  %689 = vrcp.f32 %v403_v58  ;;  %v401_v2 = vadd.f32 1.0, %v668_v62 }
 0x109   :  { %v672_v6 = vpop.eup %671  ;;  %691 = vrcp.f32 %v393_v63  ;;  %v396_v7 = vadd.f32 1.0, %v670_v1 }
 0x10a   :  { %v674_v9 = vpop.eup %673  ;;  %693 = vrcp.f32 %v401_v2  ;;  %v404_v10 = vadd.f32 1.0, %v672_v6 }
 0x10b   :  { %v676_v14 = vpop.eup %675  ;;  %695 = vrcp.f32 %v396_v7  ;;  %v394_v15 = vadd.f32 1.0, %v674_v9 }
 0x10c   :  { %v678_v16 = vpop.eup %677  ;;  %697 = vrcp.f32 %v404_v10  ;;  %v402_v17 = vadd.f32 1.0, %v676_v14 }
 0x10d   :  { %v680_v21 = vpop.eup %679  ;;  %699 = vrcp.f32 %v394_v15  ;;  %v399_v22 = vadd.f32 1.0, %v678_v16 }
 0x10e   :  { %v682_v24 = vpop.eup %681  ;;  %701 = vrcp.f32 %v402_v17  ;;  %v407_v25 = vadd.f32 1.0, %v680_v21 }
 0x10f   :  { %v684_v43 = vpop.eup %683  ;;  %703 = vrcp.f32 %v399_v22  ;;  %v397_v27 = vadd.f32 1.0, %v682_v24 }
 0x110   :  { %v686_v28 = vpop.eup %685  ;;  %705 = vrcp.f32 %v407_v25  ;;  %v405_v29 = vadd.f32 1.0, %v684_v43 }
 0x111   :  { %v688_v31 = vpop.eup %687  ;;  %707 = vrcp.f32 %v397_v27  ;;  %v400_v32 = vadd.f32 1.0, %v686_v28 }
 0x112   :  { %v690_v36 = vpop.eup %689  ;;  %v443_v37 = vmul.f32 %v688_v31, %v823_v60  ;;  %709 = vrcp.f32 %v405_v29 }
 0x113   :  { %v692_v41 = vpop.eup %691  ;;  %v451_v42 = vmul.f32 %v690_v36, %v826_v61  ;;  %711 = vrcp.f32 %v400_v32 }
 0x114   :  { %v694_v45 = vpop.eup %693  ;;  %v582_v46 = vpack.c.bf16 %v443_v37, %v443_v37  ;;  %v441_v47 = vmul.f32 %v692_v41, %v831_v4  ;;  %713 = vpow2.f32 %v391_v30 }
 0x115   :  { %v696_v48 = vpop.eup %695  ;;  %v590_v49 = vpack.c.bf16 %v451_v42, %v451_v42  ;;  %v449_v50 = vmul.f32 %v694_v45, %v834_v5  ;;  %715 = vpow2.f32 %v371_v35 }
 0x116   :  { %v698_v51 = vpop.eup %697  ;;  %524 = vst.msk [vmem:[%s977_s3 + $0x8] sm:$0xf] %vm521_vm3, %v582_v46  ;;  %v580_v60 = vpack.c.bf16 %v441_v47, %v441_v47  ;;  %v444_v61 = vmul.f32 %v696_v48, %v841_v12  ;;  %717 = vpow2.f32 %v387_v40 }
 0x117   :  { %v700_v52 = vpop.eup %699  ;;  %532 = vst.msk [vmem:[%s977_s3 + $0x28] sm:$0xf] %vm521_vm3, %v590_v49  ;;  %v588_v4 = vpack.c.bf16 %v449_v50, %v449_v50  ;;  %v452_v5 = vmul.f32 %v698_v51, %v844_v13 }
 0x118   :  { %v702_v53 = vpop.eup %701  ;;  %522 = vst.msk [vmem:[%s977_s3] sm:$0xf] %vm521_vm3, %v580_v60  ;;  %v583_v54 = vpack.c.bf16 %v444_v61, %v444_v61  ;;  %v442_v55 = vmul.f32 %v700_v52, %v851_v18 }
 0x119   :  { %v704_v12 = vpop.eup %703  ;;  %530 = vst.msk [vmem:[%s977_s3 + $0x20] sm:$0xf] %vm521_vm3, %v588_v4  ;;  %v591_v56 = vpack.c.bf16 %v452_v5, %v452_v5  ;;  %v450_v57 = vmul.f32 %v702_v53, %v854_v19 }
 0x11a   :  { %v706_v58 = vpop.eup %705  ;;  %525 = vst.msk [vmem:[%s977_s3 + $0xc] sm:$0xf] %vm521_vm3, %v583_v54  ;;  %v581_v13 = vpack.c.bf16 %v442_v55, %v442_v55  ;;  %v447_v59 = vmul.f32 %v704_v12, %v863_v33 }
 0x11b   :  { %v708_v62 = vpop.eup %707  ;;  %533 = vst.msk [vmem:[%s977_s3 + $0x2c] sm:$0xf] %vm521_vm3, %v591_v56  ;;  %v589_v18 = vpack.c.bf16 %v450_v57, %v450_v57  ;;  %v455_v63 = vmul.f32 %v706_v58, %v866_v34 }
 0x11c   :  { %v710_v0 = vpop.eup %709  ;;  %523 = vst.msk [vmem:[%s977_s3 + $0x4] sm:$0xf] %vm521_vm3, %v581_v13  ;;  %v586_v19 = vpack.c.bf16 %v447_v59, %v447_v59  ;;  %v445_v1 = vmul.f32 %v708_v62, %v869_v38 }
 0x11d   :  { %v712_v2 = vpop.eup %711  ;;  %531 = vst.msk [vmem:[%s977_s3 + $0x24] sm:$0xf] %vm521_vm3, %v589_v18  ;;  %v594_v33 = vpack.c.bf16 %v455_v63, %v455_v63  ;;  %v453_v6 = vmul.f32 %v710_v0, %v872_v39 }
 0x11e   :  { %v714_v7 = vpop.eup %713  ;;  %528 = vst.msk [vmem:[%s977_s3 + $0x18] sm:$0xf] %vm521_vm3, %v586_v19  ;;  %v584_v34 = vpack.c.bf16 %v445_v1, %v445_v1  ;;  %v448_v9 = vmul.f32 %v712_v2, %v877_v44 }
 0x11f   :  { %v716_v10 = vpop.eup %715  ;;  %536 = vst.msk [vmem:[%s977_s3 + $0x38] sm:$0xf] %vm521_vm3, %v594_v33  ;;  %v592_v38 = vpack.c.bf16 %v453_v6, %v453_v6  ;;  %v408_v14 = vadd.f32 1.0, %v714_v7 }
 0x120   :  { %v718_v15 = vpop.eup %717  ;;  %526 = vst.msk [vmem:[%s977_s3 + $0x10] sm:$0xf] %vm521_vm3, %v584_v34  ;;  %v587_v39 = vpack.c.bf16 %v448_v9, %v448_v9  ;;  %v398_v16 = vadd.f32 1.0, %v716_v10 }
 0x121   :  { %534 = vst.msk [vmem:[%s977_s3 + $0x30] sm:$0xf] %vm521_vm3, %v592_v38  ;;  %719 = vrcp.f32 %v408_v14  ;;  %v406_v44 = vadd.f32 1.0, %v718_v15 }
 0x122   :  { %529 = vst.msk [vmem:[%s977_s3 + $0x1c] sm:$0xf] %vm521_vm3, %v587_v39  ;;  %721 = vrcp.f32 %v398_v16 }
 0x123   :  { %723 = vrcp.f32 %v406_v44 }
 0x12b   :  { %v720_v17 = vpop.eup %719 }
 0x12c   :  { %v722_v20 = vpop.eup %721  ;;  %v456_v21 = vmul.f32 %v720_v17, %v883_v3 }
 0x12d   :  { %v724_v22 = vpop.eup %723  ;;  %v446_v23 = vmul.f32 %v722_v20, %v886_v8 }
 0x12e   :  { %v595_v24 = vpack.c.bf16 %v456_v21, %v456_v21  ;;  %v454_v25 = vmul.f32 %v724_v22, %v889_v11 }
 0x12f   :  { %v585_v26 = vpack.c.bf16 %v446_v23, %v446_v23 }
 0x130   :  { %537 = vst.msk [vmem:[%s977_s3 + $0x3c] sm:$0xf] %vm521_vm3, %v595_v24  ;;  %v593_v43 = vpack.c.bf16 %v454_v25, %v454_v25 }
 0x131   :  { %527 = vst.msk [vmem:[%s977_s3 + $0x14] sm:$0xf] %vm521_vm3, %v585_v26 }
 0x132   :  { %535 = vst.msk [vmem:[%s977_s3 + $0x34] sm:$0xf] %vm521_vm3, %v593_v43 }

// kernel: _encode_impl.4
= control target key start
LH: loop header
LB: loop body
LE: loop exit
PB: predicated region body
PF: predicated region fallthrough
CT: control target
= control target key end

     0   :  { %vm484_vm0 = vcmask 1044480   ;;  %vm485_vm1 = vcmask 1045504   ;;  %vm387_vm2 = vcmask 220160   ;;  %v2414_v1 = vmov 65535   ;;  %s3531_s1 = inlined_call_operand.vmem [shape: bf16[27,8], index: 1, kind: input, shape index: {}]   ;;  %s3532_s0 = inlined_call_operand.vmem [shape: bf16[512,27], index: 0, kind: input, shape index: {}]   ;;  %s3533_s2 = inlined_call_operand.vmem [shape: f32[1,8], index: 2, kind: input, shape index: {}]   ;;  %s3534_s3 = inlined_call_operand.vmem [shape: bf16[512,8], index: 3, kind: output, shape index: {}]  }
   0x1   :  { %v2123_v0 = vld [vmem:[%s3531_s1] sm:$0xff]   ;;  %v486_v2 = vsel %vm484_vm0, 4294967295, %v2414_v1  ;;  %v2124_v3 = vld [vmem:[%s3531_s1 + $0x8] sm:$0x3f]   ;;  %vm19_vm3 = vcmask 64512   ;;  %v2415_v10 = vmov 0.0  }
   0x2   :  { %2049 = vmatprep.subr.bf16.mxu0 %v2123_v0  ;;  %2117 = vmatprep.subr.bf16.mxu1 %v2123_v0  ;;  %v487_v4 = vsel %vm485_vm1, %v486_v2, 0  ;;  %v2125_v5 = vld [vmem:[%s3532_s0] sm:$0xff]   ;;  %v2456_v8 = vld [vmem:[%s3532_s0 + $0x8] sm:$0xff]   ;;  %22 = vst.msk [vmem:[#allocation2 + $0x10] sm:$0xff] %vm19_vm3, %v2415_v10  ;;  %20 = vst.msk [vmem:[#allocation2] sm:$0xff] %vm19_vm3, %v2415_v10  ;;  %vm1751_vm4 = vcmask 60416  }
   0x3   :  { %2050 = vmatpush3.bf16.msra.mxu0 %v2123_v0  ;;  %2119 = vmatpush3.bf16.msra.mxu1 %v2123_v0  ;;  %v2445_v6 = vand.u32 %v2124_v3, %v487_v4  ;;  %v2450_v7 = vld [vmem:[%s3532_s0 + $0x80] sm:$0xff]   ;;  %v2463_v9 = vld [vmem:[%s3532_s0 + $0x88] sm:$0xff]   ;;  %21 = vst.msk [vmem:[#allocation2 + $0x8] sm:$0xff] %vm19_vm3, %v2415_v10  ;;  %23 = vst.msk [vmem:[#allocation2 + $0x18] sm:$0xff] %vm19_vm3, %v2415_v10 }
   0x4   :  { %2053 = vmatprep.mubr.msk.bf16.mxu0 %vm387_vm2, %v2125_v5  ;;  %24 = vst.msk [vmem:[#allocation2 + $0x20] sm:$0xff] %vm19_vm3, %v2415_v10  ;;  %25 = vst.msk [vmem:[#allocation2 + $0x28] sm:$0xff] %vm19_vm3, %v2415_v10  ;;  %2085 = vmatprep.mubr.msk.bf16.mxu1 %vm387_vm2, %v2450_v7  ;;  %v2129_v11 = vld [vmem:[%s3532_s0 + $0x10] sm:$0xff]   ;;  %v2131_v13 = vld [vmem:[%s3532_s0 + $0x18] sm:$0xff]  }
   0x5   :  { %2051 = vmatprep.subr.bf16.mxu0 %v2445_v6  ;;  %2118 = vmatprep.subr.bf16.mxu1 %v2445_v6  ;;  %26 = vst.msk [vmem:[#allocation2 + $0x30] sm:$0xff] %vm19_vm3, %v2415_v10  ;;  %27 = vst.msk [vmem:[#allocation2 + $0x38] sm:$0xff] %vm19_vm3, %v2415_v10  ;;  %v2130_v12 = vld [vmem:[%s3532_s0 + $0x90] sm:$0xff]   ;;  %v2132_v14 = vld [vmem:[%s3532_s0 + $0x98] sm:$0xff]  }
   0x6   :  { %28 = vst.msk [vmem:[#allocation2 + $0x40] sm:$0xff] %vm19_vm3, %v2415_v10  ;;  %29 = vst.msk [vmem:[#allocation2 + $0x48] sm:$0xff] %vm19_vm3, %v2415_v10  ;;  %v2133_v15 = vld [vmem:[%s3532_s0 + $0x20] sm:$0xff]   ;;  %v2135_v17 = vld [vmem:[%s3532_s0 + $0x28] sm:$0xff]  }
   0x7   :  { %30 = vst.msk [vmem:[#allocation2 + $0x50] sm:$0xff] %vm19_vm3, %v2415_v10  ;;  %31 = vst.msk [vmem:[#allocation2 + $0x58] sm:$0xff] %vm19_vm3, %v2415_v10  ;;  %2052 = vmatpush3.bf16.msra.mxu0 %v2445_v6  ;;  %2120 = vmatpush3.bf16.msra.mxu1 %v2445_v6  ;;  %v2134_v16 = vld [vmem:[%s3532_s0 + $0xa0] sm:$0xff]   ;;  %v2136_v18 = vld [vmem:[%s3532_s0 + $0xa8] sm:$0xff]  }
   0x8   :  { %32 = vst.msk [vmem:[#allocation2 + $0x60] sm:$0xff] %vm19_vm3, %v2415_v10  ;;  %33 = vst.msk [vmem:[#allocation2 + $0x68] sm:$0xff] %vm19_vm3, %v2415_v10  ;;  %v2137_v19 = vld [vmem:[%s3532_s0 + $0x30] sm:$0xff]   ;;  %v2139_v21 = vld [vmem:[%s3532_s0 + $0x38] sm:$0xff]  }
   0x9   :  { %34 = vst.msk [vmem:[#allocation2 + $0x70] sm:$0xff] %vm19_vm3, %v2415_v10  ;;  %35 = vst.msk [vmem:[#allocation2 + $0x78] sm:$0xff] %vm19_vm3, %v2415_v10  ;;  %v2138_v20 = vld [vmem:[%s3532_s0 + $0xb0] sm:$0xff]   ;;  %v2140_v22 = vld [vmem:[%s3532_s0 + $0xb8] sm:$0xff]  }
   0xa   :  { %36 = vst.msk [vmem:[#allocation2 + $0x80] sm:$0xff] %vm19_vm3, %v2415_v10  ;;  %37 = vst.msk [vmem:[#allocation2 + $0x88] sm:$0xff] %vm19_vm3, %v2415_v10  ;;  %2054 = vmatmul.mubr.msk.bf16.vlgmr.msra.gmra.mrb[0].mxu0 %vm387_vm2, %v2456_v8  ;;  %2086 = vmatmul.mubr.msk.bf16.vlgmr.msra.gmra.mrb[0].mxu1 %vm387_vm2, %v2463_v9  ;;  %v2141_v23 = vld [vmem:[%s3532_s0 + $0x40] sm:$0xff]   ;;  %v2143_v25 = vld [vmem:[%s3532_s0 + $0x48] sm:$0xff]  }
   0xb   :  { %38 = vst.msk [vmem:[#allocation2 + $0x90] sm:$0xff] %vm19_vm3, %v2415_v10  ;;  %39 = vst.msk [vmem:[#allocation2 + $0x98] sm:$0xff] %vm19_vm3, %v2415_v10  ;;  %2057 = vmatprep.mubr.msk.bf16.mxu0 %vm387_vm2, %v2129_v11  ;;  %2089 = vmatprep.mubr.msk.bf16.mxu1 %vm387_vm2, %v2130_v12  ;;  %v2142_v24 = vld [vmem:[%s3532_s0 + $0xc0] sm:$0xff]   ;;  %v2144_v26 = vld [vmem:[%s3532_s0 + $0xc8] sm:$0xff]  }
   0xc   :  { %40 = vst.msk [vmem:[#allocation2 + $0xa0] sm:$0xff] %vm19_vm3, %v2415_v10  ;;  %41 = vst.msk [vmem:[#allocation2 + $0xa8] sm:$0xff] %vm19_vm3, %v2415_v10  ;;  %v2145_v27 = vld [vmem:[%s3532_s0 + $0x50] sm:$0xff]   ;;  %v2147_v29 = vld [vmem:[%s3532_s0 + $0x58] sm:$0xff]  }
   0xd   :  { %42 = vst.msk [vmem:[#allocation2 + $0xb0] sm:$0xff] %vm19_vm3, %v2415_v10  ;;  %43 = vst.msk [vmem:[#allocation2 + $0xb8] sm:$0xff] %vm19_vm3, %v2415_v10  ;;  %v2146_v28 = vld [vmem:[%s3532_s0 + $0xd0] sm:$0xff]   ;;  %v2148_v30 = vld [vmem:[%s3532_s0 + $0xd8] sm:$0xff]  }
   0xe   :  { %44 = vst.msk [vmem:[#allocation2 + $0xc0] sm:$0xff] %vm19_vm3, %v2415_v10  ;;  %45 = vst.msk [vmem:[#allocation2 + $0xc8] sm:$0xff] %vm19_vm3, %v2415_v10  ;;  %v2149_v31 = vld [vmem:[%s3532_s0 + $0x60] sm:$0xff]   ;;  %v2151_v33 = vld [vmem:[%s3532_s0 + $0x68] sm:$0xff]  }
   0xf   :  { %46 = vst.msk [vmem:[#allocation2 + $0xd0] sm:$0xff] %vm19_vm3, %v2415_v10  ;;  %47 = vst.msk [vmem:[#allocation2 + $0xd8] sm:$0xff] %vm19_vm3, %v2415_v10  ;;  %v2150_v32 = vld [vmem:[%s3532_s0 + $0xe0] sm:$0xff]   ;;  %v2152_v34 = vld [vmem:[%s3532_s0 + $0xe8] sm:$0xff]  }
  0x10   :  { %48 = vst.msk [vmem:[#allocation2 + $0xe0] sm:$0xff] %vm19_vm3, %v2415_v10  ;;  %49 = vst.msk [vmem:[#allocation2 + $0xe8] sm:$0xff] %vm19_vm3, %v2415_v10  ;;  %v2153_v35 = vld [vmem:[%s3532_s0 + $0x70] sm:$0xff]   ;;  %v2155_v37 = vld [vmem:[%s3532_s0 + $0x78] sm:$0xff]  }
  0x11   :  { %50 = vst.msk [vmem:[#allocation2 + $0xf0] sm:$0xff] %vm19_vm3, %v2415_v10  ;;  %51 = vst.msk [vmem:[#allocation2 + $0xf8] sm:$0xff] %vm19_vm3, %v2415_v10  ;;  %v2154_v36 = vld [vmem:[%s3532_s0 + $0xf0] sm:$0xff]   ;;  %v2156_v38 = vld [vmem:[%s3532_s0 + $0xf8] sm:$0xff]  }
  0x12   :  { %52 = vst.msk [vmem:[#allocation2 + $0x100] sm:$0xff] %vm19_vm3, %v2415_v10  ;;  %53 = vst.msk [vmem:[#allocation2 + $0x108] sm:$0xff] %vm19_vm3, %v2415_v10  ;;  %2058 = vmatmul.mubr.msk.bf16.gmra.mrb[4].mxu0 %vm387_vm2, %v2131_v13  ;;  %2090 = vmatmul.mubr.msk.bf16.gmra.mrb[4].mxu1 %vm387_vm2, %v2132_v14  ;;  %v86_v39 = vld [vmem:[#allocation2 + $0x10] sm:$0xff]  ;;  %v84_v41 = vld [vmem:[#allocation2] sm:$0xff] }
  0x13   :  { %54 = vst.msk [vmem:[#allocation2 + $0x110] sm:$0xff] %vm19_vm3, %v2415_v10  ;;  %55 = vst.msk [vmem:[#allocation2 + $0x118] sm:$0xff] %vm19_vm3, %v2415_v10  ;;  %2061 = vmatprep.mubr.msk.bf16.mxu0 %vm387_vm2, %v2133_v15  ;;  %2093 = vmatprep.mubr.msk.bf16.mxu1 %vm387_vm2, %v2134_v16  ;;  %v87_v45 = vld [vmem:[#allocation2 + $0x18] sm:$0xff]  ;;  %v85_v51 = vld [vmem:[#allocation2 + $0x8] sm:$0xff] }
  0x14   :  { %56 = vst.msk [vmem:[#allocation2 + $0x120] sm:$0xff] %vm19_vm3, %v2415_v10  ;;  %57 = vst.msk [vmem:[#allocation2 + $0x128] sm:$0xff] %vm19_vm3, %v2415_v10  ;;  %v90_v63 = vld [vmem:[#allocation2 + $0x30] sm:$0xff]  ;;  %v88_v1 = vld [vmem:[#allocation2 + $0x20] sm:$0xff] }
  0x15   :  { %58 = vst.msk [vmem:[#allocation2 + $0x130] sm:$0xff] %vm19_vm3, %v2415_v10  ;;  %59 = vst.msk [vmem:[#allocation2 + $0x138] sm:$0xff] %vm19_vm3, %v2415_v10  ;;  %v2724_v3 = vld [vmem:[%s3533_s2] ss:$0 sm:$0xff]  ;;  %v91_v6 = vld [vmem:[#allocation2 + $0x38] sm:$0xff] }
  0x16   :  { %60 = vst.msk [vmem:[#allocation2 + $0x140] sm:$0xff] %vm19_vm3, %v2415_v10  ;;  %61 = vst.msk [vmem:[#allocation2 + $0x148] sm:$0xff] %vm19_vm3, %v2415_v10  ;;  %v89_v12 = vld [vmem:[#allocation2 + $0x28] sm:$0xff] }
  0x17   :  { %62 = vst.msk [vmem:[#allocation2 + $0x150] sm:$0xff] %vm19_vm3, %v2415_v10  ;;  %63 = vst.msk [vmem:[#allocation2 + $0x158] sm:$0xff] %vm19_vm3, %v2415_v10 }
  0x18   :  { %64 = vst.msk [vmem:[#allocation2 + $0x160] sm:$0xff] %vm19_vm3, %v2415_v10  ;;  %65 = vst.msk [vmem:[#allocation2 + $0x168] sm:$0xff] %vm19_vm3, %v2415_v10 }
  0x19   :  { %66 = vst.msk [vmem:[#allocation2 + $0x170] sm:$0xff] %vm19_vm3, %v2415_v10  ;;  %67 = vst.msk [vmem:[#allocation2 + $0x178] sm:$0xff] %vm19_vm3, %v2415_v10  ;;  %v116_v42 = vld [vmem:[#allocation2 + $0x100] sm:$0xff]  ;;  %v117_v52 = vld [vmem:[#allocation2 + $0x108] sm:$0xff] }
  0x1a   :  { %68 = vst.msk [vmem:[#allocation2 + $0x180] sm:$0xff] %vm19_vm3, %v2415_v10  ;;  %69 = vst.msk [vmem:[#allocation2 + $0x188] sm:$0xff] %vm19_vm3, %v2415_v10  ;;  %2062 = vmatmul.mubr.msk.bf16.gmra.mrb[8].mxu0 %vm387_vm2, %v2135_v17  ;;  %2094 = vmatmul.mubr.msk.bf16.gmra.mrb[8].mxu1 %vm387_vm2, %v2136_v18  ;;  %v118_v40 = vld [vmem:[#allocation2 + $0x110] sm:$0xff]  ;;  %v119_v46 = vld [vmem:[#allocation2 + $0x118] sm:$0xff] }
  0x1b   :  { %70 = vst.msk [vmem:[#allocation2 + $0x190] sm:$0xff] %vm19_vm3, %v2415_v10  ;;  %71 = vst.msk [vmem:[#allocation2 + $0x198] sm:$0xff] %vm19_vm3, %v2415_v10  ;;  %2065 = vmatprep.mubr.msk.bf16.mxu0 %vm387_vm2, %v2137_v19  ;;  %2097 = vmatprep.mubr.msk.bf16.mxu1 %vm387_vm2, %v2138_v20  ;;  %v120_v2 = vld [vmem:[#allocation2 + $0x120] sm:$0xff]  ;;  %v121_v13 = vld [vmem:[#allocation2 + $0x128] sm:$0xff] }
  0x1c   :  { %72 = vst.msk [vmem:[#allocation2 + $0x1a0] sm:$0xff] %vm19_vm3, %v2415_v10  ;;  %73 = vst.msk [vmem:[#allocation2 + $0x1a8] sm:$0xff] %vm19_vm3, %v2415_v10  ;;  %v122_v0 = vld [vmem:[#allocation2 + $0x130] sm:$0xff]  ;;  %v123_v7 = vld [vmem:[#allocation2 + $0x138] sm:$0xff] }
  0x1d   :  { %74 = vst.msk [vmem:[#allocation2 + $0x1b0] sm:$0xff] %vm19_vm3, %v2415_v10  ;;  %75 = vst.msk [vmem:[#allocation2 + $0x1b8] sm:$0xff] %vm19_vm3, %v2415_v10 }
  0x1e   :  { %76 = vst.msk [vmem:[#allocation2 + $0x1c0] sm:$0xff] %vm19_vm3, %v2415_v10  ;;  %77 = vst.msk [vmem:[#allocation2 + $0x1c8] sm:$0xff] %vm19_vm3, %v2415_v10 }
  0x1f   :  { %78 = vst.msk [vmem:[#allocation2 + $0x1d0] sm:$0xff] %vm19_vm3, %v2415_v10  ;;  %79 = vst.msk [vmem:[#allocation2 + $0x1d8] sm:$0xff] %vm19_vm3, %v2415_v10 }
  0x20   :  { %80 = vst.msk [vmem:[#allocation2 + $0x1e0] sm:$0xff] %vm19_vm3, %v2415_v10  ;;  %81 = vst.msk [vmem:[#allocation2 + $0x1e8] sm:$0xff] %vm19_vm3, %v2415_v10 }
  0x21   :  { %82 = vst.msk [vmem:[#allocation2 + $0x1f0] sm:$0xff] %vm19_vm3, %v2415_v10  ;;  %83 = vst.msk [vmem:[#allocation2 + $0x1f8] sm:$0xff] %vm19_vm3, %v2415_v10 }
  0x22   :  { %2066 = vmatmul.mubr.msk.bf16.gmra.mrb[12].mxu0 %vm387_vm2, %v2139_v21  ;;  %2098 = vmatmul.mubr.msk.bf16.gmra.mrb[12].mxu1 %vm387_vm2, %v2140_v22 }
  0x23   :  { %2069 = vmatprep.mubr.msk.bf16.mxu0 %vm387_vm2, %v2141_v23  ;;  %2101 = vmatprep.mubr.msk.bf16.mxu1 %vm387_vm2, %v2142_v24 }
  0x2a   :  { %2070 = vmatmul.mubr.msk.bf16.gmra.mrb[16].mxu0 %vm387_vm2, %v2143_v25  ;;  %2102 = vmatmul.mubr.msk.bf16.gmra.mrb[16].mxu1 %vm387_vm2, %v2144_v26 }
  0x2b   :  { %2073 = vmatprep.mubr.msk.bf16.mxu0 %vm387_vm2, %v2145_v27  ;;  %2105 = vmatprep.mubr.msk.bf16.mxu1 %vm387_vm2, %v2146_v28 }
  0x32   :  { %2074 = vmatmul.mubr.msk.bf16.gmra.mrb[20].mxu0 %vm387_vm2, %v2147_v29  ;;  %2106 = vmatmul.mubr.msk.bf16.gmra.mrb[20].mxu1 %vm387_vm2, %v2148_v30 }
  0x33   :  { %2077 = vmatprep.mubr.msk.bf16.mxu0 %vm387_vm2, %v2149_v31  ;;  %2109 = vmatprep.mubr.msk.bf16.mxu1 %vm387_vm2, %v2150_v32 }
  0x3a   :  { %2078 = vmatmul.mubr.msk.bf16.gmra.mrb[24].mxu0 %vm387_vm2, %v2151_v33  ;;  %2110 = vmatmul.mubr.msk.bf16.gmra.mrb[24].mxu1 %vm387_vm2, %v2152_v34 }
  0x3b   :  { %2081 = vmatprep.mubr.msk.bf16.mxu0 %vm387_vm2, %v2153_v35  ;;  %2113 = vmatprep.mubr.msk.bf16.mxu1 %vm387_vm2, %v2154_v36 }
  0x42   :  { %2082 = vmatmul.mubr.msk.bf16.gmra.mrb[28].mxu0 %vm387_vm2, %v2155_v37  ;;  %2114 = vmatmul.mubr.msk.bf16.gmra.mrb[28].mxu1 %vm387_vm2, %v2156_v38 }
  0xdd   :  { %v2055_v43 = vpop.f32.mrb[0].mxu0  ;;  %v2087_v44 = vpop.f32.mrb[0].mxu1 }
  0xde   :  { %v782_v47 = vadd.f32 %v2055_v43, %v86_v39  ;;  %v814_v48 = vadd.f32 %v2087_v44, %v118_v40  ;;  %v525_v49 = vpop.f32.mrb[1].mxu0  ;;  %v653_v50 = vpop.f32.mrb[1].mxu1  ;;  %v94_v44 = vld [vmem:[#allocation2 + $0x50] sm:$0xff] }
  0xdf   :  { %v780_v53 = vadd.f32 %v525_v49, %v84_v41  ;;  %v812_v54 = vadd.f32 %v653_v50, %v116_v42  ;;  %v2056_v55 = vpop.f32.mrb[2].mxu0  ;;  %v2088_v56 = vpop.f32.mrb[2].mxu1  ;;  %v92_v50 = vld [vmem:[#allocation2 + $0x40] sm:$0xff] }
  0xe0   :  { %847 = vst.msk [vmem:[#allocation2 + $0x10] sm:$0xff] %vm19_vm3, %v782_v47  ;;  %879 = vst.msk [vmem:[#allocation2 + $0x110] sm:$0xff] %vm19_vm3, %v814_v48  ;;  %v783_v57 = vadd.f32 %v2056_v55, %v87_v45  ;;  %v815_v58 = vadd.f32 %v2088_v56, %v119_v46  ;;  %v528_v59 = vpop.f32.mrb[3].mxu0  ;;  %v656_v60 = vpop.f32.mrb[3].mxu1  ;;  %v126_v45 = vld [vmem:[#allocation2 + $0x150] sm:$0xff] }
  0xe1   :  { %845 = vst.msk [vmem:[#allocation2] sm:$0xff] %vm19_vm3, %v780_v53  ;;  %877 = vst.msk [vmem:[#allocation2 + $0x100] sm:$0xff] %vm19_vm3, %v812_v54  ;;  %v781_v61 = vadd.f32 %v528_v59, %v85_v51  ;;  %v813_v62 = vadd.f32 %v656_v60, %v117_v52 }
  0xe2   :  { %848 = vst.msk [vmem:[#allocation2 + $0x18] sm:$0xff] %vm19_vm3, %v783_v57  ;;  %880 = vst.msk [vmem:[#allocation2 + $0x118] sm:$0xff] %vm19_vm3, %v815_v58 }
  0xe3   :  { %846 = vst.msk [vmem:[#allocation2 + $0x8] sm:$0xff] %vm19_vm3, %v781_v61  ;;  %878 = vst.msk [vmem:[#allocation2 + $0x108] sm:$0xff] %vm19_vm3, %v813_v62 }
  0xe5   :  { %v2059_v4 = vpop.f32.mrb[4].mxu0  ;;  %v2091_v5 = vpop.f32.mrb[4].mxu1 }
  0xe6   :  { %v786_v8 = vadd.f32 %v2059_v4, %v90_v63  ;;  %v818_v9 = vadd.f32 %v2091_v5, %v122_v0  ;;  %v541_v10 = vpop.f32.mrb[5].mxu0  ;;  %v669_v11 = vpop.f32.mrb[5].mxu1 }
  0xe7   :  { %v914_v14 = vld [vmem:[#allocation2 + $0x10] sm:$0xff]  ;;  %v784_v16 = vadd.f32 %v541_v10, %v88_v1  ;;  %v816_v17 = vadd.f32 %v669_v11, %v120_v2  ;;  %v2060_v18 = vpop.f32.mrb[6].mxu0  ;;  %v2092_v19 = vpop.f32.mrb[6].mxu1 }
  0xe8   :  { %v946_v15 = vld [vmem:[#allocation2 + $0x110] sm:$0xff]  ;;  %v2727_v20 = vadd.f32 %v2724_v3, %v914_v14  ;;  %v912_v22 = vld [vmem:[#allocation2] sm:$0xff]  ;;  %851 = vst.msk [vmem:[#allocation2 + $0x30] sm:$0xff] %vm19_vm3, %v786_v8  ;;  %883 = vst.msk [vmem:[#allocation2 + $0x130] sm:$0xff] %vm19_vm3, %v818_v9  ;;  %v787_v24 = vadd.f32 %v2060_v18, %v91_v6  ;;  %v819_v25 = vadd.f32 %v2092_v19, %v123_v7  ;;  %v544_v26 = vpop.f32.mrb[7].mxu0  ;;  %v672_v27 = vpop.f32.mrb[7].mxu1 }
  0xe9   :  { %v2730_v21 = vadd.f32 %v2724_v3, %v946_v15  ;;  %v944_v23 = vld [vmem:[#allocation2 + $0x100] sm:$0xff]  ;;  %v2735_v28 = vadd.f32 %v2724_v3, %v912_v22  ;;  %v915_v30 = vld [vmem:[#allocation2 + $0x18] sm:$0xff]  ;;  %849 = vst.msk [vmem:[#allocation2 + $0x20] sm:$0xff] %vm19_vm3, %v784_v16  ;;  %881 = vst.msk [vmem:[#allocation2 + $0x120] sm:$0xff] %vm19_vm3, %v816_v17  ;;  %v785_v32 = vadd.f32 %v544_v26, %v89_v12 }
  0xea   :  { %v2738_v29 = vadd.f32 %v2724_v3, %v944_v23  ;;  %v947_v31 = vld [vmem:[#allocation2 + $0x118] sm:$0xff]  ;;  %v817_v33 = vadd.f32 %v672_v27, %v121_v13  ;;  %v1049_v34 = vsub.f32 0.0, %v2727_v20  ;;  %v2745_v36 = vadd.f32 %v2724_v3, %v915_v30  ;;  %v913_v38 = vld [vmem:[#allocation2 + $0x8] sm:$0xff]  ;;  %852 = vst.msk [vmem:[#allocation2 + $0x38] sm:$0xff] %vm19_vm3, %v787_v24  ;;  %884 = vst.msk [vmem:[#allocation2 + $0x138] sm:$0xff] %vm19_vm3, %v819_v25 }
  0xeb   :  { %v1081_v35 = vsub.f32 0.0, %v2730_v21  ;;  %v2748_v37 = vadd.f32 %v2724_v3, %v947_v31  ;;  %v945_v39 = vld [vmem:[#allocation2 + $0x108] sm:$0xff]  ;;  %v1047_v40 = vsub.f32 0.0, %v2735_v28  ;;  %v2755_v42 = vadd.f32 %v2724_v3, %v913_v38  ;;  %850 = vst.msk [vmem:[#allocation2 + $0x28] sm:$0xff] %vm19_vm3, %v785_v32  ;;  %v124_v18 = vld [vmem:[#allocation2 + $0x140] sm:$0xff]  ;;  %v95_v30 = vld [vmem:[#allocation2 + $0x58] sm:$0xff] }
  0xec   :  { %v1079_v41 = vsub.f32 0.0, %v2738_v29  ;;  %v2758_v43 = vadd.f32 %v2724_v3, %v945_v39  ;;  %882 = vst.msk [vmem:[#allocation2 + $0x128] sm:$0xff] %vm19_vm3, %v817_v33  ;;  %v1115_v46 = vmul.f32 1.442695, %v1049_v34  ;;  %v1050_v48 = vsub.f32 0.0, %v2745_v36  ;;  %v127_v34 = vld [vmem:[#allocation2 + $0x158] sm:$0xff] }
  0xed   :  { %v1179_v47 = vmul.f32 1.442695, %v1081_v35  ;;  %v1082_v49 = vsub.f32 0.0, %v2748_v37  ;;  %v1111_v51 = vmul.f32 1.442695, %v1047_v40  ;;  %v1048_v53 = vsub.f32 0.0, %v2755_v42 }
  0xee   :  { %v1175_v52 = vmul.f32 1.442695, %v1079_v41  ;;  %v1080_v54 = vsub.f32 0.0, %v2758_v43  ;;  %2157 = vpow2.f32 %v1115_v46  ;;  %v1117_v55 = vmul.f32 1.442695, %v1050_v48  ;;  %v2063_v57 = vpop.f32.mrb[8].mxu0 }
  0xef   :  { %v1181_v56 = vmul.f32 1.442695, %v1082_v49  ;;  %v2095_v58 = vpop.f32.mrb[8].mxu1  ;;  %2159 = vpow2.f32 %v1179_v47  ;;  %v1113_v59 = vmul.f32 1.442695, %v1048_v53  ;;  %v918_v61 = vld [vmem:[#allocation2 + $0x30] sm:$0xff]  ;;  %v790_v63 = vadd.f32 %v2063_v57, %v94_v44 }
  0xf0   :  { %v1177_v60 = vmul.f32 1.442695, %v1080_v54  ;;  %v950_v62 = vld [vmem:[#allocation2 + $0x130] sm:$0xff]  ;;  %2161 = vpow2.f32 %v1111_v51  ;;  %v2767_v0 = vadd.f32 %v2724_v3, %v918_v61  ;;  %v916_v2 = vld [vmem:[#allocation2 + $0x20] sm:$0xff]  ;;  %v822_v5 = vadd.f32 %v2095_v58, %v126_v45  ;;  %v557_v6 = vpop.f32.mrb[9].mxu0  ;;  %v685_v7 = vpop.f32.mrb[9].mxu1 }
  0xf1   :  { %v2770_v1 = vadd.f32 %v2724_v3, %v950_v62  ;;  %v948_v4 = vld [vmem:[#allocation2 + $0x120] sm:$0xff]  ;;  %2163 = vpow2.f32 %v1175_v52  ;;  %v2773_v8 = vadd.f32 %v2724_v3, %v916_v2  ;;  %v919_v10 = vld [vmem:[#allocation2 + $0x38] sm:$0xff]  ;;  %855 = vst.msk [vmem:[#allocation2 + $0x50] sm:$0xff] %vm19_vm3, %v790_v63  ;;  %v788_v12 = vadd.f32 %v557_v6, %v92_v50  ;;  %v2064_v13 = vpop.f32.mrb[10].mxu0  ;;  %v2096_v14 = vpop.f32.mrb[10].mxu1  ;;  %v93_v46 = vld [vmem:[#allocation2 + $0x48] sm:$0xff] }
  0xf2   :  { %v2776_v9 = vadd.f32 %v2724_v3, %v948_v4  ;;  %v951_v11 = vld [vmem:[#allocation2 + $0x138] sm:$0xff]  ;;  %2165 = vpow2.f32 %v1117_v55  ;;  %v1053_v15 = vsub.f32 0.0, %v2767_v0  ;;  %v2782_v17 = vadd.f32 %v2724_v3, %v919_v10  ;;  %887 = vst.msk [vmem:[#allocation2 + $0x150] sm:$0xff] %vm19_vm3, %v822_v5  ;;  %v560_v19 = vpop.f32.mrb[11].mxu0  ;;  %v2785_v22 = vpop.f32.mrb[11].mxu1  ;;  %v917_v26 = vld [vmem:[#allocation2 + $0x28] sm:$0xff] }
  0xf3   :  { %v1085_v16 = vsub.f32 0.0, %v2770_v1  ;;  %2167 = vpow2.f32 %v1181_v56  ;;  %v1051_v23 = vsub.f32 0.0, %v2773_v8  ;;  %v2790_v25 = vadd.f32 %v2724_v3, %v951_v11  ;;  %v949_v27 = vld [vmem:[#allocation2 + $0x128] sm:$0xff]  ;;  %853 = vst.msk [vmem:[#allocation2 + $0x40] sm:$0xff] %vm19_vm3, %v788_v12 }
  0xf4   :  { %v1083_v24 = vsub.f32 0.0, %v2776_v9  ;;  %2169 = vpow2.f32 %v1113_v59  ;;  %v1123_v31 = vmul.f32 1.442695, %v1053_v15  ;;  %v1054_v33 = vsub.f32 0.0, %v2782_v17  ;;  %v125_v5 = vld [vmem:[#allocation2 + $0x148] sm:$0xff] }
  0xf5   :  { %v1187_v32 = vmul.f32 1.442695, %v1085_v16  ;;  %2171 = vpow2.f32 %v1177_v60  ;;  %v1119_v35 = vmul.f32 1.442695, %v1051_v23  ;;  %v1086_v39 = vsub.f32 0.0, %v2790_v25  ;;  %v2795_v40 = vpop.f32.mrb[12].mxu0 }
  0xf6   :  { %v1183_v38 = vmul.f32 1.442695, %v1083_v24  ;;  %2173 = vpow2.f32 %v1123_v31  ;;  %v1125_v41 = vmul.f32 1.442695, %v1054_v33  ;;  %v2798_v44 = vadd.f32 %v2724_v3, %v917_v26  ;;  %v2803_v47 = vpop.f32.mrb[12].mxu1  ;;  %v2805_v48 = vpop.f32.mrb[13].mxu0 }
  0xf7   :  { %v2801_v45 = vadd.f32 %v2724_v3, %v949_v27  ;;  %2175 = vpow2.f32 %v1187_v32  ;;  %v2807_v49 = vmul.f32 1.442695, %v1086_v39  ;;  %v820_v50 = vadd.f32 %v685_v7, %v124_v18  ;;  %v2809_v52 = vpop.f32.mrb[13].mxu1  ;;  %v2811_v53 = vpop.f32.mrb[14].mxu0  ;;  %v96_v31 = vld [vmem:[#allocation2 + $0x60] sm:$0xff] }
  0xf8   :  { %v791_v51 = vadd.f32 %v2064_v13, %v95_v30  ;;  %v2158_v54 = vpop.eup %2157  ;;  %2177 = vpow2.f32 %v1119_v35  ;;  %v1052_v55 = vsub.f32 0.0, %v2798_v44  ;;  %v922_v57 = vld [vmem:[#allocation2 + $0x50] sm:$0xff]  ;;  %v823_v58 = vadd.f32 %v2096_v14, %v127_v34  ;;  %v2815_v59 = vpop.f32.mrb[14].mxu1 }
  0xf9   :  { %v1084_v56 = vsub.f32 0.0, %v2801_v45  ;;  %v2817_v60 = vpop.f32.mrb[15].mxu0  ;;  %v2160_v61 = vpop.eup %2159  ;;  %v1241_v62 = vadd.f32 1.0, %v2158_v54  ;;  %2179 = vpow2.f32 %v1183_v38  ;;  %v2820_v63 = vadd.f32 %v2724_v3, %v922_v57  ;;  %v954_v2 = vld [vmem:[#allocation2 + $0x150] sm:$0xff]  ;;  %885 = vst.msk [vmem:[#allocation2 + $0x140] sm:$0xff] %vm19_vm3, %v820_v50 }
  0xfa   :  { %856 = vst.msk [vmem:[#allocation2 + $0x58] sm:$0xff] %vm19_vm3, %v791_v51  ;;  %v789_v4 = vadd.f32 %v560_v19, %v93_v46  ;;  %v2824_v6 = vpop.f32.mrb[15].mxu1  ;;  %v2162_v7 = vpop.eup %2161  ;;  %v1273_v10 = vadd.f32 1.0, %v2160_v61  ;;  %2181 = vpow2.f32 %v1125_v41  ;;  %v2826_v11 = vmul.f32 1.442695, %v1052_v55  ;;  %v920_v13 = vld [vmem:[#allocation2 + $0x40] sm:$0xff] }
  0xfb   :  { %v2828_v12 = vmul.f32 1.442695, %v1084_v56  ;;  %888 = vst.msk [vmem:[#allocation2 + $0x158] sm:$0xff] %vm19_vm3, %v823_v58  ;;  %v2164_v14 = vpop.eup %2163  ;;  %2183 = vrcp.f32 %v1241_v62  ;;  %v1239_v15 = vadd.f32 1.0, %v2162_v7  ;;  %v1057_v16 = vsub.f32 0.0, %v2820_v63  ;;  %v98_v19 = vld [vmem:[#allocation2 + $0x70] sm:$0xff] }
  0xfc   :  { %v2833_v18 = vadd.f32 %v2724_v3, %v954_v2  ;;  %854 = vst.msk [vmem:[#allocation2 + $0x48] sm:$0xff] %vm19_vm3, %v789_v4  ;;  %v2166_v23 = vpop.eup %2165  ;;  %2185 = vrcp.f32 %v1273_v10  ;;  %v1271_v24 = vadd.f32 1.0, %v2164_v14  ;;  %v2837_v26 = vadd.f32 %v2724_v3, %v920_v13  ;;  %v130_v30 = vld [vmem:[#allocation2 + $0x170] sm:$0xff]  ;;  %v128_v61 = vld [vmem:[#allocation2 + $0x160] sm:$0xff] }
  0xfd   :  { %v821_v27 = vadd.f32 %v2785_v22, %v125_v5  ;;  %v2168_v32 = vpop.eup %2167  ;;  %2187 = vrcp.f32 %v1239_v15  ;;  %v1242_v33 = vadd.f32 1.0, %v2166_v23  ;;  %v2840_v34 = vmul.f32 1.442695, %v1057_v16  ;;  %v2843_v38 = vpop.f32.mrb[16].mxu0 }
  0xfe   :  { %v1089_v35 = vsub.f32 0.0, %v2833_v18  ;;  %v2845_v39 = vpop.f32.mrb[16].mxu1  ;;  %v2170_v41 = vpop.eup %2169  ;;  %2189 = vrcp.f32 %v1271_v24  ;;  %v1274_v46 = vadd.f32 1.0, %v2168_v32  ;;  %v1055_v50 = vsub.f32 0.0, %v2837_v26 }
  0xff   :  { %886 = vst.msk [vmem:[#allocation2 + $0x148] sm:$0xff] %vm19_vm3, %v821_v27  ;;  %v794_v22 = vadd.f32 %v2795_v40, %v98_v19  ;;  %v2850_v51 = vpop.f32.mrb[17].mxu0  ;;  %v2852_v54 = vpop.f32.mrb[17].mxu1  ;;  %2191 = vrcp.f32 %v1242_v33  ;;  %v1240_v56 = vadd.f32 1.0, %v2170_v41  ;;  %v826_v58 = vadd.f32 %v2803_v47, %v130_v30 }
 0x100   :  { %v2172_v55 = vpop.eup %2171  ;;  %v2854_v57 = vmul.f32 1.442695, %v1089_v35  ;;  %v2857_v62 = vpop.f32.mrb[18].mxu0  ;;  %2193 = vrcp.f32 %v1274_v46  ;;  %v2861_v5 = vmul.f32 1.442695, %v1055_v50  ;;  %v952_v7 = vld [vmem:[#allocation2 + $0x140] sm:$0xff]  ;;  %v792_v13 = vadd.f32 %v2805_v48, %v96_v31 }
 0x101   :  { %v2859_v2 = vpop.f32.mrb[18].mxu1  ;;  %v2174_v4 = vpop.eup %2173  ;;  %v1272_v40 = vadd.f32 1.0, %v2172_v55  ;;  %v923_v10 = vld [vmem:[#allocation2 + $0x58] sm:$0xff]  ;;  %859 = vst.msk [vmem:[#allocation2 + $0x70] sm:$0xff] %vm19_vm3, %v794_v22  ;;  %2195 = vrcp.f32 %v1240_v56  ;;  %v2868_v16 = vadd.f32 %v2724_v3, %v952_v7  ;;  %891 = vst.msk [vmem:[#allocation2 + $0x170] sm:$0xff] %vm19_vm3, %v826_v58  ;;  %v824_v32 = vadd.f32 %v2809_v52, %v128_v61 }
 0x102   :  { %v2865_v14 = vpop.f32.mrb[19].mxu0  ;;  %v2176_v15 = vpop.eup %2175  ;;  %v1245_v47 = vadd.f32 1.0, %v2174_v4  ;;  %v2871_v19 = vadd.f32 %v2724_v3, %v923_v10  ;;  %v955_v23 = vld [vmem:[#allocation2 + $0x158] sm:$0xff]  ;;  %857 = vst.msk [vmem:[#allocation2 + $0x60] sm:$0xff] %vm19_vm3, %v792_v13 }
 0x103   :  { %v2874_v24 = vpop.f32.mrb[19].mxu1  ;;  %v2178_v27 = vpop.eup %2177  ;;  %2197 = vrcp.f32 %v1272_v40  ;;  %v1277_v30 = vadd.f32 1.0, %v2176_v15  ;;  %v2877_v48 = vadd.f32 %v2724_v3, %v955_v23  ;;  %v921_v31 = vld [vmem:[#allocation2 + $0x48] sm:$0xff]  ;;  %v1087_v41 = vsub.f32 0.0, %v2868_v16  ;;  %889 = vst.msk [vmem:[#allocation2 + $0x160] sm:$0xff] %vm19_vm3, %v824_v32  ;;  %v99_v58 = vld [vmem:[#allocation2 + $0x78] sm:$0xff] }
 0x104   :  { %v2180_v33 = vpop.eup %2179  ;;  %2199 = vrcp.f32 %v1245_v47  ;;  %v1243_v35 = vadd.f32 1.0, %v2178_v27  ;;  %v1058_v46 = vsub.f32 0.0, %v2871_v19  ;;  %v2885_v56 = vadd.f32 %v2724_v3, %v921_v31 }
 0x105   :  { %v2182_v50 = vpop.eup %2181  ;;  %2201 = vrcp.f32 %v1277_v30  ;;  %v1275_v22 = vadd.f32 1.0, %v2180_v33  ;;  %v1090_v55 = vsub.f32 0.0, %v2877_v48  ;;  %v2888_v61 = vmul.f32 1.442695, %v1087_v41  ;;  %v2896_v23 = vpop.f32.mrb[20].mxu0 }
 0x106   :  { %v2184_v4 = vpop.eup %2183  ;;  %2203 = vrcp.f32 %v1243_v35  ;;  %v1246_v52 = vadd.f32 1.0, %v2182_v50  ;;  %v2890_v40 = vmul.f32 1.442695, %v1058_v46  ;;  %v953_v7 = vld [vmem:[#allocation2 + $0x148] sm:$0xff]  ;;  %v1056_v47 = vsub.f32 0.0, %v2885_v56  ;;  %v2898_v27 = vpop.f32.mrb[20].mxu1 }
 0x107   :  { %v2186_v10 = vpop.eup %2185  ;;  %v1433_v13 = vmul.f32 %v2184_v4, %v2727_v20  ;;  %2205 = vrcp.f32 %v1275_v22  ;;  %v2893_v15 = vmul.f32 1.442695, %v1090_v55  ;;  %v2902_v32 = vadd.f32 %v2724_v3, %v953_v7  ;;  %v2905_v20 = vpop.f32.mrb[21].mxu0 }
 0x108   :  { %v2188_v30 = vpop.eup %2187  ;;  %v1465_v31 = vmul.f32 %v2186_v10, %v2730_v21  ;;  %2207 = vrcp.f32 %v1246_v52  ;;  %v926_v33 = vld [vmem:[#allocation2 + $0x70] sm:$0xff]  ;;  %v795_v35 = vadd.f32 %v2811_v53, %v99_v58  ;;  %v2907_v41 = vpop.f32.mrb[21].mxu1  ;;  %v2911_v55 = vmul.f32 1.442695, %v1056_v47 }
 0x109   :  { %v2190_v46 = vpop.eup %2189  ;;  %v1953_v50 = vpack.c.bf16 %v1433_v13, %v1433_v13  ;;  %v1431_v22 = vmul.f32 %v2188_v30, %v2735_v28  ;;  %2209 = vpow2.f32 %v2807_v49  ;;  %v2913_v21 = vpop.f32.mrb[22].mxu0  ;;  %v1088_v58 = vsub.f32 0.0, %v2902_v32 }
 0x10a   :  { %v2915_v4 = vpop.f32.mrb[22].mxu1  ;;  %v2192_v52 = vpop.eup %2191  ;;  %v1985_v7 = vpack.c.bf16 %v1465_v31, %v1465_v31  ;;  %v1463_v53 = vmul.f32 %v2190_v46, %v2738_v29  ;;  %2211 = vpow2.f32 %v2826_v11  ;;  %860 = vst.msk [vmem:[#allocation2 + $0x78] sm:$0xff] %vm19_vm3, %v795_v35  ;;  %v2932_v29 = vadd.f32 %v2724_v3, %v926_v33  ;;  %v958_v11 = vld [vmem:[#allocation2 + $0x170] sm:$0xff] }
 0x10b   :  { %v2921_v10 = vpop.f32.mrb[23].mxu0  ;;  %v2923_v28 = vpop.f32.mrb[23].mxu1  ;;  %1754 = vst.msk [vmem:[%s3534_s3 + $0x8] sm:$0xf] %vm1751_vm4, %v1953_v50  ;;  %v1951_v13 = vpack.c.bf16 %v1431_v22, %v1431_v22  ;;  %v1434_v47 = vmul.f32 %v2192_v52, %v2745_v36  ;;  %2213 = vpow2.f32 %v2828_v12  ;;  %v1193_v46 = vmul.f32 1.442695, %v1088_v58 }
 0x10c   :  { %v2194_v49 = vpop.eup %2193  ;;  %1786 = vst.msk [vmem:[%s3534_s3 + $0x88] sm:$0xf] %vm1751_vm4, %v1985_v7  ;;  %v1983_v31 = vpack.c.bf16 %v1463_v53, %v1463_v53  ;;  %2215 = vpow2.f32 %v2840_v34  ;;  %v1061_v33 = vsub.f32 0.0, %v2932_v29  ;;  %v2954_v52 = vadd.f32 %v2724_v3, %v958_v11  ;;  %v924_v7 = vld [vmem:[#allocation2 + $0x60] sm:$0xff] }
 0x10d   :  { %v2196_v30 = vpop.eup %2195  ;;  %v1466_v35 = vmul.f32 %v2194_v49, %v2748_v37  ;;  %1752 = vst.msk [vmem:[%s3534_s3] sm:$0xf] %vm1751_vm4, %v1951_v13  ;;  %v1954_v36 = vpack.c.bf16 %v1434_v47, %v1434_v47  ;;  %2217 = vpow2.f32 %v2854_v57  ;;  %v2958_v57 = vpop.f32.mrb[24].mxu1 }
 0x10e   :  { %v2198_v50 = vpop.eup %2197  ;;  %v1432_v12 = vmul.f32 %v2196_v30, %v2755_v42  ;;  %1784 = vst.msk [vmem:[%s3534_s3 + $0x80] sm:$0xf] %vm1751_vm4, %v1983_v31  ;;  %2219 = vpow2.f32 %v2861_v5  ;;  %v2956_v42 = vpop.f32.mrb[24].mxu0 }
 0x10f   :  { %v2200_v22 = vpop.eup %2199  ;;  %v1986_v37 = vpack.c.bf16 %v1466_v35, %v1466_v35  ;;  %v1464_v34 = vmul.f32 %v2198_v50, %v2758_v43  ;;  %1755 = vst.msk [vmem:[%s3534_s3 + $0xc] sm:$0xf] %vm1751_vm4, %v1954_v36  ;;  %2221 = vpow2.f32 %v2888_v61  ;;  %v1139_v43 = vmul.f32 1.442695, %v1061_v33  ;;  %v2966_v5 = vpop.f32.mrb[25].mxu0 }
 0x110   :  { %v2202_v53 = vpop.eup %2201  ;;  %v1952_v58 = vpack.c.bf16 %v1432_v12, %v1432_v12  ;;  %v1437_v49 = vmul.f32 %v2200_v22, %v2767_v0  ;;  %v2968_v13 = vpop.f32.mrb[25].mxu1  ;;  %2223 = vpow2.f32 %v2890_v40  ;;  %v1093_v0 = vsub.f32 0.0, %v2954_v52  ;;  %v956_v40 = vld [vmem:[#allocation2 + $0x160] sm:$0xff] }
 0x111   :  { %v2204_v47 = vpop.eup %2203  ;;  %1787 = vst.msk [vmem:[%s3534_s3 + $0x8c] sm:$0xf] %vm1751_vm4, %v1986_v37  ;;  %v1984_v11 = vpack.c.bf16 %v1464_v34, %v1464_v34  ;;  %v1469_v30 = vmul.f32 %v2202_v53, %v2770_v1  ;;  %v2977_v31 = vpop.f32.mrb[26].mxu0  ;;  %2225 = vpow2.f32 %v2893_v15  ;;  %v2988_v1 = vadd.f32 %v2724_v3, %v924_v7 }
 0x112   :  { %v2979_v61 = vpop.f32.mrb[26].mxu1  ;;  %v2206_v35 = vpop.eup %2205  ;;  %1753 = vst.msk [vmem:[%s3534_s3 + $0x4] sm:$0xf] %vm1751_vm4, %v1952_v58  ;;  %v1957_v50 = vpack.c.bf16 %v1437_v49, %v1437_v49  ;;  %v1435_v36 = vmul.f32 %v2204_v47, %v2773_v8  ;;  %2227 = vpow2.f32 %v2911_v55  ;;  %v1203_v8 = vmul.f32 1.442695, %v1093_v0  ;;  %v927_v49 = vld [vmem:[#allocation2 + $0x78] sm:$0xff] }
 0x113   :  { %v2990_v12 = vpop.f32.mrb[27].mxu0  ;;  %v2992_v33 = vpop.f32.mrb[27].mxu1  ;;  %1785 = vst.msk [vmem:[%s3534_s3 + $0x84] sm:$0xf] %vm1751_vm4, %v1984_v11  ;;  %v1989_v37 = vpack.c.bf16 %v1469_v30, %v1469_v30  ;;  %v1467_v34 = vmul.f32 %v2206_v35, %v2776_v9  ;;  %2229 = vpow2.f32 %v1193_v46  ;;  %v1059_v58 = vsub.f32 0.0, %v2988_v1  ;;  %v131_v30 = vld [vmem:[#allocation2 + $0x178] sm:$0xff] }
 0x114   :  { %3535 = vst [vmem:[#allocation3_spill] sm:$0xff] %v2990_v12  ;;  %3536 = vst [vmem:[#allocation4_spill] sm:$0xff] %v2992_v33  ;;  %v2208_v22 = vpop.eup %2207  ;;  %v1955_v7 = vpack.c.bf16 %v1435_v36, %v1435_v36  ;;  %2231 = vpow2.f32 %v1139_v43  ;;  %v3011_v11 = vadd.f32 %v2724_v3, %v956_v40  ;;  %v97_v0 = vld [vmem:[#allocation2 + $0x68] sm:$0xff] }
 0x115   :  { %v2210_v15 = vpop.eup %2209  ;;  %1758 = vst.msk [vmem:[%s3534_s3 + $0x18] sm:$0xf] %vm1751_vm4, %v1957_v50  ;;  %v1438_v53 = vmul.f32 %v2208_v22, %v2782_v17  ;;  %1790 = vst.msk [vmem:[%s3534_s3 + $0x98] sm:$0xf] %vm1751_vm4, %v1989_v37  ;;  %v1987_v9 = vpack.c.bf16 %v1467_v34, %v1467_v34  ;;  %2233 = vpow2.f32 %v1203_v8  ;;  %v3017_v50 = vmul.f32 1.442695, %v1059_v58 }
 0x116   :  { %v2212_v47 = vpop.eup %2211  ;;  %v1278_v55 = vadd.f32 1.0, %v2210_v15  ;;  %1756 = vst.msk [vmem:[%s3534_s3 + $0x10] sm:$0xf] %vm1751_vm4, %v1955_v7  ;;  %v1091_v40 = vsub.f32 0.0, %v3011_v11  ;;  %v3025_v22 = vadd.f32 %v2724_v3, %v927_v49  ;;  %v129_v37 = vld [vmem:[#allocation2 + $0x168] sm:$0xff]  ;;  %v102_v34 = vld [vmem:[#allocation2 + $0x90] sm:$0xff]  ;;  %v827_v58 = vadd.f32 %v2815_v59, %v131_v30 }
 0x117   :  { %v2214_v35 = vpop.eup %2213  ;;  %v1958_v17 = vpack.c.bf16 %v1438_v53, %v1438_v53  ;;  %v1244_v46 = vadd.f32 1.0, %v2212_v47  ;;  %1788 = vst.msk [vmem:[%s3534_s3 + $0x90] sm:$0xf] %vm1751_vm4, %v1987_v9  ;;  %v3027_v15 = vpop.f32.mrb[28].mxu0  ;;  %v793_v47 = vadd.f32 %v2817_v60, %v97_v0  ;;  %v134_v49 = vld [vmem:[#allocation2 + $0x190] sm:$0xff]  ;;  %v100_v9 = vld [vmem:[#allocation2 + $0x80] sm:$0xff]  ;;  %v825_v30 = vadd.f32 %v2824_v6, %v129_v37 }
 0x118   :  { %v2216_v36 = vpop.eup %2215  ;;  %2235 = vrcp.f32 %v1278_v55  ;;  %v1276_v43 = vadd.f32 1.0, %v2214_v35  ;;  %3537 = vst [vmem:[#allocation5_spill] sm:$0xff] %v3027_v15  ;;  %v3029_v8 = vpop.f32.mrb[28].mxu1  ;;  %v132_v55 = vld [vmem:[#allocation2 + $0x180] sm:$0xff]  ;;  %v3041_v12 = vmul.f32 1.442695, %v1091_v40  ;;  %v798_v0 = vadd.f32 %v2843_v38, %v102_v34 }
 0x119   :  { %3538 = vst [vmem:[#allocation6_spill] sm:$0xff] %v3029_v8  ;;  %v2218_v7 = vpop.eup %2217  ;;  %1759 = vst.msk [vmem:[%s3534_s3 + $0x1c] sm:$0xf] %vm1751_vm4, %v1958_v17  ;;  %2237 = vrcp.f32 %v1244_v46  ;;  %v1249_v53 = vadd.f32 1.0, %v2216_v36  ;;  %v3037_v35 = vpop.f32.mrb[29].mxu0  ;;  %v1062_v17 = vsub.f32 0.0, %v3025_v22  ;;  %v796_v38 = vadd.f32 %v2850_v51, %v100_v9 }
 0x11a   :  { %3539 = vst [vmem:[#allocation7_spill] sm:$0xff] %v3037_v35  ;;  %v3039_v15 = vpop.f32.mrb[29].mxu1  ;;  %v2220_v8 = vpop.eup %2219  ;;  %2239 = vrcp.f32 %v1276_v43  ;;  %v1281_v33 = vadd.f32 1.0, %v2218_v7  ;;  %892 = vst.msk [vmem:[#allocation2 + $0x178] sm:$0xff] %vm19_vm3, %v827_v58  ;;  %v103_v43 = vld [vmem:[#allocation2 + $0x98] sm:$0xff]  ;;  %v133_v58 = vld [vmem:[#allocation2 + $0x188] sm:$0xff]  ;;  %v828_v37 = vadd.f32 %v2852_v54, %v132_v55 }
 0x11b   :  { %3540 = vst [vmem:[#allocation8_spill] sm:$0xff] %v3039_v15  ;;  %v3044_v46 = vpop.f32.mrb[30].mxu0  ;;  %v3046_v36 = vpop.f32.mrb[30].mxu1  ;;  %2241 = vrcp.f32 %v1249_v53  ;;  %v1247_v60 = vadd.f32 1.0, %v2220_v8  ;;  %858 = vst.msk [vmem:[#allocation2 + $0x68] sm:$0xff] %vm19_vm3, %v793_v47  ;;  %v135_v40 = vld [vmem:[#allocation2 + $0x198] sm:$0xff]  ;;  %v830_v8 = vadd.f32 %v2845_v39, %v134_v49  ;;  %v799_v39 = vadd.f32 %v2857_v62, %v103_v43 }
 0x11c   :  { %3541 = vst [vmem:[#allocation9_spill] sm:$0xff] %v3044_v46  ;;  %3542 = vst [vmem:[#allocation10_spill] sm:$0xff] %v3046_v36  ;;  %v2222_v59 = vpop.eup %2221  ;;  %v3052_v7 = vpop.f32.mrb[31].mxu0  ;;  %2243 = vrcp.f32 %v1281_v33  ;;  %v3056_v35 = vmul.f32 1.442695, %v1062_v17  ;;  %v101_v53 = vld [vmem:[#allocation2 + $0x88] sm:$0xff]  ;;  %v831_v49 = vadd.f32 %v2859_v2, %v135_v40  ;;  %v829_v54 = vadd.f32 %v2874_v24, %v133_v58 }
 0x11d   :  { %v3054_v15 = vpop.f32.mrb[31].mxu1  ;;  %v2224_v46 = vpop.eup %2223  ;;  %v1279_v36 = vadd.f32 1.0, %v2222_v59  ;;  %2245 = vrcp.f32 %v1247_v60  ;;  %890 = vst.msk [vmem:[#allocation2 + $0x168] sm:$0xff] %vm19_vm3, %v825_v30  ;;  %863 = vst.msk [vmem:[#allocation2 + $0x90] sm:$0xff] %vm19_vm3, %v798_v0  ;;  %v106_v34 = vld [vmem:[#allocation2 + $0xb0] sm:$0xff]  ;;  %v136_v60 = vld [vmem:[#allocation2 + $0x1a0] sm:$0xff]  ;;  %v797_v51 = vadd.f32 %v2865_v14, %v101_v53 }
 0x11e   :  { %v2226_v47 = vpop.eup %2225  ;;  %v1250_v6 = vadd.f32 1.0, %v2224_v46  ;;  %v138_v33 = vld [vmem:[#allocation2 + $0x1b0] sm:$0xff]  ;;  %895 = vst.msk [vmem:[#allocation2 + $0x190] sm:$0xff] %vm19_vm3, %v830_v8  ;;  %v104_v46 = vld [vmem:[#allocation2 + $0xa0] sm:$0xff]  ;;  %861 = vst.msk [vmem:[#allocation2 + $0x80] sm:$0xff] %vm19_vm3, %v796_v38  ;;  %v802_v2 = vadd.f32 %v2896_v23, %v106_v34  ;;  %v832_v24 = vadd.f32 %v2907_v41, %v136_v60 }
 0x11f   :  { %v2228_v59 = vpop.eup %2227  ;;  %2247 = vrcp.f32 %v1279_v36  ;;  %v1282_v17 = vadd.f32 1.0, %v2226_v47  ;;  %893 = vst.msk [vmem:[#allocation2 + $0x180] sm:$0xff] %vm19_vm3, %v828_v37  ;;  %v107_v9 = vld [vmem:[#allocation2 + $0xb8] sm:$0xff]  ;;  %864 = vst.msk [vmem:[#allocation2 + $0x98] sm:$0xff] %vm19_vm3, %v799_v39  ;;  %v834_v43 = vadd.f32 %v2898_v27, %v138_v33  ;;  %v800_v14 = vadd.f32 %v2905_v20, %v104_v46  ;;  %v105_v53 = vld [vmem:[#allocation2 + $0xa8] sm:$0xff] }
 0x120   :  { %v2230_v30 = vpop.eup %2229  ;;  %2249 = vrcp.f32 %v1250_v6  ;;  %v1248_v0 = vadd.f32 1.0, %v2228_v59  ;;  %v139_v55 = vld [vmem:[#allocation2 + $0x1b8] sm:$0xff]  ;;  %896 = vst.msk [vmem:[#allocation2 + $0x198] sm:$0xff] %vm19_vm3, %v831_v49  ;;  %862 = vst.msk [vmem:[#allocation2 + $0x88] sm:$0xff] %vm19_vm3, %v797_v51  ;;  %v137_v58 = vld [vmem:[#allocation2 + $0x1a8] sm:$0xff]  ;;  %v803_v27 = vadd.f32 %v2913_v21, %v107_v9 }
 0x121   :  { %v2232_v36 = vpop.eup %2231  ;;  %2251 = vrcp.f32 %v1282_v17  ;;  %v1280_v62 = vadd.f32 1.0, %v2230_v30  ;;  %894 = vst.msk [vmem:[#allocation2 + $0x188] sm:$0xff] %vm19_vm3, %v829_v54  ;;  %v959_v38 = vld [vmem:[#allocation2 + $0x178] sm:$0xff]  ;;  %867 = vst.msk [vmem:[#allocation2 + $0xb0] sm:$0xff] %vm19_vm3, %v802_v2  ;;  %v835_v37 = vadd.f32 %v2915_v4, %v139_v55  ;;  %v833_v21 = vadd.f32 %v2923_v28, %v137_v58 }
 0x122   :  { %v2234_v40 = vpop.eup %2233  ;;  %2253 = vrcp.f32 %v1248_v0  ;;  %v1253_v8 = vadd.f32 1.0, %v2232_v36  ;;  %v925_v23 = vld [vmem:[#allocation2 + $0x68] sm:$0xff]  ;;  %899 = vst.msk [vmem:[#allocation2 + $0x1b0] sm:$0xff] %vm19_vm3, %v834_v43  ;;  %v3084_v41 = vadd.f32 %v2724_v3, %v959_v38  ;;  %865 = vst.msk [vmem:[#allocation2 + $0xa0] sm:$0xff] %vm19_vm3, %v800_v14 }
 0x123   :  { %v2236_v47 = vpop.eup %2235  ;;  %2255 = vrcp.f32 %v1280_v62  ;;  %v1285_v6 = vadd.f32 1.0, %v2234_v40  ;;  %v3087_v33 = vadd.f32 %v2724_v3, %v925_v23  ;;  %897 = vst.msk [vmem:[#allocation2 + $0x1a0] sm:$0xff] %vm19_vm3, %v832_v24  ;;  %868 = vst.msk [vmem:[#allocation2 + $0xb8] sm:$0xff] %vm19_vm3, %v803_v27 }
 0x124   :  { %v2238_v34 = vpop.eup %2237  ;;  %v1470_v20 = vmul.f32 %v2236_v47, %v2790_v25  ;;  %2257 = vrcp.f32 %v1253_v8  ;;  %900 = vst.msk [vmem:[#allocation2 + $0x1b8] sm:$0xff] %vm19_vm3, %v835_v37  ;;  %v801_v25 = vadd.f32 %v2921_v10, %v105_v53  ;;  %v1094_v46 = vsub.f32 0.0, %v3084_v41  ;;  %v957_v60 = vld [vmem:[#allocation2 + $0x168] sm:$0xff]  ;;  %v930_v10 = vld [vmem:[#allocation2 + $0x90] sm:$0xff]  ;;  %898 = vst.msk [vmem:[#allocation2 + $0x1a8] sm:$0xff] %vm19_vm3, %v833_v21 }
 0x125   :  { %v2240_v59 = vpop.eup %2239  ;;  %v1436_v17 = vmul.f32 %v2238_v34, %v2798_v44  ;;  %2259 = vrcp.f32 %v1285_v6  ;;  %v1060_v51 = vsub.f32 0.0, %v3087_v33  ;;  %v3116_v36 = vadd.f32 %v2724_v3, %v957_v60  ;;  %v962_v62 = vld [vmem:[#allocation2 + $0x190] sm:$0xff]  ;;  %v928_v40 = vld [vmem:[#allocation2 + $0x80] sm:$0xff] }
 0x126   :  { %v2242_v4 = vpop.eup %2241  ;;  %v1990_v39 = vpack.c.bf16 %v1470_v20, %v1470_v20  ;;  %v1468_v49 = vmul.f32 %v2240_v59, %v2801_v45  ;;  %2261 = vpow2.f32 %v3017_v50  ;;  %866 = vst.msk [vmem:[#allocation2 + $0xa8] sm:$0xff] %vm19_vm3, %v801_v25  ;;  %v3124_v43 = vadd.f32 %v2724_v3, %v930_v10  ;;  %v960_v25 = vld [vmem:[#allocation2 + $0x180] sm:$0xff] }
 0x127   :  { %v2244_v30 = vpop.eup %2243  ;;  %v1956_v44 = vpack.c.bf16 %v1436_v17, %v1436_v17  ;;  %v1441_v0 = vmul.f32 %v2242_v4, %v2820_v63  ;;  %2263 = vpow2.f32 %v3041_v12  ;;  %v1205_v63 = vmul.f32 1.442695, %v1094_v46  ;;  %v3173_v10 = vld [vmem:[%s3533_s2] ss:$0 sm:$0xff] }
 0x128   :  { %v2246_v28 = vpop.eup %2245  ;;  %1791 = vst.msk [vmem:[%s3534_s3 + $0x9c] sm:$0xf] %vm1751_vm4, %v1990_v39  ;;  %v1988_v45 = vpack.c.bf16 %v1468_v49, %v1468_v49  ;;  %v1473_v50 = vmul.f32 %v2244_v30, %v2833_v18  ;;  %2265 = vpow2.f32 %v3056_v35  ;;  %v1137_v55 = vmul.f32 1.442695, %v1060_v51  ;;  %v931_v39 = vld [vmem:[#allocation2 + $0x98] sm:$0xff] }
 0x129   :  { %v2248_v12 = vpop.eup %2247  ;;  %1757 = vst.msk [vmem:[%s3534_s3 + $0x14] sm:$0xf] %vm1751_vm4, %v1956_v44  ;;  %v1961_v54 = vpack.c.bf16 %v1441_v0, %v1441_v0  ;;  %v1439_v9 = vmul.f32 %v2246_v28, %v2837_v26  ;;  %2267 = vpow2.f32 %v1205_v63  ;;  %v1092_v24 = vsub.f32 0.0, %v3116_v36  ;;  %v963_v30 = vld [vmem:[#allocation2 + $0x198] sm:$0xff] }
 0x12a   :  { %v2250_v2 = vpop.eup %2249  ;;  %1789 = vst.msk [vmem:[%s3534_s3 + $0x94] sm:$0xf] %vm1751_vm4, %v1988_v45  ;;  %v1993_v18 = vpack.c.bf16 %v1473_v50, %v1473_v50  ;;  %v1471_v35 = vmul.f32 %v2248_v12, %v2868_v16  ;;  %2269 = vpow2.f32 %v1137_v55  ;;  %v1065_v47 = vsub.f32 0.0, %v3124_v43  ;;  %v961_v45 = vld [vmem:[#allocation2 + $0x188] sm:$0xff] }
 0x12b   :  { %v2252_v26 = vpop.eup %2251  ;;  %1762 = vst.msk [vmem:[%s3534_s3 + $0x28] sm:$0xf] %vm1751_vm4, %v1961_v54  ;;  %v1959_v8 = vpack.c.bf16 %v1439_v9, %v1439_v9  ;;  %v1442_v14 = vmul.f32 %v2250_v2, %v2871_v19  ;;  %v3139_v6 = vadd.f32 %v2724_v3, %v962_v62  ;;  %v1201_v27 = vmul.f32 1.442695, %v1092_v24 }
 0x12c   :  { %v2254_v53 = vpop.eup %2253  ;;  %1794 = vst.msk [vmem:[%s3534_s3 + $0xa8] sm:$0xf] %vm1751_vm4, %v1993_v18  ;;  %v1991_v16 = vpack.c.bf16 %v1471_v35, %v1471_v35  ;;  %v1474_v58 = vmul.f32 %v2252_v26, %v2877_v48  ;;  %v3147_v37 = vadd.f32 %v2724_v3, %v928_v40  ;;  %v1147_v59 = vmul.f32 1.442695, %v1065_v47  ;;  %v934_v26 = vld [vmem:[#allocation2 + $0xb0] sm:$0xff] }
 0x12d   :  { %v2256_v38 = vpop.eup %2255  ;;  %1760 = vst.msk [vmem:[%s3534_s3 + $0x20] sm:$0xf] %vm1751_vm4, %v1959_v8  ;;  %v1962_v19 = vpack.c.bf16 %v1442_v14, %v1442_v14  ;;  %v1440_v23 = vmul.f32 %v2254_v53, %v2885_v56  ;;  %v1097_v17 = vsub.f32 0.0, %v3139_v6  ;;  %2271 = vpow2.f32 %v1201_v27 }
 0x12e   :  { %v2258_v34 = vpop.eup %2257  ;;  %1792 = vst.msk [vmem:[%s3534_s3 + $0xa0] sm:$0xf] %vm1751_vm4, %v1991_v16  ;;  %v1994_v48 = vpack.c.bf16 %v1474_v58, %v1474_v58  ;;  %v1472_v20 = vmul.f32 %v2256_v38, %v2902_v32  ;;  %v1063_v4 = vsub.f32 0.0, %v3147_v37  ;;  %2273 = vpow2.f32 %v1147_v59  ;;  %v966_v16 = vld [vmem:[#allocation2 + $0x1b0] sm:$0xff]  ;;  %v932_v58 = vld [vmem:[#allocation2 + $0xa0] sm:$0xff] }
 0x12f   :  { %v2260_v21 = vpop.eup %2259  ;;  %1763 = vst.msk [vmem:[%s3534_s3 + $0x2c] sm:$0xf] %vm1751_vm4, %v1962_v19  ;;  %v1960_v3 = vpack.c.bf16 %v1440_v23, %v1440_v23  ;;  %v1445_v56 = vmul.f32 %v2258_v34, %v2932_v29  ;;  %v1211_v60 = vmul.f32 1.442695, %v1097_v17  ;;  %v3176_v28 = vadd.f32 %v3173_v10, %v960_v25  ;;  %v964_v23 = vld [vmem:[#allocation2 + $0x1a0] sm:$0xff] }
 0x130   :  { %v2262_v49 = vpop.eup %2261  ;;  %1795 = vst.msk [vmem:[%s3534_s3 + $0xac] sm:$0xf] %vm1751_vm4, %v1994_v48  ;;  %v1992_v32 = vpack.c.bf16 %v1472_v20, %v1472_v20  ;;  %v1477_v46 = vmul.f32 %v2260_v21, %v2954_v52  ;;  %v1143_v51 = vmul.f32 1.442695, %v1063_v4  ;;  %v929_v52 = vld [vmem:[#allocation2 + $0x88] sm:$0xff]  ;;  %v3183_v54 = vadd.f32 %v3173_v10, %v931_v39  ;;  %v935_v4 = vld [vmem:[#allocation2 + $0xb8] sm:$0xff] }
 0x131   :  { %v2264_v44 = vpop.eup %2263  ;;  %1761 = vst.msk [vmem:[%s3534_s3 + $0x24] sm:$0xf] %vm1751_vm4, %v1960_v3  ;;  %v1965_v29 = vpack.c.bf16 %v1445_v56, %v1445_v56  ;;  %v1251_v0 = vadd.f32 1.0, %v2262_v49  ;;  %2275 = vpow2.f32 %v1211_v60  ;;  %v1095_v55 = vsub.f32 0.0, %v3176_v28  ;;  %v967_v60 = vld [vmem:[#allocation2 + $0x1b8] sm:$0xff] }
 0x132   :  { %v2266_v50 = vpop.eup %2265  ;;  %1793 = vst.msk [vmem:[%s3534_s3 + $0xa4] sm:$0xf] %vm1751_vm4, %v1992_v32  ;;  %v1997_v63 = vpack.c.bf16 %v1477_v46, %v1477_v46  ;;  %v1283_v12 = vadd.f32 1.0, %v2264_v44  ;;  %v3191_v62 = vadd.f32 %v3173_v10, %v963_v30  ;;  %v1066_v18 = vsub.f32 0.0, %v3183_v54 }
 0x133   :  { %1766 = vst.msk [vmem:[%s3534_s3 + $0x38] sm:$0xf] %vm1751_vm4, %v1965_v29  ;;  %2277 = vrcp.f32 %v1251_v0  ;;  %v1254_v9 = vadd.f32 1.0, %v2266_v50  ;;  %v2268_v2 = vpop.eup %2267  ;;  %v3199_v35 = vadd.f32 %v3173_v10, %v929_v52  ;;  %v3202_v40 = vadd.f32 %v3173_v10, %v961_v45  ;;  %v933_v0 = vld [vmem:[#allocation2 + $0xa8] sm:$0xff] }
 0x134   :  { %1798 = vst.msk [vmem:[%s3534_s3 + $0xb8] sm:$0xf] %vm1751_vm4, %v1997_v63  ;;  %2279 = vrcp.f32 %v1283_v12  ;;  %v2270_v8 = vpop.eup %2269  ;;  %v1286_v14 = vadd.f32 1.0, %v2268_v2  ;;  %v1207_v24 = vmul.f32 1.442695, %v1095_v55  ;;  %v1098_v53 = vsub.f32 0.0, %v3191_v62 }
 0x135   :  { %2281 = vrcp.f32 %v1254_v9  ;;  %v1252_v47 = vadd.f32 1.0, %v2270_v8  ;;  %v1149_v38 = vmul.f32 1.442695, %v1066_v18  ;;  %v1064_v19 = vsub.f32 0.0, %v3199_v35  ;;  %v965_v63 = vld [vmem:[#allocation2 + $0x1a8] sm:$0xff] }
 0x136   :  { %2283 = vpow2.f32 %v1143_v51  ;;  %v1213_v27 = vmul.f32 1.442695, %v1098_v53  ;;  %v1096_v34 = vsub.f32 0.0, %v3202_v40  ;;  %v3208_v48 = vadd.f32 %v3173_v10, %v934_v26 }
 0x137   :  { %2285 = vrcp.f32 %v1286_v14  ;;  %v1145_v20 = vmul.f32 1.442695, %v1064_v19  ;;  %v3211_v59 = vadd.f32 %v3173_v10, %v966_v16  ;;  %v3214_v17 = vadd.f32 %v3173_v10, %v932_v58  ;;  %v2272_v25 = vpop.eup %2271 }
 0x138   :  { %2287 = vrcp.f32 %v1252_v47  ;;  %v1209_v21 = vmul.f32 1.442695, %v1096_v34  ;;  %v1069_v3 = vsub.f32 0.0, %v3208_v48  ;;  %v3218_v56 = vadd.f32 %v3173_v10, %v964_v23  ;;  %v2274_v39 = vpop.eup %2273  ;;  %v110_v23 = vld [vmem:[#allocation2 + $0xd0] sm:$0xff] }
 0x139   :  { %2289 = vpow2.f32 %v1207_v24  ;;  %v1284_v49 = vadd.f32 1.0, %v2272_v25  ;;  %v1101_v32 = vsub.f32 0.0, %v3211_v59  ;;  %v1067_v46 = vsub.f32 0.0, %v3214_v17 }
 0x13a   :  { %2291 = vpow2.f32 %v1149_v38  ;;  %v1257_v30 = vadd.f32 1.0, %v2274_v39  ;;  %v1155_v44 = vmul.f32 1.442695, %v1069_v3  ;;  %v1099_v29 = vsub.f32 0.0, %v3218_v56 }
 0x13b   :  { %2293 = vpow2.f32 %v1213_v27  ;;  %v2276_v51 = vpop.eup %2275  ;;  %v1219_v52 = vmul.f32 1.442695, %v1101_v32  ;;  %v1151_v45 = vmul.f32 1.442695, %v1067_v46  ;;  %v3224_v50 = vadd.f32 %v3173_v10, %v935_v4  ;;  %v142_v46 = vld [vmem:[#allocation2 + $0x1d0] sm:$0xff] }
 0x13c   :  { %2295 = vrcp.f32 %v1284_v49  ;;  %v1289_v9 = vadd.f32 1.0, %v2276_v51  ;;  %v1215_v55 = vmul.f32 1.442695, %v1099_v29  ;;  %v3227_v2 = vadd.f32 %v3173_v10, %v967_v60  ;;  %v108_v60 = vld [vmem:[#allocation2 + $0xc0] sm:$0xff]  ;;  %v111_v51 = vld [vmem:[#allocation2 + $0xd8] sm:$0xff] }
 0x13d   :  { %v2278_v12 = vpop.eup %2277  ;;  %2297 = vrcp.f32 %v1257_v30  ;;  %v1070_v8 = vsub.f32 0.0, %v3224_v50  ;;  %v3232_v14 = vadd.f32 %v3173_v10, %v933_v0  ;;  %v3237_v58 = vadd.f32 %v3173_v10, %v965_v63  ;;  %v140_v0 = vld [vmem:[#allocation2 + $0x1c0] sm:$0xff] }
 0x13e   :  { %v2280_v18 = vpop.eup %2279  ;;  %v1443_v26 = vmul.f32 %v2278_v12, %v2988_v1  ;;  %2299 = vpow2.f32 %v1145_v20  ;;  %v1102_v16 = vsub.f32 0.0, %v3227_v2  ;;  %v806_v32 = vadd.f32 %v2956_v42, %v110_v23  ;;  %v143_v42 = vld [vmem:[#allocation2 + $0x1d8] sm:$0xff]  ;;  %v3543_v23 = vld [vmem:[#allocation3_spill] sm:$0xff] }
 0x13f   :  { %v2282_v24 = vpop.eup %2281  ;;  %v1475_v53 = vmul.f32 %v2280_v18, %v3011_v11  ;;  %2301 = vrcp.f32 %v1289_v9  ;;  %v1157_v1 = vmul.f32 1.442695, %v1070_v8  ;;  %v1100_v49 = vsub.f32 0.0, %v3237_v58  ;;  %v109_v9 = vld [vmem:[#allocation2 + $0xc8] sm:$0xff] }
 0x140   :  { %v2284_v47 = vpop.eup %2283  ;;  %v1963_v38 = vpack.c.bf16 %v1443_v26, %v1443_v26  ;;  %v1446_v19 = vmul.f32 %v2282_v24, %v3025_v22  ;;  %2303 = vpow2.f32 %v1209_v21  ;;  %v3240_v25 = vmul.f32 1.442695, %v1102_v16  ;;  %871 = vst.msk [vmem:[#allocation2 + $0xd0] sm:$0xff] %vm19_vm3, %v806_v32  ;;  %v141_v24 = vld [vmem:[#allocation2 + $0x1c8] sm:$0xff] }
 0x141   :  { %v2286_v27 = vpop.eup %2285  ;;  %v1995_v34 = vpack.c.bf16 %v1475_v53, %v1475_v53  ;;  %v1255_v20 = vadd.f32 1.0, %v2284_v47  ;;  %2305 = vpow2.f32 %v1155_v44  ;;  %v1068_v22 = vsub.f32 0.0, %v3232_v14 }
 0x142   :  { %v2288_v11 = vpop.eup %2287  ;;  %1764 = vst.msk [vmem:[%s3534_s3 + $0x30] sm:$0xf] %vm1751_vm4, %v1963_v38  ;;  %v1966_v3 = vpack.c.bf16 %v1446_v19, %v1446_v19  ;;  %v1478_v4 = vmul.f32 %v2286_v27, %v3084_v41  ;;  %2307 = vpow2.f32 %v1219_v52  ;;  %v3259_v12 = vmul.f32 1.442695, %v1100_v49  ;;  %v114_v38 = vld [vmem:[#allocation2 + $0xf0] sm:$0xff] }
 0x143   :  { %v2290_v21 = vpop.eup %2289  ;;  %1796 = vst.msk [vmem:[%s3534_s3 + $0xb0] sm:$0xf] %vm1751_vm4, %v1995_v34  ;;  %v1444_v39 = vmul.f32 %v2288_v11, %v3087_v33  ;;  %2309 = vrcp.f32 %v1255_v20  ;;  %v1153_v29 = vmul.f32 1.442695, %v1068_v22  ;;  %v838_v26 = vadd.f32 %v2958_v57, %v142_v46  ;;  %v146_v34 = vld [vmem:[#allocation2 + $0x1f0] sm:$0xff] }
 0x144   :  { %v2292_v30 = vpop.eup %2291  ;;  %1767 = vst.msk [vmem:[%s3534_s3 + $0x3c] sm:$0xf] %vm1751_vm4, %v1966_v3  ;;  %v1998_v41 = vpack.c.bf16 %v1478_v4, %v1478_v4  ;;  %v1287_v44 = vadd.f32 1.0, %v2290_v21  ;;  %2311 = vpow2.f32 %v1151_v45  ;;  %v804_v8 = vadd.f32 %v2966_v5, %v108_v60  ;;  %v144_v3 = vld [vmem:[#allocation2 + $0x1e0] sm:$0xff] }
 0x145   :  { %v2294_v33 = vpop.eup %2293  ;;  %v1964_v52 = vpack.c.bf16 %v1444_v39, %v1444_v39  ;;  %v1258_v63 = vadd.f32 1.0, %v2292_v30  ;;  %2313 = vpow2.f32 %v1215_v55  ;;  %v836_v16 = vadd.f32 %v2968_v13, %v140_v0  ;;  %903 = vst.msk [vmem:[#allocation2 + $0x1d0] sm:$0xff] %vm19_vm3, %v838_v26  ;;  %v147_v30 = vld [vmem:[#allocation2 + $0x1f8] sm:$0xff]  ;;  %v3549_v26 = vld [vmem:[#allocation9_spill] sm:$0xff] }
 0x146   :  { %v2296_v18 = vpop.eup %2295  ;;  %1799 = vst.msk [vmem:[%s3534_s3 + $0xbc] sm:$0xf] %vm1751_vm4, %v1998_v41  ;;  %2315 = vrcp.f32 %v1287_v44  ;;  %v1290_v45 = vadd.f32 1.0, %v2294_v33  ;;  %v807_v47 = vadd.f32 %v2977_v31, %v111_v51  ;;  %v839_v5 = vadd.f32 %v2979_v61, %v143_v42  ;;  %v3544_v31 = vld [vmem:[#allocation4_spill] sm:$0xff]  ;;  %v3545_v61 = vld [vmem:[#allocation5_spill] sm:$0xff] }
 0x147   :  { %v2298_v55 = vpop.eup %2297  ;;  %1765 = vst.msk [vmem:[%s3534_s3 + $0x34] sm:$0xf] %vm1751_vm4, %v1964_v52  ;;  %v1476_v53 = vmul.f32 %v2296_v18, %v3116_v36  ;;  %2317 = vrcp.f32 %v1258_v63  ;;  %v805_v27 = vadd.f32 %v3543_v23, %v109_v9  ;;  %v112_v36 = vld [vmem:[#allocation2 + $0xe0] sm:$0xff]  ;;  %v810_v39 = vadd.f32 %v3545_v61, %v114_v38  ;;  %v113_v41 = vld [vmem:[#allocation2 + $0xe8] sm:$0xff]  ;;  %v938_v33 = vld [vmem:[#allocation2 + $0xd0] sm:$0xff] }
 0x148   :  { %v2300_v19 = vpop.eup %2299  ;;  %v1449_v57 = vmul.f32 %v2298_v55, %v3124_v43  ;;  %2319 = vrcp.f32 %v1290_v45  ;;  %869 = vst.msk [vmem:[#allocation2 + $0xc0] sm:$0xff] %vm19_vm3, %v804_v8  ;;  %901 = vst.msk [vmem:[#allocation2 + $0x1c0] sm:$0xff] %vm19_vm3, %v836_v16  ;;  %v837_v43 = vadd.f32 %v3544_v31, %v141_v24  ;;  %v3548_v52 = vld [vmem:[#allocation8_spill] sm:$0xff]  ;;  %v3302_v45 = vadd.f32 %v3173_v10, %v938_v33  ;;  %v3550_v55 = vld [vmem:[#allocation10_spill] sm:$0xff] }
 0x149   :  { %v2302_v20 = vpop.eup %2301  ;;  %v1996_v11 = vpack.c.bf16 %v1476_v53, %v1476_v53  ;;  %v1256_v13 = vadd.f32 1.0, %v2300_v19  ;;  %2321 = vpow2.f32 %v1157_v1  ;;  %872 = vst.msk [vmem:[#allocation2 + $0xd8] sm:$0xff] %vm19_vm3, %v807_v47  ;;  %904 = vst.msk [vmem:[#allocation2 + $0x1d8] sm:$0xff] %vm19_vm3, %v839_v5  ;;  %v115_v1 = vld [vmem:[#allocation2 + $0xf8] sm:$0xff]  ;;  %v840_v63 = vadd.f32 %v3548_v52, %v144_v3  ;;  %v145_v42 = vld [vmem:[#allocation2 + $0x1e8] sm:$0xff] }
 0x14a   :  { %v2304_v4 = vpop.eup %2303  ;;  %v1969_v22 = vpack.c.bf16 %v1449_v57, %v1449_v57  ;;  %v1481_v21 = vmul.f32 %v2302_v20, %v3139_v6  ;;  %2323 = vpow2.f32 %v3240_v25  ;;  %870 = vst.msk [vmem:[#allocation2 + $0xc8] sm:$0xff] %vm19_vm3, %v805_v27  ;;  %902 = vst.msk [vmem:[#allocation2 + $0x1c8] sm:$0xff] %vm19_vm3, %v837_v43  ;;  %v3546_v6 = vld [vmem:[#allocation6_spill] sm:$0xff]  ;;  %v3547_v25 = vld [vmem:[#allocation7_spill] sm:$0xff]  ;;  %v811_v8 = vadd.f32 %v3549_v26, %v115_v1 }
 0x14b   :  { %v2306_v49 = vpop.eup %2305  ;;  %1797 = vst.msk [vmem:[%s3534_s3 + $0xb4] sm:$0xf] %vm1751_vm4, %v1996_v11  ;;  %2325 = vrcp.f32 %v1256_v13  ;;  %v1288_v32 = vadd.f32 1.0, %v2304_v4  ;;  %v842_v46 = vadd.f32 %v3546_v6, %v146_v34  ;;  %v808_v60 = vadd.f32 %v3547_v25, %v112_v36 }
 0x14c   :  { %v2308_v44 = vpop.eup %2307  ;;  %1770 = vst.msk [vmem:[%s3534_s3 + $0x48] sm:$0xf] %vm1751_vm4, %v1969_v22  ;;  %v2001_v0 = vpack.c.bf16 %v1481_v21, %v1481_v21  ;;  %v1261_v51 = vadd.f32 1.0, %v2306_v49  ;;  %2327 = vpow2.f32 %v1153_v29  ;;  %v843_v53 = vadd.f32 %v3550_v55, %v147_v30  ;;  %v970_v57 = vld [vmem:[#allocation2 + $0x1d0] sm:$0xff] }
 0x14d   :  { %875 = vst.msk [vmem:[#allocation2 + $0xf0] sm:$0xff] %vm19_vm3, %v810_v39  ;;  %v2310_v9 = vpop.eup %2309  ;;  %2329 = vrcp.f32 %v1288_v32  ;;  %v1293_v18 = vadd.f32 1.0, %v2308_v44  ;;  %907 = vst.msk [vmem:[#allocation2 + $0x1f0] sm:$0xff] %vm19_vm3, %v842_v46  ;;  %v809_v16 = vadd.f32 %v3052_v7, %v113_v41  ;;  %v1073_v19 = vsub.f32 0.0, %v3302_v45 }
 0x14e   :  { %873 = vst.msk [vmem:[#allocation2 + $0xe0] sm:$0xff] %vm19_vm3, %v808_v60  ;;  %v2312_v24 = vpop.eup %2311  ;;  %v1447_v29 = vmul.f32 %v2310_v9, %v3147_v37  ;;  %2331 = vrcp.f32 %v1261_v51  ;;  %905 = vst.msk [vmem:[#allocation2 + $0x1e0] sm:$0xff] %vm19_vm3, %v840_v63  ;;  %v841_v23 = vadd.f32 %v3054_v15, %v145_v42  ;;  %v3320_v36 = vadd.f32 %v3173_v10, %v970_v57 }
 0x14f   :  { %1802 = vst.msk [vmem:[%s3534_s3 + $0xc8] sm:$0xf] %vm1751_vm4, %v2001_v0  ;;  %v2314_v47 = vpop.eup %2313  ;;  %2333 = vrcp.f32 %v1293_v18  ;;  %v1259_v38 = vadd.f32 1.0, %v2312_v24  ;;  %v936_v5 = vld [vmem:[#allocation2 + $0xc0] sm:$0xff]  ;;  %v1163_v13 = vmul.f32 1.442695, %v1073_v19 }
 0x150   :  { %876 = vst.msk [vmem:[#allocation2 + $0xf8] sm:$0xff] %vm19_vm3, %v811_v8  ;;  %v2316_v27 = vpop.eup %2315  ;;  %v1967_v37 = vpack.c.bf16 %v1447_v29, %v1447_v29  ;;  %v1291_v34 = vadd.f32 1.0, %v2314_v47  ;;  %2335 = vpow2.f32 %v3259_v12  ;;  %v968_v7 = vld [vmem:[#allocation2 + $0x1c0] sm:$0xff]  ;;  %908 = vst.msk [vmem:[#allocation2 + $0x1f8] sm:$0xff] %vm19_vm3, %v843_v53  ;;  %v3326_v15 = vadd.f32 %v3173_v10, %v936_v5  ;;  %v939_v3 = vld [vmem:[#allocation2 + $0xd8] sm:$0xff] }
 0x151   :  { %874 = vst.msk [vmem:[#allocation2 + $0xe8] sm:$0xff] %vm19_vm3, %v809_v16  ;;  %v2318_v20 = vpop.eup %2317  ;;  %v1479_v11 = vmul.f32 %v2316_v27, %v3176_v28  ;;  %2337 = vrcp.f32 %v1259_v38  ;;  %906 = vst.msk [vmem:[#allocation2 + $0x1e8] sm:$0xff] %vm19_vm3, %v841_v23  ;;  %v1105_v43 = vsub.f32 0.0, %v3320_v36  ;;  %v3336_v28 = vadd.f32 %v3173_v10, %v968_v7  ;;  %v971_v39 = vld [vmem:[#allocation2 + $0x1d8] sm:$0xff]  ;;  %v937_v46 = vld [vmem:[#allocation2 + $0xc8] sm:$0xff] }
 0x152   :  { %v2320_v31 = vpop.eup %2319  ;;  %1768 = vst.msk [vmem:[%s3534_s3 + $0x40] sm:$0xf] %vm1751_vm4, %v1967_v37  ;;  %v1450_v12 = vmul.f32 %v2318_v20, %v3183_v54  ;;  %2339 = vrcp.f32 %v1291_v34  ;;  %v1071_v61 = vsub.f32 0.0, %v3326_v15  ;;  %v3346_v41 = vadd.f32 %v3173_v10, %v939_v3  ;;  %v969_v16 = vld [vmem:[#allocation2 + $0x1c8] sm:$0xff] }
 0x153   :  { %v2322_v4 = vpop.eup %2321  ;;  %v1999_v22 = vpack.c.bf16 %v1479_v11, %v1479_v11  ;;  %v1482_v21 = vmul.f32 %v2320_v31, %v3191_v62  ;;  %2341 = vpow2.f32 %v1163_v13  ;;  %v1227_v6 = vmul.f32 1.442695, %v1105_v43 }
 0x154   :  { %v2324_v1 = vpop.eup %2323  ;;  %v1970_v49 = vpack.c.bf16 %v1450_v12, %v1450_v12  ;;  %v1262_v32 = vadd.f32 1.0, %v2322_v4  ;;  %v1103_v54 = vsub.f32 0.0, %v3336_v28  ;;  %v1159_v62 = vmul.f32 1.442695, %v1071_v61  ;;  %v942_v57 = vld [vmem:[#allocation2 + $0xf0] sm:$0xff] }
 0x155   :  { %v2326_v25 = vpop.eup %2325  ;;  %1800 = vst.msk [vmem:[%s3534_s3 + $0xc0] sm:$0xf] %vm1751_vm4, %v1999_v22  ;;  %v2002_v60 = vpack.c.bf16 %v1482_v21, %v1482_v21  ;;  %v1294_v30 = vadd.f32 1.0, %v2324_v1  ;;  %v3354_v33 = vadd.f32 %v3173_v10, %v971_v39  ;;  %v1074_v42 = vsub.f32 0.0, %v3346_v41  ;;  %v974_v5 = vld [vmem:[#allocation2 + $0x1f0] sm:$0xff]  ;;  %v972_v43 = vld [vmem:[#allocation2 + $0x1e0] sm:$0xff] }
 0x156   :  { %v2328_v44 = vpop.eup %2327  ;;  %1771 = vst.msk [vmem:[%s3534_s3 + $0x4c] sm:$0xf] %vm1751_vm4, %v1970_v49  ;;  %v1448_v0 = vmul.f32 %v2326_v25, %v3199_v35  ;;  %2343 = vrcp.f32 %v1262_v32  ;;  %v1223_v51 = vmul.f32 1.442695, %v1103_v54  ;;  %v3362_v9 = vadd.f32 %v3173_v10, %v937_v46 }
 0x157   :  { %v2330_v52 = vpop.eup %2329  ;;  %1803 = vst.msk [vmem:[%s3534_s3 + $0xcc] sm:$0xf] %vm1751_vm4, %v2002_v60  ;;  %2345 = vrcp.f32 %v1294_v30  ;;  %v1260_v63 = vadd.f32 1.0, %v2328_v44  ;;  %v1106_v8 = vsub.f32 0.0, %v3354_v33  ;;  %v1165_v55 = vmul.f32 1.442695, %v1074_v42 }
 0x158   :  { %v2332_v18 = vpop.eup %2331  ;;  %v1968_v35 = vpack.c.bf16 %v1448_v0, %v1448_v0  ;;  %v1480_v26 = vmul.f32 %v2330_v52, %v3202_v40  ;;  %2347 = vpow2.f32 %v1227_v6  ;;  %v1072_v53 = vsub.f32 0.0, %v3362_v9 }
 0x159   :  { %v2334_v24 = vpop.eup %2333  ;;  %v1453_v29 = vmul.f32 %v2332_v18, %v3208_v48  ;;  %2349 = vrcp.f32 %v1260_v63  ;;  %v1229_v19 = vmul.f32 1.442695, %v1106_v8  ;;  %v3387_v31 = vadd.f32 %v3173_v10, %v942_v57  ;;  %v975_v18 = vld [vmem:[#allocation2 + $0x1f8] sm:$0xff] }
 0x15a   :  { %v2336_v47 = vpop.eup %2335  ;;  %1769 = vst.msk [vmem:[%s3534_s3 + $0x44] sm:$0xf] %vm1751_vm4, %v1968_v35  ;;  %v2000_v38 = vpack.c.bf16 %v1480_v26, %v1480_v26  ;;  %v1485_v40 = vmul.f32 %v2334_v24, %v3211_v59  ;;  %2351 = vpow2.f32 %v1159_v62  ;;  %v1161_v37 = vmul.f32 1.442695, %v1072_v53  ;;  %v941_v24 = vld [vmem:[#allocation2 + $0xe8] sm:$0xff] }
 0x15b   :  { %v2338_v23 = vpop.eup %2337  ;;  %v1973_v48 = vpack.c.bf16 %v1453_v29, %v1453_v29  ;;  %v1292_v27 = vadd.f32 1.0, %v2336_v47  ;;  %2353 = vpow2.f32 %v1223_v51  ;;  %v3379_v59 = vadd.f32 %v3173_v10, %v969_v16  ;;  %v973_v16 = vld [vmem:[#allocation2 + $0x1e8] sm:$0xff] }
 0x15c   :  { %v2340_v34 = vpop.eup %2339  ;;  %1801 = vst.msk [vmem:[%s3534_s3 + $0xc4] sm:$0xf] %vm1751_vm4, %v2000_v38  ;;  %v2005_v7 = vpack.c.bf16 %v1485_v40, %v1485_v40  ;;  %v1451_v20 = vmul.f32 %v2338_v23, %v3214_v17  ;;  %2355 = vpow2.f32 %v1165_v55  ;;  %v3390_v12 = vadd.f32 %v3173_v10, %v974_v5  ;;  %v940_v17 = vld [vmem:[#allocation2 + $0xe0] sm:$0xff] }
 0x15d   :  { %v2342_v11 = vpop.eup %2341  ;;  %1774 = vst.msk [vmem:[%s3534_s3 + $0x58] sm:$0xf] %vm1751_vm4, %v1973_v48  ;;  %v1483_v13 = vmul.f32 %v2340_v34, %v3218_v56  ;;  %2357 = vrcp.f32 %v1292_v27  ;;  %v1104_v22 = vsub.f32 0.0, %v3379_v59  ;;  %v943_v56 = vld [vmem:[#allocation2 + $0xf8] sm:$0xff]  ;;  %v1077_v61 = vsub.f32 0.0, %v3387_v31 }
 0x15e   :  { %1806 = vst.msk [vmem:[%s3534_s3 + $0xd8] sm:$0xf] %vm1751_vm4, %v2005_v7  ;;  %v1971_v3 = vpack.c.bf16 %v1451_v20, %v1451_v20  ;;  %v1265_v4 = vadd.f32 1.0, %v2342_v11  ;;  %2359 = vpow2.f32 %v1229_v19  ;;  %v1109_v39 = vsub.f32 0.0, %v3390_v12 }
 0x15f   :  { %v2003_v21 = vpack.c.bf16 %v1483_v13, %v1483_v13  ;;  %2361 = vpow2.f32 %v1161_v37  ;;  %v1225_v49 = vmul.f32 1.442695, %v1104_v22  ;;  %v3404_v32 = vadd.f32 %v3173_v10, %v940_v17 }
 0x160   :  { %v2344_v1 = vpop.eup %2343  ;;  %1772 = vst.msk [vmem:[%s3534_s3 + $0x50] sm:$0xf] %vm1751_vm4, %v1971_v3  ;;  %2363 = vrcp.f32 %v1265_v4  ;;  %v3407_v6 = vadd.f32 %v3173_v10, %v972_v43  ;;  %v1171_v25 = vmul.f32 1.442695, %v1077_v61  ;;  %v1235_v60 = vmul.f32 1.442695, %v1109_v39 }
 0x161   :  { %v2346_v54 = vpop.eup %2345  ;;  %1804 = vst.msk [vmem:[%s3534_s3 + $0xd0] sm:$0xf] %vm1751_vm4, %v2003_v21  ;;  %v1454_v46 = vmul.f32 %v2344_v1, %v3224_v50  ;;  %v3415_v30 = vadd.f32 %v3173_v10, %v943_v56  ;;  %2365 = vpow2.f32 %v1225_v49  ;;  %v1075_v0 = vsub.f32 0.0, %v3404_v32 }
 0x162   :  { %v2348_v62 = vpop.eup %2347  ;;  %v1486_v44 = vmul.f32 %v2346_v54, %v3227_v2  ;;  %v1107_v51 = vsub.f32 0.0, %v3407_v6  ;;  %2367 = vpow2.f32 %v1171_v25  ;;  %v3431_v40 = vadd.f32 %v3173_v10, %v975_v18 }
 0x163   :  { %v2350_v52 = vpop.eup %2349  ;;  %v1974_v63 = vpack.c.bf16 %v1454_v46, %v1454_v46  ;;  %v1297_v42 = vadd.f32 1.0, %v2348_v62  ;;  %2369 = vpow2.f32 %v1235_v60  ;;  %v1167_v8 = vmul.f32 1.442695, %v1075_v0 }
 0x164   :  { %v2352_v35 = vpop.eup %2351  ;;  %v2006_v50 = vpack.c.bf16 %v1486_v44, %v1486_v44  ;;  %v1452_v26 = vmul.f32 %v2350_v52, %v3232_v14  ;;  %v1231_v55 = vmul.f32 1.442695, %v1107_v51  ;;  %v1078_v53 = vsub.f32 0.0, %v3415_v30 }
 0x165   :  { %v2354_v29 = vpop.eup %2353  ;;  %1775 = vst.msk [vmem:[%s3534_s3 + $0x5c] sm:$0xf] %vm1751_vm4, %v1974_v63  ;;  %2371 = vrcp.f32 %v1297_v42  ;;  %v1263_v2 = vadd.f32 1.0, %v2352_v35  ;;  %v3434_v5 = vadd.f32 %v3173_v10, %v941_v24  ;;  %v1110_v27 = vsub.f32 0.0, %v3431_v40 }
 0x166   :  { %v2356_v47 = vpop.eup %2355  ;;  %1807 = vst.msk [vmem:[%s3534_s3 + $0xdc] sm:$0xf] %vm1751_vm4, %v2006_v50  ;;  %v1972_v14 = vpack.c.bf16 %v1452_v26, %v1452_v26  ;;  %v1295_v38 = vadd.f32 1.0, %v2354_v29  ;;  %2373 = vpow2.f32 %v1167_v8  ;;  %v3443_v37 = vadd.f32 %v3173_v10, %v973_v16 }
 0x167   :  { %v2358_v19 = vpop.eup %2357  ;;  %2375 = vrcp.f32 %v1263_v2  ;;  %v1266_v57 = vadd.f32 1.0, %v2356_v47  ;;  %v1173_v20 = vmul.f32 1.442695, %v1078_v53  ;;  %v1076_v11 = vsub.f32 0.0, %v3434_v5 }
 0x168   :  { %v2360_v23 = vpop.eup %2359  ;;  %1773 = vst.msk [vmem:[%s3534_s3 + $0x54] sm:$0xf] %vm1751_vm4, %v1972_v14  ;;  %v1484_v48 = vmul.f32 %v2358_v19, %v3237_v58  ;;  %2377 = vrcp.f32 %v1295_v38  ;;  %v1237_v3 = vmul.f32 1.442695, %v1110_v27  ;;  %v1108_v10 = vsub.f32 0.0, %v3443_v37 }
 0x169   :  { %v2362_v34 = vpop.eup %2361  ;;  %2379 = vrcp.f32 %v1266_v57  ;;  %v1298_v7 = vadd.f32 1.0, %v2360_v23  ;;  %v1169_v1 = vmul.f32 1.442695, %v1076_v11 }
 0x16a   :  { %v2364_v13 = vpop.eup %2363  ;;  %v2004_v17 = vpack.c.bf16 %v1484_v48, %v1484_v48  ;;  %v1264_v43 = vadd.f32 1.0, %v2362_v34  ;;  %2381 = vpow2.f32 %v1231_v55  ;;  %v1233_v25 = vmul.f32 1.442695, %v1108_v10 }
 0x16b   :  { %v1457_v4 = vmul.f32 %v2364_v13, %v3302_v45  ;;  %2383 = vrcp.f32 %v1298_v7  ;;  %v2366_v58 = vpop.eup %2365 }
 0x16c   :  { %1805 = vst.msk [vmem:[%s3534_s3 + $0xd4] sm:$0xf] %vm1751_vm4, %v2004_v17  ;;  %2385 = vrcp.f32 %v1264_v43  ;;  %v2368_v22 = vpop.eup %2367  ;;  %v1296_v21 = vadd.f32 1.0, %v2366_v58 }
 0x16d   :  { %v1977_v56 = vpack.c.bf16 %v1457_v4, %v1457_v4  ;;  %2387 = vpow2.f32 %v1173_v20  ;;  %v2370_v61 = vpop.eup %2369  ;;  %v1269_v39 = vadd.f32 1.0, %v2368_v22 }
 0x16e   :  { %2389 = vpow2.f32 %v1237_v3  ;;  %v1301_v45 = vadd.f32 1.0, %v2370_v61 }
 0x16f   :  { %v2372_v49 = vpop.eup %2371  ;;  %1778 = vst.msk [vmem:[%s3534_s3 + $0x68] sm:$0xf] %vm1751_vm4, %v1977_v56  ;;  %2391 = vrcp.f32 %v1296_v21 }
 0x170   :  { %v2374_v54 = vpop.eup %2373  ;;  %v1489_v46 = vmul.f32 %v2372_v49, %v3320_v36  ;;  %2393 = vrcp.f32 %v1269_v39 }
 0x171   :  { %v2376_v60 = vpop.eup %2375  ;;  %2395 = vrcp.f32 %v1301_v45  ;;  %v1267_v62 = vadd.f32 1.0, %v2374_v54 }
 0x172   :  { %v2378_v44 = vpop.eup %2377  ;;  %v2009_v0 = vpack.c.bf16 %v1489_v46, %v1489_v46  ;;  %v1455_v51 = vmul.f32 %v2376_v60, %v3326_v15  ;;  %2397 = vpow2.f32 %v1169_v1 }
 0x173   :  { %v2380_v52 = vpop.eup %2379  ;;  %v1487_v63 = vmul.f32 %v2378_v44, %v3336_v28  ;;  %2399 = vrcp.f32 %v1267_v62 }
 0x174   :  { %v2382_v42 = vpop.eup %2381  ;;  %1810 = vst.msk [vmem:[%s3534_s3 + $0xe8] sm:$0xf] %vm1751_vm4, %v2009_v0  ;;  %v1975_v36 = vpack.c.bf16 %v1455_v51, %v1455_v51  ;;  %v1458_v18 = vmul.f32 %v2380_v52, %v3346_v41  ;;  %2401 = vpow2.f32 %v1233_v25 }
 0x175   :  { %v2384_v35 = vpop.eup %2383  ;;  %v2007_v50 = vpack.c.bf16 %v1487_v63, %v1487_v63  ;;  %v1299_v26 = vadd.f32 1.0, %v2382_v42 }
 0x176   :  { %v2386_v8 = vpop.eup %2385  ;;  %1776 = vst.msk [vmem:[%s3534_s3 + $0x60] sm:$0xf] %vm1751_vm4, %v1975_v36  ;;  %v1978_v15 = vpack.c.bf16 %v1458_v18, %v1458_v18  ;;  %v1490_v28 = vmul.f32 %v2384_v35, %v3354_v33 }
 0x177   :  { %v2388_v24 = vpop.eup %2387  ;;  %1808 = vst.msk [vmem:[%s3534_s3 + $0xe0] sm:$0xf] %vm1751_vm4, %v2007_v50  ;;  %v1456_v41 = vmul.f32 %v2386_v8, %v3362_v9  ;;  %2403 = vrcp.f32 %v1299_v26 }
 0x178   :  { %v2390_v29 = vpop.eup %2389  ;;  %1779 = vst.msk [vmem:[%s3534_s3 + $0x6c] sm:$0xf] %vm1751_vm4, %v1978_v15  ;;  %v2010_v2 = vpack.c.bf16 %v1490_v28, %v1490_v28  ;;  %v1270_v55 = vadd.f32 1.0, %v2388_v24 }
 0x179   :  { %v2392_v53 = vpop.eup %2391  ;;  %v1976_v16 = vpack.c.bf16 %v1456_v41, %v1456_v41  ;;  %v1302_v33 = vadd.f32 1.0, %v2390_v29 }
 0x17a   :  { %v2394_v47 = vpop.eup %2393  ;;  %1811 = vst.msk [vmem:[%s3534_s3 + $0xec] sm:$0xf] %vm1751_vm4, %v2010_v2  ;;  %v1488_v9 = vmul.f32 %v2392_v53, %v3379_v59  ;;  %2405 = vrcp.f32 %v1270_v55 }
 0x17b   :  { %v2396_v14 = vpop.eup %2395  ;;  %1777 = vst.msk [vmem:[%s3534_s3 + $0x64] sm:$0xf] %vm1751_vm4, %v1976_v16  ;;  %v1461_v38 = vmul.f32 %v2394_v47, %v3387_v31  ;;  %2407 = vrcp.f32 %v1302_v33 }
 0x17c   :  { %v2398_v19 = vpop.eup %2397  ;;  %v2008_v57 = vpack.c.bf16 %v1488_v9, %v1488_v9  ;;  %v1493_v23 = vmul.f32 %v2396_v14, %v3390_v12 }
 0x17d   :  { %v2400_v48 = vpop.eup %2399  ;;  %v1981_v27 = vpack.c.bf16 %v1461_v38, %v1461_v38  ;;  %v1268_v34 = vadd.f32 1.0, %v2398_v19 }
 0x17e   :  { %v2402_v7 = vpop.eup %2401  ;;  %1809 = vst.msk [vmem:[%s3534_s3 + $0xe4] sm:$0xf] %vm1751_vm4, %v2008_v57  ;;  %v2013_v59 = vpack.c.bf16 %v1493_v23, %v1493_v23  ;;  %v1459_v20 = vmul.f32 %v2400_v48, %v3404_v32 }
 0x17f   :  { %1782 = vst.msk [vmem:[%s3534_s3 + $0x78] sm:$0xf] %vm1751_vm4, %v1981_v27  ;;  %2409 = vrcp.f32 %v1268_v34  ;;  %v1300_v31 = vadd.f32 1.0, %v2402_v7 }
 0x180   :  { %1814 = vst.msk [vmem:[%s3534_s3 + $0xf8] sm:$0xf] %vm1751_vm4, %v2013_v59  ;;  %v1979_v12 = vpack.c.bf16 %v1459_v20, %v1459_v20 }
 0x181   :  { %v2404_v11 = vpop.eup %2403  ;;  %2411 = vrcp.f32 %v1300_v31 }
 0x182   :  { %1780 = vst.msk [vmem:[%s3534_s3 + $0x70] sm:$0xf] %vm1751_vm4, %v1979_v12  ;;  %v1491_v32 = vmul.f32 %v2404_v11, %v3407_v6 }
 0x184   :  { %v2406_v13 = vpop.eup %2405  ;;  %v2011_v17 = vpack.c.bf16 %v1491_v32, %v1491_v32 }
 0x185   :  { %v2408_v43 = vpop.eup %2407  ;;  %v1462_v3 = vmul.f32 %v2406_v13, %v3415_v30 }
 0x186   :  { %1812 = vst.msk [vmem:[%s3534_s3 + $0xf0] sm:$0xf] %vm1751_vm4, %v2011_v17  ;;  %v1494_v4 = vmul.f32 %v2408_v43, %v3431_v40 }
 0x187   :  { %v1982_v58 = vpack.c.bf16 %v1462_v3, %v1462_v3 }
 0x188   :  { %v2014_v10 = vpack.c.bf16 %v1494_v4, %v1494_v4 }
 0x189   :  { %v2410_v22 = vpop.eup %2409  ;;  %1783 = vst.msk [vmem:[%s3534_s3 + $0x7c] sm:$0xf] %vm1751_vm4, %v1982_v58 }
 0x18a   :  { %1815 = vst.msk [vmem:[%s3534_s3 + $0xfc] sm:$0xf] %vm1751_vm4, %v2014_v10  ;;  %v1460_v6 = vmul.f32 %v2410_v22, %v3434_v5 }
 0x18b   :  { %v2412_v30 = vpop.eup %2411 }
 0x18c   :  { %v1980_v56 = vpack.c.bf16 %v1460_v6, %v1460_v6  ;;  %v1492_v21 = vmul.f32 %v2412_v30, %v3443_v37 }
 0x18e   :  { %1781 = vst.msk [vmem:[%s3534_s3 + $0x74] sm:$0xf] %vm1751_vm4, %v1980_v56  ;;  %v2012_v40 = vpack.c.bf16 %v1492_v21, %v1492_v21 }
 0x190   :  { %1813 = vst.msk [vmem:[%s3534_s3 + $0xf4] sm:$0xf] %vm1751_vm4, %v2012_v40 }

// kernel: _encode_impl.7
= control target key start
LH: loop header
LB: loop body
LE: loop exit
PB: predicated region body
PF: predicated region fallthrough
CT: control target
= control target key end

     0   :  { %s81_s0 = inlined_call_operand.vmem [shape: f32[2], index: 0, kind: input, shape index: {}]   ;;  %s82_s1 = inlined_call_operand.vmem [shape: f32[8,128], index: 1, kind: input, shape index: {}]   ;;  %s83_s2 = inlined_call_operand.vmem [shape: f32[8,128], index: 2, kind: input, shape index: {}]   ;;  %s84_s3 = inlined_call_operand.vmem [shape: f32[8,128], index: 3, kind: output, shape index: {}]  }
   0x1   :  { %s8_s14 = sshll.u32 %s81_s0, 4  ;;  %s9_s14 = int_to_ptr.vmem [resolvable:$true] %s8_s14 }
   0x2   :  { %s34_s15 = scalar_lea.vmem %s9_s14, 16  ;;  %p39_p1 = scmp.lt.s32.totalorder %s9_s14, %s9_s14 }
   0x3   :  { %p35_p0 = scmp.ne.s32.totalorder %s9_s14, %s34_s15  ;;  %p40_p2 = scmp.lt.s32.totalorder %s34_s15, %s34_s15 }
   0x5   :  { %p41_p3 = por %p40_p2, %p39_p1 }
   0x7   :  { %p42_p4 = pnand %p41_p3, %p35_p0 }
   0x9   :  { %45 = shalt.err (!%p42_p4)  }
   0xa   :  { %s48_s16 = smov [#allocation3]  }
   0xb   :  { %11 = dma.vmem_to_smem %s9_s14, 16, %s48_s16, [#allocation2] }
   0xc   :  { %46 = dma.done.wait [#allocation2], 16 }
   0xd   :  { %47 = vsyncadd [#allocation2], 4294967280 }
   0xe   :  { %13 = sfence }
   0xf   :  { %s18_s17 = sld [smem:[#allocation3]]  ;;  %s32_s18 = sld [smem:[#allocation3 + $0x1]]  ;;  %v19_v0 = vld [vmem:[%s82_s1] sm:$0xff] }
  0x10   :  { %v23_v1 = vld [vmem:[%s83_s2] sm:$0xff] }
  0x15   :  { %v20_v2 = vstv %s18_s17  ;;  %v24_v3 = vstv %s32_s18 }
  0x16   :  { %v21_v4 = vmul.f32 %v20_v2, %v19_v0  ;;  %v25_v5 = vmul.f32 %v24_v3, %v23_v1 }
  0x18   :  { %v26_v6 = vadd.f32 %v25_v5, %v21_v4 }
  0x1a   :  { %27 = vst [vmem:[%s84_s3] sm:$0xff] %v26_v6 }

// kernel: _encode_impl.6
= control target key start
LH: loop header
LB: loop body
LE: loop exit
PB: predicated region body
PF: predicated region fallthrough
CT: control target
= control target key end

     0   :  { %vm19_vm0 = vcmask 64512   ;;  %v264_v0 = vmov 0   ;;  %v265_v2 = vmov 0.0   ;;  %vm122_vm1 = vcmask 130048   ;;  %s352_s1 = inlined_call_operand.vmem [shape: bf16[144,8], index: 1, kind: input, shape index: {}]   ;;  %s353_s0 = inlined_call_operand.vmem [shape: bf16[32,144], index: 0, kind: input, shape index: {}]   ;;  %s354_s2 = inlined_call_operand.vmem [shape: f32[1,8], index: 2, kind: input, shape index: {}]   ;;  %s355_s3 = inlined_call_operand.vmem [shape: f32[32,8], index: 3, kind: output, shape index: {}]  }
   0x1   :  { %129 = vmatprep.subr.bf16.mxu0 %v264_v0  ;;  %229 = vmatprep.subr.bf16.mxu1 %v264_v0  ;;  %v249_v1 = vld [vmem:[%s352_s1] sm:$0xff]   ;;  %20 = vst.msk [vmem:[#allocation2] sm:$0xff] %vm19_vm0, %v265_v2  ;;  %21 = vst.msk [vmem:[#allocation2 + $0x8] sm:$0xff] %vm19_vm0, %v265_v2  ;;  %v250_v3 = vld [vmem:[%s352_s1 + $0x8] sm:$0xff]  }
   0x2   :  { %22 = vst.msk [vmem:[#allocation2 + $0x10] sm:$0xff] %vm19_vm0, %v265_v2  ;;  %23 = vst.msk [vmem:[#allocation2 + $0x18] sm:$0xff] %vm19_vm0, %v265_v2  ;;  %130 = vmatpush1.bf16.msra.mxu0 %v249_v1  ;;  %238 = vmatpush1.bf16.msra.mxu1 %v249_v1  ;;  %v251_v4 = vld [vmem:[%s352_s1 + $0x10] sm:$0xff]   ;;  %v252_v5 = vld [vmem:[%s352_s1 + $0x18] sm:$0xff]  }
   0x3   :  { %131 = vmatprep.subr.bf16.mxu0 %v264_v0  ;;  %230 = vmatprep.subr.bf16.mxu1 %v264_v0  ;;  %v260_v6 = vld [vmem:[%s353_s0 + $0x4] ss:$8 sps:$4 sm:$0xff]   ;;  %v263_v7 = vld [vmem:[%s353_s0 + $0x14] ss:$8 sps:$4 sm:$0xff]   ;;  %v258_v13 = vld [vmem:[%s353_s0] ss:$8 sps:$4 sm:$0xff]  }
   0x4   :  { %226 = vmatprep.mubr.msk.bf16.mxu0 %vm122_vm1, %v260_v6  ;;  %227 = vmatprep.mubr.msk.bf16.mxu1 %vm122_vm1, %v263_v7  ;;  %v253_v8 = vld [vmem:[%s352_s1 + $0x20] sm:$0xff]   ;;  %v254_v9 = vld [vmem:[%s352_s1 + $0x28] sm:$0xff]   ;;  %v255_v10 = vld [vmem:[%s352_s1 + $0x30] sm:$0xff]  }
   0x5   :  { %v256_v11 = vld [vmem:[%s352_s1 + $0x38] sm:$0xff]   ;;  %v257_v12 = vld [vmem:[%s352_s1 + $0x40] sm:$0xff]  }
   0x6   :  { %132 = vmatpush1.bf16.msra.mxu0 %v250_v3  ;;  %239 = vmatpush1.bf16.msra.mxu1 %v250_v3  ;;  %v261_v14 = vld [vmem:[%s353_s0 + $0x10] ss:$8 sps:$4 sm:$0xff]   ;;  %v228_v31 = vld [vmem:[%s354_s2] ss:$0 sm:$0xff] }
   0x7   :  { %133 = vmatprep.subr.bf16.mxu0 %v264_v0  ;;  %231 = vmatprep.subr.bf16.mxu1 %v264_v0 }
   0x8   :  { %v24_v15 = vld [vmem:[#allocation2] sm:$0xff]  ;;  %v25_v19 = vld [vmem:[#allocation2 + $0x8] sm:$0xff] }
   0x9   :  { %v26_v16 = vld [vmem:[#allocation2 + $0x10] sm:$0xff]  ;;  %v27_v20 = vld [vmem:[#allocation2 + $0x18] sm:$0xff] }
   0xa   :  { %134 = vmatpush1.bf16.msra.mxu0 %v251_v4  ;;  %240 = vmatpush1.bf16.msra.mxu1 %v251_v4 }
   0xb   :  { %135 = vmatprep.subr.bf16.mxu0 %v264_v0  ;;  %232 = vmatprep.subr.bf16.mxu1 %v264_v0 }
   0xe   :  { %136 = vmatpush1.bf16.msra.mxu0 %v252_v5  ;;  %241 = vmatpush1.bf16.msra.mxu1 %v252_v5 }
   0xf   :  { %137 = vmatprep.subr.bf16.mxu0 %v264_v0  ;;  %233 = vmatprep.subr.bf16.mxu1 %v264_v0 }
  0x12   :  { %138 = vmatpush1.bf16.msra.mxu0 %v253_v8  ;;  %242 = vmatpush1.bf16.msra.mxu1 %v253_v8 }
  0x13   :  { %139 = vmatprep.subr.bf16.mxu0 %v264_v0  ;;  %234 = vmatprep.subr.bf16.mxu1 %v264_v0 }
  0x16   :  { %140 = vmatpush1.bf16.msra.mxu0 %v254_v9  ;;  %243 = vmatpush1.bf16.msra.mxu1 %v254_v9 }
  0x17   :  { %141 = vmatprep.subr.bf16.mxu0 %v264_v0  ;;  %235 = vmatprep.subr.bf16.mxu1 %v264_v0 }
  0x1a   :  { %142 = vmatpush1.bf16.msra.mxu0 %v255_v10  ;;  %244 = vmatpush1.bf16.msra.mxu1 %v255_v10 }
  0x1b   :  { %143 = vmatprep.subr.bf16.mxu0 %v264_v0  ;;  %236 = vmatprep.subr.bf16.mxu1 %v264_v0 }
  0x1e   :  { %144 = vmatpush1.bf16.msra.mxu0 %v256_v11  ;;  %245 = vmatpush1.bf16.msra.mxu1 %v256_v11 }
  0x1f   :  { %145 = vmatprep.subr.bf16.mxu0 %v264_v0  ;;  %237 = vmatprep.subr.bf16.mxu1 %v264_v0 }
  0x22   :  { %146 = vmatpush1.bf16.msra.mxu0 %v257_v12  ;;  %246 = vmatpush1.bf16.msra.mxu1 %v257_v12 }
  0x25   :  { %162 = vmatmul.mubr.bf16.vlgmr.msra.gmra.mrb[0].mxu0 %v258_v13  ;;  %170 = vmatmul.mubr.bf16.vlgmr.msra.gmra.mrb[0].mxu1 %v261_v14 }
  0xf8   :  { %v163_v17 = vpop.f32.mrb[0].mxu0  ;;  %v171_v18 = vpop.f32.mrb[0].mxu1 }
  0xf9   :  { %v178_v21 = vadd.f32 %v163_v17, %v24_v15  ;;  %v180_v22 = vadd.f32 %v171_v18, %v26_v16  ;;  %v165_v23 = vpop.f32.mrb[1].mxu0  ;;  %v173_v24 = vpop.f32.mrb[1].mxu1 }
  0xfa   :  { %v166_v25 = vpop.f32.mrb[2].mxu0  ;;  %v174_v26 = vpop.f32.mrb[2].mxu1 }
  0xfb   :  { %183 = vst.msk [vmem:[#allocation2] sm:$0xff] %vm19_vm0, %v178_v21  ;;  %185 = vst.msk [vmem:[#allocation2 + $0x10] sm:$0xff] %vm19_vm0, %v180_v22  ;;  %v179_v27 = vadd.f32 %v166_v25, %v25_v19  ;;  %v181_v28 = vadd.f32 %v174_v26, %v27_v20  ;;  %v168_v29 = vpop.f32.mrb[3].mxu0  ;;  %v176_v30 = vpop.f32.mrb[3].mxu1 }
  0xfd   :  { %184 = vst.msk [vmem:[#allocation2 + $0x8] sm:$0xff] %vm19_vm0, %v179_v27  ;;  %186 = vst.msk [vmem:[#allocation2 + $0x18] sm:$0xff] %vm19_vm0, %v181_v28 }
 0x102   :  { %v190_v32 = vld [vmem:[#allocation2] sm:$0xff]  ;;  %v192_v33 = vld [vmem:[#allocation2 + $0x10] sm:$0xff] }
 0x103   :  { %v201_v34 = vadd.f32 %v228_v31, %v190_v32  ;;  %v203_v35 = vadd.f32 %v228_v31, %v192_v33 }
 0x104   :  { %v191_v36 = vld [vmem:[#allocation2 + $0x8] sm:$0xff]  ;;  %v193_v37 = vld [vmem:[#allocation2 + $0x18] sm:$0xff] }
 0x105   :  { %205 = vst.msk [vmem:[%s355_s3] sm:$0xff] %vm19_vm0, %v201_v34  ;;  %207 = vst.msk [vmem:[%s355_s3 + $0x10] sm:$0xff] %vm19_vm0, %v203_v35  ;;  %v202_v38 = vadd.f32 %v228_v31, %v191_v36  ;;  %v204_v39 = vadd.f32 %v228_v31, %v193_v37 }
 0x107   :  { %206 = vst.msk [vmem:[%s355_s3 + $0x8] sm:$0xff] %vm19_vm0, %v202_v38  ;;  %208 = vst.msk [vmem:[%s355_s3 + $0x18] sm:$0xff] %vm19_vm0, %v204_v39 }

</bundles_post_ra>
